<compile_context>
chip_gen: v7x
topology: tpu7x:2x2x1
jax: 0.10.0
libtpu: 0.0.40
codegen_flags: <defaults>
</compile_context>

<pallas_src>
import math
import jax
import jax.numpy as jnp
from jax.experimental import pallas as pl
from jax.experimental.pallas import tpu as pltpu

BN_EPS = 1e-5

_CPARAMS = pltpu.CompilerParams(
    dimension_semantics=("parallel", "parallel"),
    vmem_limit_bytes=32 * 1024 * 1024,
)


def _choose_row_tile(Ho, Wo, cin, cout, vmem_budget=4 * 1024 * 1024, max_rows=512):
    """Largest even divisor of Ho whose tile fits the VMEM budget / row cap."""
    per_row = Wo * (32 * cin + 8 * cout)   # band + u + im2col + acc, generous bytes/row
    tro = 2
    for cand in range(2, Ho + 1, 2):
        if Ho % cand != 0:
            continue
        if cand * per_row > vmem_budget or cand * Wo > max_rows:
            continue
        tro = cand
    return tro


# -------- kernel 1: height-upsample + 3x3 conv (+bias) + partial BN stats -------------
def _up_conv3x3_kernel(xw_ref, w_ref, b_ref, z_ref, stats_ref):
    # xw_ref   : (H+2, Wo+2, Cin) bf16 — width already 2x-upsampled, H edge-padded
    #            (upsample border clamping), W zero-padded (conv padding).
    # w_ref    : (9*Cin, Cout)    bf16 — 3x3 taps flattened tap-major (k = 3*dy + dx).
    # b_ref    : (1, Cout)        f32  — conv bias (cancels under batch-stat BN, but kept
    #            for exact parity with the PyTorch compute; it is one cheap VPU add).
    # z_ref    : (TRo, Wo, Cout)  f32  — pre-BN conv output tile.
    # stats_ref: (2, Cout)        f32  — per-tile [sum, sum-of-squares] of z rows.
    TRo, Wo, Cout = z_ref.shape
    Cin = xw_ref.shape[-1]
    HALF = TRo // 2
    TRi = HALF + 2

    t = pl.program_id(1)
    nt = pl.num_programs(1)

    k0 = pl.multiple_of(t * HALF, HALF)
    band = xw_ref[pl.ds(k0, TRi), :, :].astype(jnp.float32)        # (TRi, Wo+2, Cin)

    # Height 2x bilinear upsample (align_corners=False). With xe the edge-padded rows:
    #   up[2k]   = 0.25*xe[k]   + 0.75*xe[k+1]
    #   up[2k+1] = 0.75*xe[k+1] + 0.25*xe[k+2]
    ue = 0.25 * band[0:HALF] + 0.75 * band[1:HALF + 1]
    uo = 0.75 * band[1:HALF + 1] + 0.25 * band[2:HALF + 2]
    mid = jnp.stack([ue, uo], axis=1).reshape(TRo, Wo + 2, Cin)

    # Conv halo rows: zero at the true image border (conv zero padding), otherwise the
    # adjacent upsampled rows reconstructed from the same band.
    top_w = jnp.where(t > 0, 1.0, 0.0)
    bot_w = jnp.where(t < nt - 1, 1.0, 0.0)
    top = top_w * (0.75 * band[0:1] + 0.25 * band[1:2])
    bot = bot_w * (0.25 * band[TRi - 2:TRi - 1] + 0.75 * band[TRi - 1:TRi])

    u = jnp.concatenate([top, mid, bot], axis=0).astype(jnp.bfloat16)  # (TRo+2, Wo+2, Cin)

    # im2col -> single big-K matmul on the MXU (bf16 in, f32 accumulate).
    taps = [u[dy:dy + TRo, dx:dx + Wo, :] for dy in range(3) for dx in range(3)]
    patch = jnp.concatenate(taps, axis=-1).reshape(TRo * Wo, 9 * Cin)
    z = jnp.dot(patch, w_ref[...], preferred_element_type=jnp.float32) + b_ref[...]

    # Partial BatchNorm statistics for this tile (two-pass batch BN; finalize outside).
    stats_ref[...] = jnp.concatenate(
        [jnp.sum(z, axis=0, keepdims=True),
         jnp.sum(z * z, axis=0, keepdims=True)], axis=0)
    z_ref[...] = z.reshape(TRo, Wo, Cout)


def _up_conv3x3(xw, w9, b2, TRo):
    N, Hp, Wp2, Cin = xw.shape
    Wo = Wp2 - 2
    Ho = 2 * (Hp - 2)
    Cout = w9.shape[-1]
    T = Ho // TRo
    return pl.pallas_call(
        _up_conv3x3_kernel,
        out_shape=(jax.ShapeDtypeStruct((N, Ho, Wo, Cout), jnp.float32),
                   jax.ShapeDtypeStruct((N * T, 2, Cout), jnp.float32)),
        grid=(N, T),
        in_specs=[
            pl.BlockSpec((None, Hp, Wp2, Cin), lambda n, t: (n, 0, 0, 0)),
            pl.BlockSpec((9 * Cin, Cout), lambda n, t: (0, 0)),
            pl.BlockSpec((1, Cout), lambda n, t: (0, 0)),
        ],
        out_specs=(
            pl.BlockSpec((None, TRo, Wo, Cout), lambda n, t: (n, t, 0, 0)),
            pl.BlockSpec((None, 2, Cout), lambda n, t: (n * T + t, 0, 0)),
        ),
        compiler_params=_CPARAMS,
    )(xw, w9, b2)


# -------- kernel 2: BatchNorm finalize + PReLU -----------------------------------------
def _bn_prelu_kernel(z_ref, sc_ref, sh_ref, a_ref, y_ref):
    z = z_ref[...]
    y = z * sc_ref[...] + sh_ref[...]
    a = a_ref[0, 0]
    y_ref[...] = jnp.where(y >= 0.0, y, a * y)


def _bn_prelu(z, scale, shift, alpha, TRo):
    N, Ho, Wo, Cout = z.shape
    T = Ho // TRo
    return pl.pallas_call(
        _bn_prelu_kernel,
        out_shape=jax.ShapeDtypeStruct((N, Ho, Wo, Cout), jnp.float32),
        grid=(N, T),
        in_specs=[
            pl.BlockSpec((None, TRo, Wo, Cout), lambda n, t: (n, t, 0, 0)),
            pl.BlockSpec((1, Cout), lambda n, t: (0, 0)),
            pl.BlockSpec((1, Cout), lambda n, t: (0, 0)),
            pl.BlockSpec((1, 1), lambda n, t: (0, 0)),
        ],
        out_specs=pl.BlockSpec((None, TRo, Wo, Cout), lambda n, t: (n, t, 0, 0)),
        compiler_params=_CPARAMS,
    )(z, scale, shift, alpha)


# -------- module parameters + forward ---------------------------------------------------
def init_params(key, in_channels, out_channels):
    k1, k2 = jax.random.split(key)
    bound = 1.0 / math.sqrt(9 * in_channels)
    return {
        'conv_w': jax.random.uniform(k1, (3, 3, in_channels, out_channels),
                                     jnp.float32, -bound, bound),   # HWIO
        'conv_b': jax.random.uniform(k2, (out_channels,), jnp.float32, -bound, bound),
        'bn_g': jnp.ones((out_channels,), jnp.float32),
        'bn_b': jnp.zeros((out_channels,), jnp.float32),
        'prelu_a': jnp.full((1,), 0.25, jnp.float32),   # PReLU default single parameter
    }


def psp_upsample_forward(x_nchw, params):
    """PSPUpsample.forward: 2x bilinear upsample -> conv3x3(pad=1) -> BN -> PReLU."""
    x = jnp.transpose(x_nchw, (0, 2, 3, 1)).astype(jnp.float32)   # NHWC
    N, H, W, Cin = x.shape
    Cout = params['conv_w'].shape[-1]
    Ho, Wo = 2 * H, 2 * W
    TRo = _choose_row_tile(Ho, Wo, Cin, Cout)

    # Width 2x bilinear upsample (align_corners=False, matching F.upsample's default),
    # H edge-pad (gives the upsample's border clamping) and conv zero-pad columns.
    # Cheap plain-JAX glue on the LOW-RES input, stored bf16; the 4x-larger upsampled
    # activation never hits HBM — the height upsample runs inside the conv kernel.
    # TODO(synk): the width interleave could also be fused into the kernel, at the cost
    # of an in-kernel sublane-interleaving relayout.
    xe = jnp.pad(x, ((0, 0), (1, 1), (1, 1), (0, 0)), mode='edge')   # (N, H+2, W+2, Cin)
    ev = 0.25 * xe[:, :, 0:W, :] + 0.75 * xe[:, :, 1:W + 1, :]
    od = 0.75 * xe[:, :, 1:W + 1, :] + 0.25 * xe[:, :, 2:W + 2, :]
    xw = jnp.stack([ev, od], axis=3).reshape(N, H + 2, Wo, Cin)
    xw = jnp.pad(xw, ((0, 0), (0, 0), (1, 1), (0, 0))).astype(jnp.bfloat16)

    w9 = params['conv_w'].reshape(9 * Cin, Cout).astype(jnp.bfloat16)
    b2 = params['conv_b'].reshape(1, Cout).astype(jnp.float32)

    z, stats = _up_conv3x3(xw, w9, b2, TRo)

    # Training-mode BatchNorm2d: biased batch statistics over (N, H, W), eps=1e-5.
    cnt = jnp.float32(N * Ho * Wo)
    mean = jnp.sum(stats[:, 0, :], axis=0) / cnt
    var = jnp.maximum(jnp.sum(stats[:, 1, :], axis=0) / cnt - mean * mean, 0.0)
    inv = jax.lax.rsqrt(var + BN_EPS)
    scale = (params['bn_g'] * inv).reshape(1, Cout).astype(jnp.float32)
    shift = (params['bn_b'] - params['bn_g'] * inv * mean).reshape(1, Cout).astype(jnp.float32)
    alpha = params['prelu_a'].reshape(1, 1).astype(jnp.float32)

    y = _bn_prelu(z, scale, shift, alpha, TRo)
    return jnp.transpose(y, (0, 3, 1, 2))   # back to NCHW: (N, Cout, 2H, 2W)


if __name__ == "__main__":
    key = jax.random.PRNGKey(0)
    kx, kp = jax.random.split(key)
    N, Cin, H, W = 2, 8, 16, 16
    Cout = 32
    x = jax.random.uniform(kx, (N, Cin, H, W), dtype=jnp.float32)
    params = init_params(kp, Cin, Cout)

    fwd = jax.jit(psp_upsample_forward)
    out = fwd(x, params)
    jax.block_until_ready(out)
    assert out.shape == (N, Cout, 2 * H, 2 * W)
    print("KERNEL_OK")
</pallas_src>

<mosaic_0001>
module attributes {stable_mosaic.version = 11 : i64} {
  func.func @_up_conv3x3_kernel(%arg0: i32, %arg1: i32, %arg2: memref<1x18x34x8xbf16, #tpu.memory_space<vmem>>, %arg3: memref<72x32xbf16, #tpu.memory_space<vmem>>, %arg4: memref<1x32xf32, #tpu.memory_space<vmem>>, %arg5: memref<1x16x32x32xf32, #tpu.memory_space<vmem>>, %arg6: memref<1x2x32xf32, #tpu.memory_space<vmem>>) attributes {dimension_semantics = [#tpu.dimension_semantics<parallel>, #tpu.dimension_semantics<parallel>], iteration_bounds = array<i64: 2, 2>, scalar_prefetch = 0 : i64, scratch_operands = 0 : i64, tpu.core_type = #tpu.core_type<tc>, window_params = [{transform_indices = @transform_0, window_bounds = array<i64: 1, 18, 34, 8>}, {pipeline_mode = #tpu.pipeline_mode<synchronous>, transform_indices = @transform_1, window_bounds = array<i64: 72, 32>}, {pipeline_mode = #tpu.pipeline_mode<synchronous>, transform_indices = @transform_2, window_bounds = array<i64: 1, 32>}, {transform_indices = @transform_3, window_bounds = array<i64: 1, 16, 32, 32>}, {transform_indices = @transform_4, window_bounds = array<i64: 1, 2, 32>}]} {
    %c8_i32 = arith.constant 8 : i32
    %0 = arith.muli %arg1, %c8_i32 : i32
    %1 = tpu.assume_multiple %0, 8 : i32
    %c0 = arith.constant 0 : index
    %2 = arith.index_cast %1 : i32 to index
    %c0_0 = arith.constant 0 : index
    %c0_1 = arith.constant 0 : index
    %3 = vector.load %arg2[%c0, %2, %c0_0, %c0_1] : memref<1x18x34x8xbf16, #tpu.memory_space<vmem>>, vector<1x10x34x8xbf16>
    %4 = vector.shape_cast %3 : vector<1x10x34x8xbf16> to vector<10x34x8xbf16>
    %5 = arith.extf %4 : vector<10x34x8xbf16> to vector<10x34x8xf32>
    %6 = vector.extract_strided_slice %5 {offsets = [0, 0, 0], sizes = [8, 34, 8], strides = [1, 1, 1]} : vector<10x34x8xf32> to vector<8x34x8xf32>
    %cst = arith.constant 2.500000e-01 : f32
    %7 = vector.broadcast %cst : f32 to vector<8x34x8xf32>
    %8 = arith.mulf %7, %6 : vector<8x34x8xf32>
    %9 = vector.extract_strided_slice %5 {offsets = [1, 0, 0], sizes = [8, 34, 8], strides = [1, 1, 1]} : vector<10x34x8xf32> to vector<8x34x8xf32>
    %cst_2 = arith.constant 7.500000e-01 : f32
    %10 = vector.broadcast %cst_2 : f32 to vector<8x34x8xf32>
    %11 = arith.mulf %10, %9 : vector<8x34x8xf32>
    %12 = arith.addf %8, %11 : vector<8x34x8xf32>
    %13 = vector.extract_strided_slice %5 {offsets = [1, 0, 0], sizes = [8, 34, 8], strides = [1, 1, 1]} : vector<10x34x8xf32> to vector<8x34x8xf32>
    %cst_3 = arith.constant 7.500000e-01 : f32
    %14 = vector.broadcast %cst_3 : f32 to vector<8x34x8xf32>
    %15 = arith.mulf %14, %13 : vector<8x34x8xf32>
    %16 = vector.extract_strided_slice %5 {offsets = [2, 0, 0], sizes = [8, 34, 8], strides = [1, 1, 1]} : vector<10x34x8xf32> to vector<8x34x8xf32>
    %cst_4 = arith.constant 2.500000e-01 : f32
    %17 = vector.broadcast %cst_4 : f32 to vector<8x34x8xf32>
    %18 = arith.mulf %17, %16 : vector<8x34x8xf32>
    %19 = arith.addf %15, %18 : vector<8x34x8xf32>
    %20 = vector.shape_cast %12 : vector<8x34x8xf32> to vector<8x1x34x8xf32>
    %21 = vector.shape_cast %19 : vector<8x34x8xf32> to vector<8x1x34x8xf32>
    %22 = tpu.concatenate %20, %21 in 1 : vector<8x1x34x8xf32>, vector<8x1x34x8xf32> -> vector<8x2x34x8xf32>
    %23 = vector.shape_cast %22 : vector<8x2x34x8xf32> to vector<16x34x8xf32>
    %c0_i32 = arith.constant 0 : i32
    %24 = arith.cmpi sgt, %arg1, %c0_i32 : i32
    %cst_5 = arith.constant 1.000000e+00 : f32
    %cst_6 = arith.constant 0.000000e+00 : f32
    %25 = arith.select %24, %cst_5, %cst_6 : f32
    %c1_i32 = arith.constant 1 : i32
    %26 = arith.cmpi slt, %arg1, %c1_i32 : i32
    %cst_7 = arith.constant 1.000000e+00 : f32
    %cst_8 = arith.constant 0.000000e+00 : f32
    %27 = arith.select %26, %cst_7, %cst_8 : f32
    %28 = vector.extract_strided_slice %5 {offsets = [0, 0, 0], sizes = [1, 34, 8], strides = [1, 1, 1]} : vector<10x34x8xf32> to vector<1x34x8xf32>
    %cst_9 = arith.constant 7.500000e-01 : f32
    %29 = vector.broadcast %cst_9 : f32 to vector<1x34x8xf32>
    %30 = arith.mulf %29, %28 : vector<1x34x8xf32>
    %31 = vector.extract_strided_slice %5 {offsets = [1, 0, 0], sizes = [1, 34, 8], strides = [1, 1, 1]} : vector<10x34x8xf32> to vector<1x34x8xf32>
    %cst_10 = arith.constant 2.500000e-01 : f32
    %32 = vector.broadcast %cst_10 : f32 to vector<1x34x8xf32>
    %33 = arith.mulf %32, %31 : vector<1x34x8xf32>
    %34 = arith.addf %30, %33 : vector<1x34x8xf32>
    %35 = vector.broadcast %25 : f32 to vector<1x34x8xf32>
    %36 = arith.mulf %35, %34 : vector<1x34x8xf32>
    %37 = vector.extract_strided_slice %5 {offsets = [8, 0, 0], sizes = [1, 34, 8], strides = [1, 1, 1]} : vector<10x34x8xf32> to vector<1x34x8xf32>
    %cst_11 = arith.constant 2.500000e-01 : f32
    %38 = vector.broadcast %cst_11 : f32 to vector<1x34x8xf32>
    %39 = arith.mulf %38, %37 : vector<1x34x8xf32>
    %40 = vector.extract_strided_slice %5 {offsets = [9, 0, 0], sizes = [1, 34, 8], strides = [1, 1, 1]} : vector<10x34x8xf32> to vector<1x34x8xf32>
    %cst_12 = arith.constant 7.500000e-01 : f32
    %41 = vector.broadcast %cst_12 : f32 to vector<1x34x8xf32>
    %42 = arith.mulf %41, %40 : vector<1x34x8xf32>
    %43 = arith.addf %39, %42 : vector<1x34x8xf32>
    %44 = vector.broadcast %27 : f32 to vector<1x34x8xf32>
    %45 = arith.mulf %44, %43 : vector<1x34x8xf32>
    %46 = tpu.concatenate %36, %23, %45 in 0 : vector<1x34x8xf32>, vector<16x34x8xf32>, vector<1x34x8xf32> -> vector<18x34x8xf32>
    %47 = arith.truncf %46 : vector<18x34x8xf32> to vector<18x34x8xbf16>
    %48 = vector.extract_strided_slice %47 {offsets = [0, 0, 0], sizes = [16, 32, 8], strides = [1, 1, 1]} : vector<18x34x8xbf16> to vector<16x32x8xbf16>
    %49 = vector.extract_strided_slice %47 {offsets = [0, 1, 0], sizes = [16, 32, 8], strides = [1, 1, 1]} : vector<18x34x8xbf16> to vector<16x32x8xbf16>
    %50 = vector.extract_strided_slice %47 {offsets = [0, 2, 0], sizes = [16, 32, 8], strides = [1, 1, 1]} : vector<18x34x8xbf16> to vector<16x32x8xbf16>
    %51 = vector.extract_strided_slice %47 {offsets = [1, 0, 0], sizes = [16, 32, 8], strides = [1, 1, 1]} : vector<18x34x8xbf16> to vector<16x32x8xbf16>
    %52 = vector.extract_strided_slice %47 {offsets = [1, 1, 0], sizes = [16, 32, 8], strides = [1, 1, 1]} : vector<18x34x8xbf16> to vector<16x32x8xbf16>
    %53 = vector.extract_strided_slice %47 {offsets = [1, 2, 0], sizes = [16, 32, 8], strides = [1, 1, 1]} : vector<18x34x8xbf16> to vector<16x32x8xbf16>
    %54 = vector.extract_strided_slice %47 {offsets = [2, 0, 0], sizes = [16, 32, 8], strides = [1, 1, 1]} : vector<18x34x8xbf16> to vector<16x32x8xbf16>
    %55 = vector.extract_strided_slice %47 {offsets = [2, 1, 0], sizes = [16, 32, 8], strides = [1, 1, 1]} : vector<18x34x8xbf16> to vector<16x32x8xbf16>
    %56 = vector.extract_strided_slice %47 {offsets = [2, 2, 0], sizes = [16, 32, 8], strides = [1, 1, 1]} : vector<18x34x8xbf16> to vector<16x32x8xbf16>
    %57 = tpu.concatenate %48, %49, %50, %51, %52, %53, %54, %55, %56 in 2 : vector<16x32x8xbf16>, vector<16x32x8xbf16>, vector<16x32x8xbf16>, vector<16x32x8xbf16>, vector<16x32x8xbf16>, vector<16x32x8xbf16>, vector<16x32x8xbf16>, vector<16x32x8xbf16>, vector<16x32x8xbf16> -> vector<16x32x72xbf16>
    %58 = vector.shape_cast %57 : vector<16x32x72xbf16> to vector<512x72xbf16>
    %c0_13 = arith.constant 0 : index
    %c0_14 = arith.constant 0 : index
    %59 = vector.load %arg3[%c0_13, %c0_14] : memref<72x32xbf16, #tpu.memory_space<vmem>>, vector<72x32xbf16>
    %cst_15 = arith.constant dense<0.000000e+00> : vector<512x32xf32>
    %60 = tpu.matmul %58, %59, %cst_15 {dimension_numbers = #tpu.dot_dimension_numbers<[1], [0], [0], [1], [0, 0, 1, 1], [], []>} : vector<512x72xbf16>, vector<72x32xbf16>, vector<512x32xf32> -> vector<512x32xf32>
    %c0_16 = arith.constant 0 : index
    %c0_17 = arith.constant 0 : index
    %61 = vector.load %arg4[%c0_16, %c0_17] : memref<1x32xf32, #tpu.memory_space<vmem>>, vector<1x32xf32>
    %62 = vector.broadcast %61 : vector<1x32xf32> to vector<512x32xf32>
    %63 = arith.addf %60, %62 : vector<512x32xf32>
    %cst_18 = arith.constant dense<0.000000e+00> : vector<32xf32>
    %64 = vector.multi_reduction <add>, %63, %cst_18 [0] : vector<512x32xf32> to vector<32xf32>
    %65 = vector.shape_cast %64 : vector<32xf32> to vector<1x32xf32>
    %66 = arith.mulf %63, %63 : vector<512x32xf32>
    %cst_19 = arith.constant dense<0.000000e+00> : vector<32xf32>
    %67 = vector.multi_reduction <add>, %66, %cst_19 [0] : vector<512x32xf32> to vector<32xf32>
    %68 = vector.shape_cast %67 : vector<32xf32> to vector<1x32xf32>
    %69 = tpu.concatenate %65, %68 in 0 : vector<1x32xf32>, vector<1x32xf32> -> vector<2x32xf32>
    %c0_20 = arith.constant 0 : index
    %c0_21 = arith.constant 0 : index
    %c0_22 = arith.constant 0 : index
    %70 = vector.load %arg6[%c0_20, %c0_21, %c0_22] : memref<1x2x32xf32, #tpu.memory_space<vmem>>, vector<1x2x32xf32>
    %71 = vector.shape_cast %70 : vector<1x2x32xf32> to vector<2x32xf32>
    %72 = vector.shape_cast %69 : vector<2x32xf32> to vector<1x2x32xf32>
    tpu.vector_store %arg6[%c0_20, %c0_21, %c0_22], %72 {strides = array<i32>} : memref<1x2x32xf32, #tpu.memory_space<vmem>>, vector<1x2x32xf32>,
    %73 = vector.shape_cast %63 : vector<512x32xf32> to vector<16x32x32xf32>
    %c0_23 = arith.constant 0 : index
    %c0_24 = arith.constant 0 : index
    %c0_25 = arith.constant 0 : index
    %c0_26 = arith.constant 0 : index
    %74 = vector.load %arg5[%c0_23, %c0_24, %c0_25, %c0_26] : memref<1x16x32x32xf32, #tpu.memory_space<vmem>>, vector<1x16x32x32xf32>
    %75 = vector.shape_cast %74 : vector<1x16x32x32xf32> to vector<16x32x32xf32>
    %76 = vector.shape_cast %73 : vector<16x32x32xf32> to vector<1x16x32x32xf32>
    tpu.vector_store %arg5[%c0_23, %c0_24, %c0_25, %c0_26], %76 {strides = array<i32>} : memref<1x16x32x32xf32, #tpu.memory_space<vmem>>, vector<1x16x32x32xf32>,
    return
  }
  func.func @transform_0(%arg0: i32, %arg1: i32) -> (i32, i32, i32, i32) {
    %c0_i32 = arith.constant 0 : i32
    %c0_i32_0 = arith.constant 0 : i32
    %c0_i32_1 = arith.constant 0 : i32
    %c0_i32_2 = arith.constant 0 : i32
    return %arg0, %c0_i32, %c0_i32_0, %c0_i32_1 : i32, i32, i32, i32
  }
  func.func @transform_1(%arg0: i32, %arg1: i32) -> (i32, i32) {
    %c0_i32 = arith.constant 0 : i32
    %c0_i32_0 = arith.constant 0 : i32
    %c0_i32_1 = arith.constant 0 : i32
    return %c0_i32, %c0_i32_0 : i32, i32
  }
  func.func @transform_2(%arg0: i32, %arg1: i32) -> (i32, i32) {
    %c0_i32 = arith.constant 0 : i32
    %c0_i32_0 = arith.constant 0 : i32
    %c0_i32_1 = arith.constant 0 : i32
    return %c0_i32, %c0_i32_0 : i32, i32
  }
  func.func @transform_3(%arg0: i32, %arg1: i32) -> (i32, i32, i32, i32) {
    %c0_i32 = arith.constant 0 : i32
    %c0_i32_0 = arith.constant 0 : i32
    %c0_i32_1 = arith.constant 0 : i32
    return %arg0, %arg1, %c0_i32, %c0_i32_0 : i32, i32, i32, i32
  }
  func.func @transform_4(%arg0: i32, %arg1: i32) -> (i32, i32, i32) {
    %c2_i32 = arith.constant 2 : i32
    %0 = arith.muli %arg0, %c2_i32 : i32
    %1 = arith.addi %0, %arg1 : i32
    %c0_i32 = arith.constant 0 : i32
    %c0_i32_0 = arith.constant 0 : i32
    %c0_i32_1 = arith.constant 0 : i32
    return %1, %c0_i32, %c0_i32_0 : i32, i32, i32
  }
}

module attributes {stable_mosaic.version = 11 : i64} {
  func.func @_bn_prelu_kernel(%arg0: i32, %arg1: i32, %arg2: memref<1x16x32x32xf32, #tpu.memory_space<vmem>>, %arg3: memref<1x32xf32, #tpu.memory_space<vmem>>, %arg4: memref<1x32xf32, #tpu.memory_space<vmem>>, %arg5: memref<1x1xf32, #tpu.memory_space<vmem>>, %arg6: memref<1x16x32x32xf32, #tpu.memory_space<vmem>>) attributes {dimension_semantics = [#tpu.dimension_semantics<parallel>, #tpu.dimension_semantics<parallel>], iteration_bounds = array<i64: 2, 2>, scalar_prefetch = 0 : i64, scratch_operands = 0 : i64, tpu.core_type = #tpu.core_type<tc>, window_params = [{transform_indices = @transform_0, window_bounds = array<i64: 1, 16, 32, 32>}, {pipeline_mode = #tpu.pipeline_mode<synchronous>, transform_indices = @transform_1, window_bounds = array<i64: 1, 32>}, {pipeline_mode = #tpu.pipeline_mode<synchronous>, transform_indices = @transform_2, window_bounds = array<i64: 1, 32>}, {pipeline_mode = #tpu.pipeline_mode<synchronous>, transform_indices = @transform_3, window_bounds = array<i64: 1, 1>}, {transform_indices = @transform_4, window_bounds = array<i64: 1, 16, 32, 32>}]} {
    %c0 = arith.constant 0 : index
    %c0_0 = arith.constant 0 : index
    %c0_1 = arith.constant 0 : index
    %c0_2 = arith.constant 0 : index
    %0 = vector.load %arg2[%c0, %c0_0, %c0_1, %c0_2] : memref<1x16x32x32xf32, #tpu.memory_space<vmem>>, vector<1x16x32x32xf32>
    %1 = vector.shape_cast %0 : vector<1x16x32x32xf32> to vector<16x32x32xf32>
    %c0_3 = arith.constant 0 : index
    %c0_4 = arith.constant 0 : index
    %2 = vector.load %arg3[%c0_3, %c0_4] : memref<1x32xf32, #tpu.memory_space<vmem>>, vector<1x32xf32>
    %3 = vector.shape_cast %2 : vector<1x32xf32> to vector<1x1x32xf32>
    %4 = vector.broadcast %3 : vector<1x1x32xf32> to vector<16x32x32xf32>
    %5 = arith.mulf %1, %4 : vector<16x32x32xf32>
    %c0_5 = arith.constant 0 : index
    %c0_6 = arith.constant 0 : index
    %6 = vector.load %arg4[%c0_5, %c0_6] : memref<1x32xf32, #tpu.memory_space<vmem>>, vector<1x32xf32>
    %7 = vector.shape_cast %6 : vector<1x32xf32> to vector<1x1x32xf32>
    %8 = vector.broadcast %7 : vector<1x1x32xf32> to vector<16x32x32xf32>
    %9 = arith.addf %5, %8 : vector<16x32x32xf32>
    %c0_7 = arith.constant 0 : index
    %c0_8 = arith.constant 0 : index
    %10 = vector.load %arg5[%c0_7, %c0_8] : memref<1x1xf32, #tpu.memory_space<vmem>>, vector<1x1xf32>
    %11 = vector.extract %10[0, 0] : f32 from vector<1x1xf32>
    %cst = arith.constant 0.000000e+00 : f32
    %12 = vector.broadcast %cst : f32 to vector<16x32x32xf32>
    %13 = arith.cmpf oge, %9, %12 : vector<16x32x32xf32>
    %14 = vector.broadcast %11 : f32 to vector<16x32x32xf32>
    %15 = arith.mulf %14, %9 : vector<16x32x32xf32>
    %16 = arith.select %13, %9, %15 : vector<16x32x32xi1>, vector<16x32x32xf32>
    %c0_9 = arith.constant 0 : index
    %c0_10 = arith.constant 0 : index
    %c0_11 = arith.constant 0 : index
    %c0_12 = arith.constant 0 : index
    %17 = vector.load %arg6[%c0_9, %c0_10, %c0_11, %c0_12] : memref<1x16x32x32xf32, #tpu.memory_space<vmem>>, vector<1x16x32x32xf32>
    %18 = vector.shape_cast %17 : vector<1x16x32x32xf32> to vector<16x32x32xf32>
    %19 = vector.shape_cast %16 : vector<16x32x32xf32> to vector<1x16x32x32xf32>
    tpu.vector_store %arg6[%c0_9, %c0_10, %c0_11, %c0_12], %19 {strides = array<i32>} : memref<1x16x32x32xf32, #tpu.memory_space<vmem>>, vector<1x16x32x32xf32>,
    return
  }
  func.func @transform_0(%arg0: i32, %arg1: i32) -> (i32, i32, i32, i32) {
    %c0_i32 = arith.constant 0 : i32
    %c0_i32_0 = arith.constant 0 : i32
    %c0_i32_1 = arith.constant 0 : i32
    return %arg0, %arg1, %c0_i32, %c0_i32_0 : i32, i32, i32, i32
  }
  func.func @transform_1(%arg0: i32, %arg1: i32) -> (i32, i32) {
    %c0_i32 = arith.constant 0 : i32
    %c0_i32_0 = arith.constant 0 : i32
    %c0_i32_1 = arith.constant 0 : i32
    return %c0_i32, %c0_i32_0 : i32, i32
  }
  func.func @transform_2(%arg0: i32, %arg1: i32) -> (i32, i32) {
    %c0_i32 = arith.constant 0 : i32
    %c0_i32_0 = arith.constant 0 : i32
    %c0_i32_1 = arith.constant 0 : i32
    return %c0_i32, %c0_i32_0 : i32, i32
  }
  func.func @transform_3(%arg0: i32, %arg1: i32) -> (i32, i32) {
    %c0_i32 = arith.constant 0 : i32
    %c0_i32_0 = arith.constant 0 : i32
    %c0_i32_1 = arith.constant 0 : i32
    return %c0_i32, %c0_i32_0 : i32, i32
  }
  func.func @transform_4(%arg0: i32, %arg1: i32) -> (i32, i32, i32, i32) {
    %c0_i32 = arith.constant 0 : i32
    %c0_i32_0 = arith.constant 0 : i32
    %c0_i32_1 = arith.constant 0 : i32
    return %arg0, %arg1, %c0_i32, %c0_i32_0 : i32, i32, i32, i32
  }
}

</mosaic_0001>

<bundles_post_ra>
// kernel: psp_upsample_forward.3
= control target key start
LH: loop header
LB: loop body
LE: loop exit
PB: predicated region body
PF: predicated region fallthrough
CT: control target
= control target key end

     0   :  { %s936_s17 = smov 0   ;;  %s938_s18 = smov 0   ;;  %s2145_s0 = inlined_call_operand.vmem [shape: f32[2,32,32,32], index: 0, kind: input, shape index: {}]   ;;  %s2146_s1 = inlined_call_operand.vmem [shape: f32[1,32], index: 1, kind: input, shape index: {}]   ;;  %s2147_s2 = inlined_call_operand.vmem [shape: f32[1,32], index: 2, kind: input, shape index: {}]   ;;  %s2148_s3 = inlined_call_operand.<no memory space> [shape: f32[1,1], index: 3, kind: input, shape index: {}]   ;;  %s2149_s4 = inlined_call_operand.vmem [shape: f32[2,32,32,32], index: 4, kind: output, shape index: {}]  }
   0x1   :  { %v9_v0 = vstv %s2148_s3  ;;  %s940_s19 = smov 0   ;;  %s942_s20 = smov 0  }
   0x2   :  { %10 = vst [vmem:[#allocation2] sm:$0x1] %v9_v0  ;;  %s944_s21 = smov 0  }
   0x3 LB: > { %s25_s3 = sadd.s32 1, %s898_s19  ;;  %s28_s22 = sadd.s32 1, %s902_s20  ;;  %s906_s21 = sphi %s944_s21, %s16_s21   ;;  %s902_s20 = sphi %s942_s20, %s2410_s20   ;;  %s898_s19 = sphi %s940_s19, %s2409_s19   ;;  %s894_s18 = sphi %s938_s18, %s2408_s18   ;;  %s890_s17 = sphi %s936_s17, %s2407_s17  }
   0x4   : > { %p26_p0 = scmp.ge.s32.totalorder %s25_s3, 2  ;;  %p813_p1 = scmp.ge.s32.totalorder %s906_s21, 1 }
   0x5   : > { %p186_p2 = scmp.lt.s32.totalorder %s906_s21, 5 }
   0x6   : > { %s2412_s3 = smov (%p26_p0, %s25_s3), 0  ;;  %s2414_s22 = smov (!%p26_p0, %s28_s22), %s902_s20 }
   0x7   : > { %p187_p3 = pnand %p813_p1, %p186_p2  ;;  %p30_p4 = scmp.ge.s32.totalorder %s2414_s22, 2 }
   0x9   : > { %s2416_s22 = smov (%p30_p4, %s2414_s22), 0  ;;  %190 = sbr.rel (%p187_p3) target bundleno = 138 (0x8a), region = 36 }
  0x10   : > { %s814_s23 = sshll.u32 %s890_s17, 4  ;;  %p223_p5 = scmp.lt.s32.totalorder %s894_s18, 1  ;;  %v450_v1 = vld [vmem:[#allocation2] sm:$0x1]  ;;  %vm645_vm8 = vcmask 261120  }
  0x11   : > { %p225_p6 = scmp.lt.s32.totalorder %s814_s23, 31  ;;  %826 = vpush %v450_v1  ;;  %v980_v3 = vld [vmem:[%s2146_s1] ss:$0 sm:$0xff] }
  0x12   : > { %s2418_s18 = smov (!%p223_p5, %s894_s18), 1  ;;  %v990_v9 = vld [vmem:[%s2147_s2] ss:$0 sm:$0xff] }
  0x13   : > { %s2420_s23 = smov (!%p225_p6, %s814_s23), 31  ;;  %s816_s25 = sshll.u32 %s2418_s18, 7 }
  0x14   : > { %s815_s24 = sshll.u32 %s2420_s23, 2 }
  0x15   : > { %s966_s26 = sadd.s32 %s816_s25, %s815_s24 }
  0x16   : > { %s817_s27 = sshll.u32 %s966_s26, 3 }
  0x17   : > { %s974_s30 = scalar_lea.vmem %s2145_s0, %s817_s27  ;;  %s1684_s12 = scalar_lea.vmem %s2149_s4, %s817_s27 }
  0x18   : > { %v244_v2 = vld [vmem:[%s974_s30] sm:$0xff]  ;;  %v245_v4 = vld [vmem:[%s974_s30 + $0x8] sm:$0xff]  ;;  %v246_v5 = vld [vmem:[%s974_s30 + $0x10] sm:$0xff] }
  0x19   : > { %v247_v6 = vld [vmem:[%s974_s30 + $0x18] sm:$0xff]  ;;  %v248_v7 = vld [vmem:[%s974_s30 + $0x20] sm:$0xff]  ;;  %v249_v8 = vld [vmem:[%s974_s30 + $0x28] sm:$0xff]  ;;  %v315_v13 = vmul.f32 %v980_v3, %v244_v2  ;;  %v316_v17 = vmul.f32 %v980_v3, %v245_v4  ;;  %v317_v21 = vmul.f32 %v980_v3, %v246_v5 }
  0x1a   : > { %v250_v10 = vld [vmem:[%s974_s30 + $0x30] sm:$0xff]  ;;  %v251_v11 = vld [vmem:[%s974_s30 + $0x38] sm:$0xff]  ;;  %v252_v12 = vld [vmem:[%s974_s30 + $0x40] sm:$0xff]  ;;  %v318_v22 = vmul.f32 %v980_v3, %v247_v6  ;;  %v319_v23 = vmul.f32 %v980_v3, %v248_v7  ;;  %v320_v27 = vmul.f32 %v980_v3, %v249_v8 }
  0x1b   : > { %v253_v14 = vld [vmem:[%s974_s30 + $0x48] sm:$0xff]  ;;  %v254_v15 = vld [vmem:[%s974_s30 + $0x50] sm:$0xff]  ;;  %v255_v16 = vld [vmem:[%s974_s30 + $0x58] sm:$0xff]  ;;  %v321_v28 = vmul.f32 %v980_v3, %v250_v10  ;;  %v322_v29 = vmul.f32 %v980_v3, %v251_v11  ;;  %v1013_v30 = vmul.f32 %v980_v3, %v252_v12  ;;  %v1028_v37 = vadd.f32 %v990_v9, %v315_v13 }
  0x1c   : > { %v256_v18 = vld [vmem:[%s974_s30 + $0x60] sm:$0xff]  ;;  %v257_v19 = vld [vmem:[%s974_s30 + $0x68] sm:$0xff]  ;;  %v258_v20 = vld [vmem:[%s974_s30 + $0x70] sm:$0xff]  ;;  %v1019_v34 = vmul.f32 %v980_v3, %v253_v14  ;;  %v1022_v35 = vmul.f32 %v980_v3, %v254_v15  ;;  %v1025_v36 = vmul.f32 %v980_v3, %v255_v16  ;;  %v1043_v44 = vadd.f32 %v990_v9, %v316_v17 }
  0x1d   : > { %v259_v24 = vld [vmem:[%s974_s30 + $0x78] sm:$0xff]  ;;  %v260_v25 = vld [vmem:[%s974_s30 + $0x80] sm:$0xff]  ;;  %v261_v26 = vld [vmem:[%s974_s30 + $0x88] sm:$0xff]  ;;  %v1034_v41 = vmul.f32 %v980_v3, %v256_v18  ;;  %v1037_v42 = vmul.f32 %v980_v3, %v257_v19  ;;  %v1040_v43 = vmul.f32 %v980_v3, %v258_v20  ;;  %v1058_v51 = vadd.f32 %v990_v9, %v317_v21 }
  0x1e   : > { %v262_v31 = vld [vmem:[%s974_s30 + $0x90] sm:$0xff]  ;;  %v263_v32 = vld [vmem:[%s974_s30 + $0x98] sm:$0xff]  ;;  %v264_v33 = vld [vmem:[%s974_s30 + $0xa0] sm:$0xff]  ;;  %v1049_v48 = vmul.f32 %v980_v3, %v259_v24  ;;  %v1052_v49 = vmul.f32 %v980_v3, %v260_v25  ;;  %v1055_v50 = vmul.f32 %v980_v3, %v261_v26  ;;  %v1073_v58 = vadd.f32 %v990_v9, %v318_v22 }
  0x1f   : > { %v265_v38 = vld [vmem:[%s974_s30 + $0xa8] sm:$0xff]  ;;  %v266_v39 = vld [vmem:[%s974_s30 + $0xb0] sm:$0xff]  ;;  %v267_v40 = vld [vmem:[%s974_s30 + $0xb8] sm:$0xff]  ;;  %v1064_v55 = vmul.f32 %v980_v3, %v262_v31  ;;  %v1067_v56 = vmul.f32 %v980_v3, %v263_v32  ;;  %v1070_v57 = vmul.f32 %v980_v3, %v264_v33  ;;  %v1088_v1 = vadd.f32 %v990_v9, %v319_v23 }
  0x20   : > { %v268_v45 = vld [vmem:[%s974_s30 + $0xc0] sm:$0xff]  ;;  %v269_v46 = vld [vmem:[%s974_s30 + $0xc8] sm:$0xff]  ;;  %v270_v47 = vld [vmem:[%s974_s30 + $0xd0] sm:$0xff]  ;;  %v1079_v62 = vmul.f32 %v980_v3, %v265_v38  ;;  %v1082_v63 = vmul.f32 %v980_v3, %v266_v39  ;;  %v1085_v0 = vmul.f32 %v980_v3, %v267_v40  ;;  %v1103_v10 = vadd.f32 %v990_v9, %v320_v27 }
  0x21   : > { %v271_v52 = vld [vmem:[%s974_s30 + $0xd8] sm:$0xff]  ;;  %v272_v53 = vld [vmem:[%s974_s30 + $0xe0] sm:$0xff]  ;;  %v273_v54 = vld [vmem:[%s974_s30 + $0xe8] sm:$0xff]  ;;  %2187 = vst [vmem:[#allocation3_spill] sm:$0xff] %v1088_v1  ;;  %v1094_v6 = vmul.f32 %v980_v3, %v268_v45  ;;  %v1097_v7 = vmul.f32 %v980_v3, %v269_v46  ;;  %v1100_v8 = vmul.f32 %v980_v3, %v270_v47  ;;  %v1118_v17 = vadd.f32 %v990_v9, %v321_v28 }
  0x22   : > { %v274_v59 = vld [vmem:[%s974_s30 + $0xf0] sm:$0xff]  ;;  %v275_v60 = vld [vmem:[%s974_s30 + $0xf8] sm:$0xff]  ;;  %v276_v61 = vld [vmem:[%s974_s30 + $0x100] sm:$0xff]  ;;  %2188 = vst [vmem:[#allocation4_spill] sm:$0xff] %v1103_v10  ;;  %v1109_v14 = vmul.f32 %v980_v3, %v271_v52  ;;  %v1112_v15 = vmul.f32 %v980_v3, %v272_v53  ;;  %v1115_v16 = vmul.f32 %v980_v3, %v273_v54  ;;  %v1133_v24 = vadd.f32 %v990_v9, %v322_v29 }
  0x23   : > { %v277_v2 = vld [vmem:[%s974_s30 + $0x108] sm:$0xff]  ;;  %v278_v4 = vld [vmem:[%s974_s30 + $0x110] sm:$0xff]  ;;  %v279_v5 = vld [vmem:[%s974_s30 + $0x118] sm:$0xff]  ;;  %2189 = vst [vmem:[#allocation5_spill] sm:$0xff] %v1118_v17  ;;  %v1124_v21 = vmul.f32 %v980_v3, %v274_v59  ;;  %v1127_v22 = vmul.f32 %v980_v3, %v275_v60  ;;  %v1130_v23 = vmul.f32 %v980_v3, %v276_v61  ;;  %v1149_v33 = vadd.f32 %v990_v9, %v1013_v30 }
  0x24   : > { %v280_v11 = vld [vmem:[%s974_s30 + $0x120] sm:$0xff]  ;;  %v281_v12 = vld [vmem:[%s974_s30 + $0x128] sm:$0xff]  ;;  %v282_v13 = vld [vmem:[%s974_s30 + $0x130] sm:$0xff]  ;;  %2190 = vst [vmem:[#allocation6_spill] sm:$0xff] %v1133_v24  ;;  %v1139_v28 = vmul.f32 %v980_v3, %v277_v2  ;;  %v1142_v31 = vmul.f32 %v980_v3, %v278_v4  ;;  %v1145_v32 = vmul.f32 %v980_v3, %v279_v5  ;;  %v1165_v47 = vadd.f32 %v990_v9, %v1019_v34 }
  0x25   : > { %v283_v18 = vld [vmem:[%s974_s30 + $0x138] sm:$0xff]  ;;  %v284_v19 = vld [vmem:[%s974_s30 + $0x140] sm:$0xff]  ;;  %v285_v20 = vld [vmem:[%s974_s30 + $0x148] sm:$0xff]  ;;  %2191 = vst [vmem:[#allocation7_spill] sm:$0xff] %v1149_v33  ;;  %v1155_v40 = vmul.f32 %v980_v3, %v280_v11  ;;  %v1158_v45 = vmul.f32 %v980_v3, %v281_v12  ;;  %v1161_v46 = vmul.f32 %v980_v3, %v282_v13  ;;  %v1181_v61 = vadd.f32 %v990_v9, %v1022_v35 }
  0x26   : > { %v286_v25 = vld [vmem:[%s974_s30 + $0x150] sm:$0xff]  ;;  %v287_v26 = vld [vmem:[%s974_s30 + $0x158] sm:$0xff]  ;;  %v288_v27 = vld [vmem:[%s974_s30 + $0x160] sm:$0xff]  ;;  %2192 = vst [vmem:[#allocation8_spill] sm:$0xff] %v1165_v47  ;;  %v1171_v54 = vmul.f32 %v980_v3, %v283_v18  ;;  %v1174_v59 = vmul.f32 %v980_v3, %v284_v19  ;;  %v1177_v60 = vmul.f32 %v980_v3, %v285_v20  ;;  %v1197_v13 = vadd.f32 %v990_v9, %v1025_v36 }
  0x27   : > { %v289_v29 = vld [vmem:[%s974_s30 + $0x168] sm:$0xff]  ;;  %v290_v38 = vld [vmem:[%s974_s30 + $0x170] sm:$0xff]  ;;  %v291_v39 = vld [vmem:[%s974_s30 + $0x178] sm:$0xff]  ;;  %2193 = vst [vmem:[#allocation9_spill] sm:$0xff] %v1181_v61  ;;  %v1187_v5 = vmul.f32 %v980_v3, %v286_v25  ;;  %v1190_v11 = vmul.f32 %v980_v3, %v287_v26  ;;  %v1193_v12 = vmul.f32 %v980_v3, %v288_v27  ;;  %v1207_v27 = vadd.f32 %v990_v9, %v1034_v41 }
  0x28   : > { %v292_v30 = vld [vmem:[%s974_s30 + $0x180] sm:$0xff]  ;;  %v293_v52 = vld [vmem:[%s974_s30 + $0x188] sm:$0xff]  ;;  %v294_v53 = vld [vmem:[%s974_s30 + $0x190] sm:$0xff]  ;;  %2194 = vst [vmem:[#allocation10_spill] sm:$0xff] %v1197_v13  ;;  %v360_v20 = vmul.f32 %v980_v3, %v289_v29  ;;  %v361_v25 = vmul.f32 %v980_v3, %v290_v38  ;;  %v362_v26 = vmul.f32 %v980_v3, %v291_v39  ;;  %v1217_v29 = vadd.f32 %v990_v9, %v1037_v42 }
  0x29   : > { %v295_v34 = vld [vmem:[%s974_s30 + $0x198] sm:$0xff]  ;;  %v296_v2 = vld [vmem:[%s974_s30 + $0x1a0] sm:$0xff]  ;;  %v297_v4 = vld [vmem:[%s974_s30 + $0x1a8] sm:$0xff]  ;;  %2195 = vst [vmem:[#allocation11_spill] sm:$0xff] %v1207_v27  ;;  %v363_v13 = vmul.f32 %v980_v3, %v292_v30  ;;  %v364_v33 = vmul.f32 %v980_v3, %v293_v52  ;;  %v365_v24 = vmul.f32 %v980_v3, %v294_v53  ;;  %v1227_v30 = vadd.f32 %v990_v9, %v1040_v43 }
  0x2a   : > { %v298_v35 = vld [vmem:[%s974_s30 + $0x1b0] sm:$0xff]  ;;  %v299_v18 = vld [vmem:[%s974_s30 + $0x1b8] sm:$0xff]  ;;  %v300_v19 = vld [vmem:[%s974_s30 + $0x1c0] sm:$0xff]  ;;  %2196 = vst [vmem:[#allocation12_spill] sm:$0xff] %v1217_v29  ;;  %v366_v10 = vmul.f32 %v980_v3, %v295_v34  ;;  %v367_v41 = vmul.f32 %v980_v3, %v296_v2  ;;  %v368_v27 = vmul.f32 %v980_v3, %v297_v4  ;;  %v1235_v29 = vadd.f32 %v990_v9, %v1049_v48 }
  0x2b   : > { %v301_v61 = vld [vmem:[%s974_s30 + $0x1c8] sm:$0xff]  ;;  %v302_v47 = vld [vmem:[%s974_s30 + $0x1d0] sm:$0xff]  ;;  %v303_v36 = vld [vmem:[%s974_s30 + $0x1d8] sm:$0xff]  ;;  %v369_v53 = vmul.f32 %v980_v3, %v298_v35  ;;  %v370_v1 = vmul.f32 %v980_v3, %v299_v18  ;;  %v371_v42 = vmul.f32 %v980_v3, %v300_v19  ;;  %v1242_v43 = vadd.f32 %v990_v9, %v1052_v49 }
  0x2c   : > { %v304_v38 = vld [vmem:[%s974_s30 + $0x1e0] sm:$0xff]  ;;  %v305_v39 = vld [vmem:[%s974_s30 + $0x1e8] sm:$0xff]  ;;  %v306_v17 = vld [vmem:[%s974_s30 + $0x1f0] sm:$0xff]  ;;  %v372_v34 = vmul.f32 %v980_v3, %v301_v61  ;;  %v373_v2 = vmul.f32 %v980_v3, %v302_v47  ;;  %v374_v4 = vmul.f32 %v980_v3, %v303_v36  ;;  %v1249_v48 = vadd.f32 %v990_v9, %v1055_v50 }
  0x2d   : > { %v307_v52 = vld [vmem:[%s974_s30 + $0x1f8] sm:$0xff]  ;;  %v375_v35 = vmul.f32 %v980_v3, %v304_v38  ;;  %v376_v18 = vmul.f32 %v980_v3, %v305_v39  ;;  %v377_v19 = vmul.f32 %v980_v3, %v306_v17  ;;  %v1254_v47 = vadd.f32 %v990_v9, %v1064_v55 }
  0x2e   : > { %v378_v61 = vmul.f32 %v980_v3, %v307_v52  ;;  %v1258_v49 = vadd.f32 %v990_v9, %v1067_v56  ;;  %v1262_v36 = vadd.f32 %v990_v9, %v1070_v57  ;;  %v1266_v17 = vadd.f32 %v990_v9, %v1079_v62 }
  0x2f   : > { %v1270_v50 = vadd.f32 %v990_v9, %v1082_v63  ;;  %v1274_v3 = vadd.f32 %v990_v9, %v1085_v0  ;;  %v1278_v55 = vadd.f32 %v990_v9, %v1094_v6  ;;  %v1282_v56 = vadd.f32 %v990_v9, %v1097_v7 }
  0x30   : > { %v1286_v57 = vadd.f32 %v990_v9, %v1100_v8  ;;  %v1290_v62 = vadd.f32 %v990_v9, %v1109_v14  ;;  %v1294_v63 = vadd.f32 %v990_v9, %v1112_v15  ;;  %v1298_v0 = vadd.f32 %v990_v9, %v1115_v16 }
  0x31   : > { %v1302_v6 = vadd.f32 %v990_v9, %v1124_v21  ;;  %v1306_v7 = vadd.f32 %v990_v9, %v1127_v22  ;;  %v1310_v8 = vadd.f32 %v990_v9, %v1130_v23  ;;  %v1314_v14 = vadd.f32 %v990_v9, %v1139_v28 }
  0x32   : > { %v1318_v15 = vadd.f32 %v990_v9, %v1142_v31  ;;  %v1322_v16 = vadd.f32 %v990_v9, %v1145_v32  ;;  %v1326_v21 = vadd.f32 %v990_v9, %v1155_v40  ;;  %v1330_v22 = vadd.f32 %v990_v9, %v1158_v45 }
  0x33   : > { %v1334_v23 = vadd.f32 %v990_v9, %v1161_v46  ;;  %v1338_v28 = vadd.f32 %v990_v9, %v1171_v54  ;;  %v1342_v31 = vadd.f32 %v990_v9, %v1174_v59  ;;  %v1346_v32 = vadd.f32 %v990_v9, %v1177_v60 }
  0x34   : > { %2197 = vst [vmem:[#allocation13_spill] sm:$0xff] %v1318_v15  ;;  %2198 = vst [vmem:[#allocation14_spill] sm:$0xff] %v1322_v16  ;;  %v1350_v40 = vadd.f32 %v990_v9, %v1187_v5  ;;  %v1354_v45 = vadd.f32 %v990_v9, %v1190_v11  ;;  %v1358_v46 = vadd.f32 %v990_v9, %v1193_v12  ;;  %vm452_vm0 = vcmp.ge.f32.partialorder %v1028_v37, 0.0 }
  0x35   : > { %2199 = vst [vmem:[#allocation15_spill] sm:$0xff] %v1326_v21  ;;  %2200 = vst [vmem:[#allocation16_spill] sm:$0xff] %v1330_v22  ;;  %v1361_v54 = vadd.f32 %v990_v9, %v360_v20  ;;  %v1364_v59 = vadd.f32 %v990_v9, %v361_v25  ;;  %v1367_v60 = vadd.f32 %v990_v9, %v362_v26  ;;  %vm453_vm1 = vcmp.ge.f32.partialorder %v1043_v44, 0.0 }
  0x36   : > { %2201 = vst [vmem:[#allocation17_spill] sm:$0xff] %v1334_v23  ;;  %2202 = vst [vmem:[#allocation18_spill] sm:$0xff] %v1338_v28  ;;  %v1370_v5 = vadd.f32 %v990_v9, %v363_v13  ;;  %v1373_v38 = vadd.f32 %v990_v9, %v364_v33  ;;  %v1376_v11 = vadd.f32 %v990_v9, %v365_v24  ;;  %vm454_vm2 = vcmp.ge.f32.partialorder %v1058_v51, 0.0 }
  0x37   : > { %2203 = vst [vmem:[#allocation19_spill] sm:$0xff] %v1342_v31  ;;  %2204 = vst [vmem:[#allocation20_spill] sm:$0xff] %v1361_v54  ;;  %v1379_v12 = vadd.f32 %v990_v9, %v366_v10  ;;  %v1382_v20 = vadd.f32 %v990_v9, %v367_v41  ;;  %v1385_v25 = vadd.f32 %v990_v9, %v368_v27  ;;  %vm455_vm3 = vcmp.ge.f32.partialorder %v1073_v58, 0.0 }
  0x38   : > { %2205 = vst [vmem:[#allocation21_spill] sm:$0xff] %v1364_v59  ;;  %2206 = vst [vmem:[#allocation22_spill] sm:$0xff] %v1367_v60  ;;  %v1388_v26 = vadd.f32 %v990_v9, %v369_v53  ;;  %v1391_v13 = vadd.f32 %v990_v9, %v370_v1  ;;  %v1394_v33 = vadd.f32 %v990_v9, %v371_v42  ;;  %vm496_vm14 = vcmp.ge.f32.partialorder %v1358_v46, 0.0 }
  0x39   : > { %v1397_v24 = vadd.f32 %v990_v9, %v372_v34  ;;  %v1400_v10 = vadd.f32 %v990_v9, %v373_v2  ;;  %v1403_v39 = vadd.f32 %v990_v9, %v374_v4  ;;  %v1406_v27 = vadd.f32 %v990_v9, %v375_v35 }
  0x3a   : > { %v1409_v41 = vadd.f32 %v990_v9, %v376_v18  ;;  %v1412_v1 = vadd.f32 %v990_v9, %v377_v19  ;;  %v1415_v52 = vadd.f32 %v990_v9, %v378_v61  ;;  %v2218_v9 = vld [vmem:[#allocation3_spill] sm:$0xff]  ;;  %v2220_v18 = vld [vmem:[#allocation4_spill] sm:$0xff]  ;;  %v2222_v61 = vld [vmem:[#allocation5_spill] sm:$0xff]  ;;  %vm500_vm12 = vcmp.ge.f32.partialorder %v1370_v5, 0.0 }
  0x3b   : > { %2207 = vst [vmem:[#allocation23_spill] sm:$0xff] %v1397_v24  ;;  %2208 = vst [vmem:[#allocation24_spill] sm:$0xff] %v1400_v10  ;;  %vm456_vm4 = vcmp.ge.f32.partialorder %v2218_v9, 0.0  ;;  %vm457_vm5 = vcmp.ge.f32.partialorder %v2220_v18, 0.0  ;;  %vm458_vm6 = vcmp.ge.f32.partialorder %v2222_v61, 0.0  ;;  %vm501_vm15 = vcmp.ge.f32.partialorder %v1373_v38, 0.0 }
  0x3c   : > { %2209 = vst [vmem:[#allocation25_spill] sm:$0xff] %v1403_v39  ;;  %2210 = vst [vmem:[#allocation26_spill] sm:$0xff] %v1406_v27  ;;  %vm503_vm13 = vcmp.ge.f32.partialorder %v1379_v12, 0.0 }
  0x3d   : > { %2211 = vst [vmem:[#allocation27_spill] sm:$0xff] %v1409_v41  ;;  %2212 = vst [vmem:[#allocation28_spill] sm:$0xff] %v1412_v1 }
  0x3e   : > { %2213 = vst [vmem:[#allocation29_spill] sm:$0xff] %v1415_v52 }
  0x42   : > { %s827_s9 = spop %826 }
  0x43   : > { %v1417_v53 = vstv %s827_s9 }
  0x44   : > { %v1421_v42 = vmul.f32 %v1417_v53, %v1028_v37  ;;  %v1425_v34 = vmul.f32 %v1417_v53, %v1043_v44  ;;  %v1429_v2 = vmul.f32 %v1417_v53, %v1058_v51  ;;  %v1433_v4 = vmul.f32 %v1417_v53, %v1073_v58 }
  0x45   : > { %v1437_v35 = vmul.f32 %v1417_v53, %v2218_v9  ;;  %v1441_v19 = vmul.f32 %v1417_v53, %v2220_v18 }
  0x46   : > { %2214 = vst [vmem:[#allocation30_spill] sm:$0xff] %v1421_v42  ;;  %2215 = vst [vmem:[#allocation31_spill] sm:$0xff] %v1425_v34  ;;  %v1445_v42 = vmul.f32 %v1417_v53, %v2222_v61  ;;  %v2224_v34 = vld [vmem:[#allocation6_spill] sm:$0xff] }
  0x47   : > { %2216 = vst [vmem:[#allocation32_spill] sm:$0xff] %v1429_v2  ;;  %2217 = vst [vmem:[#allocation33_spill] sm:$0xff] %v1433_v4  ;;  %v1449_v52 = vmul.f32 %v1417_v53, %v2224_v34  ;;  %v2226_v2 = vld [vmem:[#allocation7_spill] sm:$0xff]  ;;  %v2228_v4 = vld [vmem:[#allocation8_spill] sm:$0xff]  ;;  %vm459_vm7 = vcmp.ge.f32.partialorder %v2224_v34, 0.0 }
  0x48   : > { %2219 = vst [vmem:[#allocation3_spill] sm:$0xff] %v1437_v35  ;;  %2221 = vst [vmem:[#allocation4_spill] sm:$0xff] %v1441_v19  ;;  %v1453_v1 = vmul.f32 %v1417_v53, %v2226_v2  ;;  %v1457_v41 = vmul.f32 %v1417_v53, %v2228_v4  ;;  %v2230_v35 = vld [vmem:[#allocation9_spill] sm:$0xff]  ;;  %v2232_v19 = vld [vmem:[#allocation10_spill] sm:$0xff]  ;;  %vm460_vm9 = vcmp.ge.f32.partialorder %v2226_v2, 0.0  ;;  %vm461_vm10 = vcmp.ge.f32.partialorder %v2228_v4, 0.0 }
  0x49   : > { %2223 = vst [vmem:[#allocation5_spill] sm:$0xff] %v1445_v42  ;;  %2225 = vst [vmem:[#allocation6_spill] sm:$0xff] %v1449_v52  ;;  %v1461_v27 = vmul.f32 %v1417_v53, %v2230_v35  ;;  %v1465_v39 = vmul.f32 %v1417_v53, %v2232_v19  ;;  %v2234_v42 = vld [vmem:[#allocation11_spill] sm:$0xff]  ;;  %v2236_v52 = vld [vmem:[#allocation12_spill] sm:$0xff]  ;;  %vm462_vm11 = vcmp.ge.f32.partialorder %v2230_v35, 0.0 }
  0x4a   : > { %2227 = vst [vmem:[#allocation7_spill] sm:$0xff] %v1453_v1  ;;  %2229 = vst [vmem:[#allocation8_spill] sm:$0xff] %v1457_v41  ;;  %v1469_v10 = vmul.f32 %v1417_v53, %v2234_v42  ;;  %v1473_v24 = vmul.f32 %v1417_v53, %v2236_v52  ;;  %v1477_v1 = vmul.f32 %v1417_v53, %v1227_v30 }
  0x4b   : > { %2231 = vst [vmem:[#allocation9_spill] sm:$0xff] %v1461_v27  ;;  %2233 = vst [vmem:[#allocation10_spill] sm:$0xff] %v1465_v39  ;;  %v1481_v41 = vmul.f32 %v1417_v53, %v1235_v29  ;;  %v1485_v27 = vmul.f32 %v1417_v53, %v1242_v43  ;;  %v1489_v39 = vmul.f32 %v1417_v53, %v1249_v48 }
  0x4c   : > { %2235 = vst [vmem:[#allocation11_spill] sm:$0xff] %v1469_v10  ;;  %2237 = vst [vmem:[#allocation12_spill] sm:$0xff] %v1473_v24  ;;  %v1493_v10 = vmul.f32 %v1417_v53, %v1254_v47  ;;  %v1497_v24 = vmul.f32 %v1417_v53, %v1258_v49 }
  0x4d   : > { %2238 = vst [vmem:[#allocation34_spill] sm:$0xff] %v1485_v27  ;;  %2239 = vst [vmem:[#allocation35_spill] sm:$0xff] %v1489_v39  ;;  %v1505_v27 = vmul.f32 %v1417_v53, %v1262_v36  ;;  %v1509_v39 = vmul.f32 %v1417_v53, %v1266_v17 }
  0x4e   : > { %2240 = vst [vmem:[#allocation36_spill] sm:$0xff] %v1493_v10  ;;  %2241 = vst [vmem:[#allocation37_spill] sm:$0xff] %v1497_v24  ;;  %v1513_v10 = vmul.f32 %v1417_v53, %v1270_v50  ;;  %v1517_v24 = vmul.f32 %v1417_v53, %v1274_v3 }
  0x4f   : > { %2242 = vst [vmem:[#allocation38_spill] sm:$0xff] %v1505_v27  ;;  %2243 = vst [vmem:[#allocation39_spill] sm:$0xff] %v1509_v39  ;;  %v1525_v27 = vmul.f32 %v1417_v53, %v1278_v55  ;;  %v1529_v39 = vmul.f32 %v1417_v53, %v1282_v56 }
  0x50   : > { %2244 = vst [vmem:[#allocation40_spill] sm:$0xff] %v1513_v10  ;;  %2245 = vst [vmem:[#allocation41_spill] sm:$0xff] %v1517_v24  ;;  %v1533_v10 = vmul.f32 %v1417_v53, %v1286_v57  ;;  %v1537_v24 = vmul.f32 %v1417_v53, %v1290_v62 }
  0x51   : > { %2246 = vst [vmem:[#allocation42_spill] sm:$0xff] %v1525_v27  ;;  %2247 = vst [vmem:[#allocation43_spill] sm:$0xff] %v1529_v39  ;;  %v1545_v39 = vmul.f32 %v1417_v53, %v1294_v63  ;;  %v1557_v27 = vmul.f32 %v1417_v53, %v1306_v7 }
  0x52   : > { %2248 = vst [vmem:[#allocation44_spill] sm:$0xff] %v1533_v10  ;;  %2249 = vst [vmem:[#allocation45_spill] sm:$0xff] %v1537_v24  ;;  %v1549_v10 = vmul.f32 %v1417_v53, %v1298_v0  ;;  %v1553_v24 = vmul.f32 %v1417_v53, %v1302_v6 }
  0x53   : > { %2250 = vst [vmem:[#allocation46_spill] sm:$0xff] %v1545_v39  ;;  %2253 = vst [vmem:[#allocation49_spill] sm:$0xff] %v1557_v27  ;;  %v1565_v39 = vmul.f32 %v1417_v53, %v1310_v8  ;;  %v1577_v27 = vmul.f32 %v1417_v53, %v1322_v16 }
  0x54   : > { %2251 = vst [vmem:[#allocation47_spill] sm:$0xff] %v1549_v10  ;;  %2252 = vst [vmem:[#allocation48_spill] sm:$0xff] %v1553_v24  ;;  %v1569_v10 = vmul.f32 %v1417_v53, %v1314_v14  ;;  %v1573_v24 = vmul.f32 %v1417_v53, %v1318_v15  ;;  %v2283_v15 = vld [vmem:[#allocation25_spill] sm:$0xff] }
  0x55   : > { %2254 = vst [vmem:[#allocation50_spill] sm:$0xff] %v1565_v39  ;;  %2257 = vst [vmem:[#allocation53_spill] sm:$0xff] %v1577_v27  ;;  %v1585_v39 = vmul.f32 %v1417_v53, %v1326_v21  ;;  %v1597_v27 = vmul.f32 %v1417_v53, %v1338_v28  ;;  %v1704_v21 = vmul.f32 %v1417_v53, %v2283_v15 }
  0x56   : > { %2255 = vst [vmem:[#allocation51_spill] sm:$0xff] %v1569_v10  ;;  %2256 = vst [vmem:[#allocation52_spill] sm:$0xff] %v1573_v24  ;;  %v1589_v10 = vmul.f32 %v1417_v53, %v1330_v22  ;;  %v1593_v24 = vmul.f32 %v1417_v53, %v1334_v23 }
  0x57   : > { %2258 = vst [vmem:[#allocation54_spill] sm:$0xff] %v1585_v39  ;;  %2261 = vst [vmem:[#allocation57_spill] sm:$0xff] %v1597_v27  ;;  %v1605_v39 = vmul.f32 %v1417_v53, %v1342_v31  ;;  %v1617_v27 = vmul.f32 %v1417_v53, %v1354_v45 }
  0x58   : > { %2259 = vst [vmem:[#allocation55_spill] sm:$0xff] %v1589_v10  ;;  %2260 = vst [vmem:[#allocation56_spill] sm:$0xff] %v1593_v24  ;;  %v1609_v10 = vmul.f32 %v1417_v53, %v1346_v32  ;;  %v1613_v24 = vmul.f32 %v1417_v53, %v1350_v40 }
  0x59   : > { %2262 = vst [vmem:[#allocation58_spill] sm:$0xff] %v1605_v39  ;;  %2265 = vst [vmem:[#allocation61_spill] sm:$0xff] %v1617_v27  ;;  %v1625_v39 = vmul.f32 %v1417_v53, %v1358_v46  ;;  %v1637_v27 = vmul.f32 %v1417_v53, %v1367_v60 }
  0x5a   : > { %2263 = vst [vmem:[#allocation59_spill] sm:$0xff] %v1609_v10  ;;  %2264 = vst [vmem:[#allocation60_spill] sm:$0xff] %v1613_v24  ;;  %v1629_v10 = vmul.f32 %v1417_v53, %v1361_v54  ;;  %v1633_v24 = vmul.f32 %v1417_v53, %v1364_v59  ;;  %v2296_v59 = vld [vmem:[#allocation33_spill] sm:$0xff] }
  0x5b   : > { %2266 = vst [vmem:[#allocation62_spill] sm:$0xff] %v1625_v39  ;;  %2269 = vst [vmem:[#allocation65_spill] sm:$0xff] %v1637_v27  ;;  %v1653_v27 = vmul.f32 %v1417_v53, %v1376_v11  ;;  %v1657_v39 = vmul.f32 %v1417_v53, %v1379_v12  ;;  %v584_v60 = vsel %vm455_vm3, %v1073_v58, %v2296_v59  ;;  %v2299_v58 = vld [vmem:[#allocation5_spill] sm:$0xff]  ;;  %vm506_vm3 = vcmp.ge.f32.partialorder %v1388_v26, 0.0 }
  0x5c   : > { %2267 = vst [vmem:[#allocation63_spill] sm:$0xff] %v1629_v10  ;;  %2268 = vst [vmem:[#allocation64_spill] sm:$0xff] %v1633_v24  ;;  %v1645_v10 = vmul.f32 %v1417_v53, %v1370_v5  ;;  %v1649_v24 = vmul.f32 %v1417_v53, %v1373_v38 }
  0x5d   : > { %2272 = vst [vmem:[#allocation68_spill] sm:$0xff] %v1653_v27  ;;  %2273 = vst [vmem:[#allocation69_spill] sm:$0xff] %v1657_v39  ;;  %v1673_v27 = vmul.f32 %v1417_v53, %v1388_v26  ;;  %v1677_v39 = vmul.f32 %v1417_v53, %v1391_v13 }
  0x5e   : > { %2270 = vst [vmem:[#allocation66_spill] sm:$0xff] %v1645_v10  ;;  %2271 = vst [vmem:[#allocation67_spill] sm:$0xff] %v1649_v24  ;;  %v1665_v10 = vmul.f32 %v1417_v53, %v1382_v20  ;;  %v1669_v24 = vmul.f32 %v1417_v53, %v1385_v25 }
  0x5f   : > { %2276 = vst [vmem:[#allocation72_spill] sm:$0xff] %v1673_v27  ;;  %2277 = vst [vmem:[#allocation73_spill] sm:$0xff] %v1677_v39  ;;  %v1692_v27 = vmul.f32 %v1417_v53, %v1394_v33 }
  0x60   : > { %2274 = vst [vmem:[#allocation70_spill] sm:$0xff] %v1665_v10  ;;  %2275 = vst [vmem:[#allocation71_spill] sm:$0xff] %v1669_v24  ;;  %v2279_v24 = vld [vmem:[#allocation23_spill] sm:$0xff]  ;;  %v2281_v10 = vld [vmem:[#allocation24_spill] sm:$0xff] }
  0x61   : > { %2278 = vst [vmem:[#allocation74_spill] sm:$0xff] %v1692_v27  ;;  %v1696_v39 = vmul.f32 %v1417_v53, %v2279_v24  ;;  %v1700_v16 = vmul.f32 %v1417_v53, %v2281_v10  ;;  %2284 = vst [vmem:[#allocation25_spill] sm:$0xff] %v1704_v21  ;;  %v2285_v27 = vld [vmem:[#allocation26_spill] sm:$0xff]  ;;  %v2291_v21 = vld [vmem:[#allocation29_spill] sm:$0xff] }
  0x62   : > { %v1712_v28 = vmul.f32 %v1417_v53, %v2285_v27  ;;  %v1724_v31 = vmul.f32 %v1417_v53, %v2291_v21  ;;  %649 = vst.msk [vmem:[%s1684_s12 + $0x18] sm:$0xff] %vm645_vm8, %v584_v60  ;;  %v2303_v60 = vld [vmem:[#allocation9_spill] sm:$0xff] }
  0x63   : > { %2280 = vst [vmem:[#allocation23_spill] sm:$0xff] %v1696_v39  ;;  %2282 = vst [vmem:[#allocation24_spill] sm:$0xff] %v1700_v16  ;;  %v2287_v39 = vld [vmem:[#allocation27_spill] sm:$0xff]  ;;  %v2289_v16 = vld [vmem:[#allocation28_spill] sm:$0xff] }
  0x64   : > { %2286 = vst [vmem:[#allocation26_spill] sm:$0xff] %v1712_v28  ;;  %v1716_v23 = vmul.f32 %v1417_v53, %v2287_v39  ;;  %v1720_v22 = vmul.f32 %v1417_v53, %v2289_v16  ;;  %2292 = vst [vmem:[#allocation29_spill] sm:$0xff] %v1724_v31  ;;  %v2294_v28 = vld [vmem:[#allocation31_spill] sm:$0xff]  ;;  %v2295_v31 = vld [vmem:[#allocation32_spill] sm:$0xff] }
  0x65   : > { %v582_v53 = vsel %vm453_vm1, %v1043_v44, %v2294_v28  ;;  %v583_v54 = vsel %vm454_vm2, %v1058_v51, %v2295_v31  ;;  %v587_v28 = vsel %vm458_vm6, %v2222_v61, %v2299_v58  ;;  %v2300_v31 = vld [vmem:[#allocation6_spill] sm:$0xff]  ;;  %vm504_vm1 = vcmp.ge.f32.partialorder %v1382_v20, 0.0  ;;  %v2324_v58 = vld [vmem:[#allocation40_spill] sm:$0xff] }
  0x66   : > { %2288 = vst [vmem:[#allocation27_spill] sm:$0xff] %v1716_v23  ;;  %2290 = vst [vmem:[#allocation28_spill] sm:$0xff] %v1720_v22  ;;  %v2293_v23 = vld [vmem:[#allocation30_spill] sm:$0xff]  ;;  %v588_v59 = vsel %vm459_vm7, %v2224_v34, %v2300_v31  ;;  %vm505_vm2 = vcmp.ge.f32.partialorder %v1385_v25, 0.0  ;;  %vm2310_vm6 = vcmp.ge.f32.partialorder %v1227_v30, 0.0  ;;  %vm2315_vm7 = vcmp.ge.f32.partialorder %v1249_v48, 0.0 }
  0x67   : > { %v581_v22 = vsel %vm452_vm0, %v1028_v37, %v2293_v23  ;;  %vm502_vm0 = vcmp.ge.f32.partialorder %v1376_v11, 0.0  ;;  %v2297_v37 = vld [vmem:[#allocation3_spill] sm:$0xff]  ;;  %v2298_v23 = vld [vmem:[#allocation4_spill] sm:$0xff]  ;;  %647 = vst.msk [vmem:[%s1684_s12 + $0x8] sm:$0xff] %vm645_vm8, %v582_v53  ;;  %648 = vst.msk [vmem:[%s1684_s12 + $0x10] sm:$0xff] %vm645_vm8, %v583_v54 }
  0x68   : > { %v585_v44 = vsel %vm456_vm4, %v2218_v9, %v2297_v37  ;;  %v586_v51 = vsel %vm457_vm5, %v2220_v18, %v2298_v23  ;;  %646 = vst.msk [vmem:[%s1684_s12] sm:$0xff] %vm645_vm8, %v581_v22  ;;  %vm507_vm4 = vcmp.ge.f32.partialorder %v1391_v13, 0.0  ;;  %v2301_v9 = vld [vmem:[#allocation7_spill] sm:$0xff]  ;;  %v2302_v22 = vld [vmem:[#allocation8_spill] sm:$0xff]  ;;  %v591_v18 = vsel %vm462_vm11, %v2230_v35, %v2303_v60  ;;  %v2304_v61 = vld [vmem:[#allocation10_spill] sm:$0xff] }
  0x69   : > { %v589_v34 = vsel %vm460_vm9, %v2226_v2, %v2301_v9  ;;  %v590_v54 = vsel %vm461_vm10, %v2228_v4, %v2302_v22  ;;  %vm2305_vm5 = vcmp.ge.f32.partialorder %v2232_v19, 0.0  ;;  %650 = vst.msk [vmem:[%s1684_s12 + $0x20] sm:$0xff] %vm645_vm8, %v585_v44  ;;  %651 = vst.msk [vmem:[%s1684_s12 + $0x28] sm:$0xff] %vm645_vm8, %v586_v51  ;;  %v2306_v2 = vld [vmem:[#allocation11_spill] sm:$0xff]  ;;  %vm2307_vm11 = vcmp.ge.f32.partialorder %v2234_v42, 0.0  ;;  %v2308_v35 = vld [vmem:[#allocation12_spill] sm:$0xff] }
  0x6a   : > { %v592_v53 = vsel %vm2305_vm5, %v2232_v19, %v2304_v61  ;;  %652 = vst.msk [vmem:[%s1684_s12 + $0x30] sm:$0xff] %vm645_vm8, %v587_v28  ;;  %653 = vst.msk [vmem:[%s1684_s12 + $0x38] sm:$0xff] %vm645_vm8, %v588_v59  ;;  %v593_v4 = vsel %vm2307_vm11, %v2234_v42, %v2306_v2  ;;  %vm2309_vm5 = vcmp.ge.f32.partialorder %v2236_v52, 0.0  ;;  %v595_v37 = vsel %vm2310_vm6, %v1227_v30, %v1477_v1  ;;  %v2318_v23 = vld [vmem:[#allocation37_spill] sm:$0xff]  ;;  %v2332_v9 = vld [vmem:[#allocation44_spill] sm:$0xff] }
  0x6b   : > { %v594_v19 = vsel %vm2309_vm5, %v2236_v52, %v2308_v35  ;;  %vm2311_vm10 = vcmp.ge.f32.partialorder %v1235_v29, 0.0  ;;  %654 = vst.msk [vmem:[%s1684_s12 + $0x40] sm:$0xff] %vm645_vm8, %v589_v34  ;;  %655 = vst.msk [vmem:[%s1684_s12 + $0x48] sm:$0xff] %vm645_vm8, %v590_v54  ;;  %vm512_vm11 = vcmp.ge.f32.partialorder %v2285_v27, 0.0  ;;  %vm514_vm5 = vcmp.ge.f32.partialorder %v2289_v16, 0.0  ;;  %v2316_v52 = vld [vmem:[#allocation36_spill] sm:$0xff] }
  0x6c   : > { %v596_v44 = vsel %vm2311_vm10, %v1235_v29, %v1481_v41  ;;  %656 = vst.msk [vmem:[%s1684_s12 + $0x50] sm:$0xff] %vm645_vm8, %v591_v18  ;;  %657 = vst.msk [vmem:[%s1684_s12 + $0x58] sm:$0xff] %vm645_vm8, %v592_v53  ;;  %v2312_v29 = vld [vmem:[#allocation34_spill] sm:$0xff]  ;;  %vm2313_vm9 = vcmp.ge.f32.partialorder %v1242_v43, 0.0  ;;  %v2314_v41 = vld [vmem:[#allocation35_spill] sm:$0xff]  ;;  %vm2317_vm6 = vcmp.ge.f32.partialorder %v1254_v47, 0.0 }
  0x6d   : > { %v597_v30 = vsel %vm2313_vm9, %v1242_v43, %v2312_v29  ;;  %v598_v1 = vsel %vm2315_vm7, %v1249_v48, %v2314_v41  ;;  %v599_v42 = vsel %vm2317_vm6, %v1254_v47, %v2316_v52  ;;  %vm2319_vm10 = vcmp.ge.f32.partialorder %v1258_v49, 0.0  ;;  %658 = vst.msk [vmem:[%s1684_s12 + $0x60] sm:$0xff] %vm645_vm8, %v593_v4  ;;  %659 = vst.msk [vmem:[%s1684_s12 + $0x68] sm:$0xff] %vm645_vm8, %v594_v19  ;;  %v2320_v43 = vld [vmem:[#allocation38_spill] sm:$0xff]  ;;  %v2322_v47 = vld [vmem:[#allocation39_spill] sm:$0xff] }
  0x6e   : > { %v600_v51 = vsel %vm2319_vm10, %v1258_v49, %v2318_v23  ;;  %660 = vst.msk [vmem:[%s1684_s12 + $0x70] sm:$0xff] %vm645_vm8, %v595_v37  ;;  %661 = vst.msk [vmem:[%s1684_s12 + $0x78] sm:$0xff] %vm645_vm8, %v596_v44  ;;  %vm2321_vm7 = vcmp.ge.f32.partialorder %v1262_v36, 0.0  ;;  %vm2323_vm9 = vcmp.ge.f32.partialorder %v1266_v17, 0.0  ;;  %vm2325_vm6 = vcmp.ge.f32.partialorder %v1270_v50, 0.0  ;;  %v2326_v31 = vld [vmem:[#allocation41_spill] sm:$0xff] }
  0x6f   : > { %v601_v48 = vsel %vm2321_vm7, %v1262_v36, %v2320_v43  ;;  %v602_v49 = vsel %vm2323_vm9, %v1266_v17, %v2322_v47  ;;  %v603_v28 = vsel %vm2325_vm6, %v1270_v50, %v2324_v58  ;;  %vm2327_vm10 = vcmp.ge.f32.partialorder %v1274_v3, 0.0  ;;  %662 = vst.msk [vmem:[%s1684_s12 + $0x80] sm:$0xff] %vm645_vm8, %v597_v30  ;;  %663 = vst.msk [vmem:[%s1684_s12 + $0x88] sm:$0xff] %vm645_vm8, %v598_v1  ;;  %v2328_v36 = vld [vmem:[#allocation42_spill] sm:$0xff]  ;;  %v2330_v50 = vld [vmem:[#allocation43_spill] sm:$0xff] }
  0x70   : > { %v604_v59 = vsel %vm2327_vm10, %v1274_v3, %v2326_v31  ;;  %664 = vst.msk [vmem:[%s1684_s12 + $0x90] sm:$0xff] %vm645_vm8, %v599_v42  ;;  %665 = vst.msk [vmem:[%s1684_s12 + $0x98] sm:$0xff] %vm645_vm8, %v600_v51  ;;  %vm2329_vm7 = vcmp.ge.f32.partialorder %v1278_v55, 0.0  ;;  %vm2331_vm9 = vcmp.ge.f32.partialorder %v1282_v56, 0.0  ;;  %vm2333_vm6 = vcmp.ge.f32.partialorder %v1286_v57, 0.0  ;;  %v2334_v22 = vld [vmem:[#allocation45_spill] sm:$0xff] }
  0x71   : > { %v605_v17 = vsel %vm2329_vm7, %v1278_v55, %v2328_v36  ;;  %v606_v3 = vsel %vm2331_vm9, %v1282_v56, %v2330_v50  ;;  %v607_v34 = vsel %vm2333_vm6, %v1286_v57, %v2332_v9  ;;  %vm2335_vm10 = vcmp.ge.f32.partialorder %v1290_v62, 0.0  ;;  %666 = vst.msk [vmem:[%s1684_s12 + $0xa0] sm:$0xff] %vm645_vm8, %v601_v48  ;;  %667 = vst.msk [vmem:[%s1684_s12 + $0xa8] sm:$0xff] %vm645_vm8, %v602_v49  ;;  %v2336_v55 = vld [vmem:[#allocation46_spill] sm:$0xff]  ;;  %v2338_v57 = vld [vmem:[#allocation47_spill] sm:$0xff] }
  0x72   : > { %v608_v54 = vsel %vm2335_vm10, %v1290_v62, %v2334_v22  ;;  %668 = vst.msk [vmem:[%s1684_s12 + $0xb0] sm:$0xff] %vm645_vm8, %v603_v28  ;;  %669 = vst.msk [vmem:[%s1684_s12 + $0xb8] sm:$0xff] %vm645_vm8, %v604_v59  ;;  %vm2337_vm7 = vcmp.ge.f32.partialorder %v1294_v63, 0.0  ;;  %vm2339_vm9 = vcmp.ge.f32.partialorder %v1298_v0, 0.0  ;;  %v2340_v60 = vld [vmem:[#allocation48_spill] sm:$0xff]  ;;  %vm2341_vm6 = vcmp.ge.f32.partialorder %v1302_v6, 0.0 }
  0x73   : > { %v609_v56 = vsel %vm2337_vm7, %v1294_v63, %v2336_v55  ;;  %v610_v62 = vsel %vm2339_vm9, %v1298_v0, %v2338_v57  ;;  %v611_v18 = vsel %vm2341_vm6, %v1302_v6, %v2340_v60  ;;  %v2342_v61 = vld [vmem:[#allocation49_spill] sm:$0xff]  ;;  %vm2343_vm10 = vcmp.ge.f32.partialorder %v1306_v7, 0.0  ;;  %670 = vst.msk [vmem:[%s1684_s12 + $0xc0] sm:$0xff] %vm645_vm8, %v605_v17  ;;  %671 = vst.msk [vmem:[%s1684_s12 + $0xc8] sm:$0xff] %vm645_vm8, %v606_v3  ;;  %v2344_v63 = vld [vmem:[#allocation50_spill] sm:$0xff] }
  0x74   : > { %v612_v53 = vsel %vm2343_vm10, %v1306_v7, %v2342_v61  ;;  %672 = vst.msk [vmem:[%s1684_s12 + $0xd0] sm:$0xff] %vm645_vm8, %v607_v34  ;;  %673 = vst.msk [vmem:[%s1684_s12 + $0xd8] sm:$0xff] %vm645_vm8, %v608_v54  ;;  %vm2345_vm7 = vcmp.ge.f32.partialorder %v1310_v8, 0.0  ;;  %v2346_v6 = vld [vmem:[#allocation51_spill] sm:$0xff]  ;;  %vm2347_vm9 = vcmp.ge.f32.partialorder %v1314_v14, 0.0  ;;  %v2348_v2 = vld [vmem:[#allocation52_spill] sm:$0xff] }
  0x75   : > { %v613_v0 = vsel %vm2345_vm7, %v1310_v8, %v2344_v63  ;;  %v614_v7 = vsel %vm2347_vm9, %v1314_v14, %v2346_v6  ;;  %v2349_v4 = vld [vmem:[#allocation13_spill] sm:$0xff]  ;;  %v2352_v37 = vld [vmem:[#allocation14_spill] sm:$0xff]  ;;  %674 = vst.msk [vmem:[%s1684_s12 + $0xe0] sm:$0xff] %vm645_vm8, %v609_v56  ;;  %675 = vst.msk [vmem:[%s1684_s12 + $0xe8] sm:$0xff] %vm645_vm8, %v610_v62 }
  0x76   : > { %vm2350_vm6 = vcmp.ge.f32.partialorder %v2349_v4, 0.0  ;;  %v2351_v19 = vld [vmem:[#allocation53_spill] sm:$0xff]  ;;  %vm2353_vm10 = vcmp.ge.f32.partialorder %v2352_v37, 0.0  ;;  %676 = vst.msk [vmem:[%s1684_s12 + $0xf0] sm:$0xff] %vm645_vm8, %v611_v18  ;;  %677 = vst.msk [vmem:[%s1684_s12 + $0xf8] sm:$0xff] %vm645_vm8, %v612_v53  ;;  %v2354_v8 = vld [vmem:[#allocation54_spill] sm:$0xff] }
  0x77   : > { %v615_v35 = vsel %vm2350_vm6, %v2349_v4, %v2348_v2  ;;  %v616_v44 = vsel %vm2353_vm10, %v2352_v37, %v2351_v19  ;;  %v2355_v14 = vld [vmem:[#allocation15_spill] sm:$0xff]  ;;  %v2358_v41 = vld [vmem:[#allocation16_spill] sm:$0xff]  ;;  %v2361_v42 = vld [vmem:[#allocation17_spill] sm:$0xff]  ;;  %678 = vst.msk [vmem:[%s1684_s12 + $0x100] sm:$0xff] %vm645_vm8, %v613_v0 }
  0x78   : > { %vm2356_vm7 = vcmp.ge.f32.partialorder %v2355_v14, 0.0  ;;  %v2357_v30 = vld [vmem:[#allocation55_spill] sm:$0xff]  ;;  %vm2359_vm9 = vcmp.ge.f32.partialorder %v2358_v41, 0.0  ;;  %v2360_v52 = vld [vmem:[#allocation56_spill] sm:$0xff]  ;;  %vm2362_vm6 = vcmp.ge.f32.partialorder %v2361_v42, 0.0  ;;  %v2363_v51 = vld [vmem:[#allocation57_spill] sm:$0xff] }
  0x79   : > { %v617_v29 = vsel %vm2356_vm7, %v2355_v14, %v2354_v8  ;;  %v618_v1 = vsel %vm2359_vm9, %v2358_v41, %v2357_v30  ;;  %v619_v23 = vsel %vm2362_vm6, %v2361_v42, %v2360_v52  ;;  %v2364_v43 = vld [vmem:[#allocation18_spill] sm:$0xff]  ;;  %679 = vst.msk [vmem:[%s1684_s12 + $0x108] sm:$0xff] %vm645_vm8, %v614_v7  ;;  %680 = vst.msk [vmem:[%s1684_s12 + $0x110] sm:$0xff] %vm645_vm8, %v615_v35  ;;  %v2367_v49 = vld [vmem:[#allocation19_spill] sm:$0xff]  ;;  %vm2370_vm9 = vcmp.ge.f32.partialorder %v1346_v32, 0.0 }
  0x7a   : > { %vm2365_vm10 = vcmp.ge.f32.partialorder %v2364_v43, 0.0  ;;  %681 = vst.msk [vmem:[%s1684_s12 + $0x118] sm:$0xff] %vm645_vm8, %v616_v44  ;;  %v2366_v47 = vld [vmem:[#allocation58_spill] sm:$0xff]  ;;  %vm2368_vm7 = vcmp.ge.f32.partialorder %v2367_v49, 0.0  ;;  %v2369_v28 = vld [vmem:[#allocation59_spill] sm:$0xff]  ;;  %v2371_v59 = vld [vmem:[#allocation60_spill] sm:$0xff] }
  0x7b   : > { %v620_v48 = vsel %vm2365_vm10, %v2364_v43, %v2363_v51  ;;  %v621_v58 = vsel %vm2368_vm7, %v2367_v49, %v2366_v47  ;;  %v622_v31 = vsel %vm2370_vm9, %v1346_v32, %v2369_v28  ;;  %vm2372_vm6 = vcmp.ge.f32.partialorder %v1350_v40, 0.0  ;;  %v2373_v17 = vld [vmem:[#allocation61_spill] sm:$0xff]  ;;  %682 = vst.msk [vmem:[%s1684_s12 + $0x120] sm:$0xff] %vm645_vm8, %v617_v29  ;;  %683 = vst.msk [vmem:[%s1684_s12 + $0x128] sm:$0xff] %vm645_vm8, %v618_v1  ;;  %v2375_v32 = vld [vmem:[#allocation62_spill] sm:$0xff] }
  0x7c   : > { %v623_v36 = vsel %vm2372_vm6, %v1350_v40, %v2371_v59  ;;  %vm2374_vm10 = vcmp.ge.f32.partialorder %v1354_v45, 0.0  ;;  %684 = vst.msk [vmem:[%s1684_s12 + $0x130] sm:$0xff] %vm645_vm8, %v619_v23  ;;  %685 = vst.msk [vmem:[%s1684_s12 + $0x138] sm:$0xff] %vm645_vm8, %v620_v48  ;;  %v625_v40 = vsel %vm496_vm14, %v1358_v46, %v2375_v32  ;;  %v2376_v3 = vld [vmem:[#allocation63_spill] sm:$0xff]  ;;  %v2377_v9 = vld [vmem:[#allocation20_spill] sm:$0xff]  ;;  %vm2398_vm14 = vcmp.ge.f32.partialorder %v2281_v10, 0.0 }
  0x7d   : > { %v624_v50 = vsel %vm2374_vm10, %v1354_v45, %v2373_v17  ;;  %vm2378_vm7 = vcmp.ge.f32.partialorder %v2377_v9, 0.0  ;;  %v2379_v34 = vld [vmem:[#allocation64_spill] sm:$0xff]  ;;  %v2380_v22 = vld [vmem:[#allocation21_spill] sm:$0xff]  ;;  %v2383_v56 = vld [vmem:[#allocation22_spill] sm:$0xff]  ;;  %686 = vst.msk [vmem:[%s1684_s12 + $0x140] sm:$0xff] %vm645_vm8, %v621_v58 }
  0x7e   : > { %v626_v45 = vsel %vm2378_vm7, %v2377_v9, %v2376_v3  ;;  %vm2381_vm9 = vcmp.ge.f32.partialorder %v2380_v22, 0.0  ;;  %v2382_v55 = vld [vmem:[#allocation65_spill] sm:$0xff]  ;;  %vm2384_vm6 = vcmp.ge.f32.partialorder %v2383_v56, 0.0  ;;  %687 = vst.msk [vmem:[%s1684_s12 + $0x148] sm:$0xff] %vm645_vm8, %v622_v31  ;;  %688 = vst.msk [vmem:[%s1684_s12 + $0x150] sm:$0xff] %vm645_vm8, %v623_v36  ;;  %v2385_v46 = vld [vmem:[#allocation66_spill] sm:$0xff] }
  0x7f   : > { %v627_v54 = vsel %vm2381_vm9, %v2380_v22, %v2379_v34  ;;  %v628_v57 = vsel %vm2384_vm6, %v2383_v56, %v2382_v55  ;;  %689 = vst.msk [vmem:[%s1684_s12 + $0x158] sm:$0xff] %vm645_vm8, %v624_v50  ;;  %v629_v62 = vsel %vm500_vm12, %v1370_v5, %v2385_v46  ;;  %v2386_v60 = vld [vmem:[#allocation67_spill] sm:$0xff]  ;;  %v2387_v61 = vld [vmem:[#allocation68_spill] sm:$0xff]  ;;  %v2388_v63 = vld [vmem:[#allocation69_spill] sm:$0xff]  ;;  %vm2394_vm12 = vcmp.ge.f32.partialorder %v1394_v33, 0.0 }
  0x80   : > { %v630_v18 = vsel %vm501_vm15, %v1373_v38, %v2386_v60  ;;  %v631_v53 = vsel %vm502_vm0, %v1376_v11, %v2387_v61  ;;  %v632_v0 = vsel %vm503_vm13, %v1379_v12, %v2388_v63  ;;  %690 = vst.msk [vmem:[%s1684_s12 + $0x160] sm:$0xff] %vm645_vm8, %v625_v40  ;;  %691 = vst.msk [vmem:[%s1684_s12 + $0x168] sm:$0xff] %vm645_vm8, %v626_v45  ;;  %v2389_v5 = vld [vmem:[#allocation70_spill] sm:$0xff]  ;;  %v2390_v11 = vld [vmem:[#allocation71_spill] sm:$0xff]  ;;  %vm2396_vm13 = vcmp.ge.f32.partialorder %v2279_v24, 0.0 }
  0x81   : > { %692 = vst.msk [vmem:[%s1684_s12 + $0x170] sm:$0xff] %vm645_vm8, %v627_v54  ;;  %693 = vst.msk [vmem:[%s1684_s12 + $0x178] sm:$0xff] %vm645_vm8, %v628_v57  ;;  %v633_v38 = vsel %vm504_vm1, %v1382_v20, %v2389_v5  ;;  %v634_v12 = vsel %vm505_vm2, %v1385_v25, %v2390_v11  ;;  %v2391_v6 = vld [vmem:[#allocation72_spill] sm:$0xff]  ;;  %v2392_v2 = vld [vmem:[#allocation73_spill] sm:$0xff]  ;;  %vm2400_vm15 = vcmp.ge.f32.partialorder %v2283_v15, 0.0  ;;  %vm2403_vm0 = vcmp.ge.f32.partialorder %v2287_v39, 0.0 }
  0x82   : > { %v635_v7 = vsel %vm506_vm3, %v1388_v26, %v2391_v6  ;;  %v636_v4 = vsel %vm507_vm4, %v1391_v13, %v2392_v2  ;;  %694 = vst.msk [vmem:[%s1684_s12 + $0x180] sm:$0xff] %vm645_vm8, %v629_v62  ;;  %695 = vst.msk [vmem:[%s1684_s12 + $0x188] sm:$0xff] %vm645_vm8, %v630_v18  ;;  %v2393_v20 = vld [vmem:[#allocation74_spill] sm:$0xff]  ;;  %v2395_v26 = vld [vmem:[#allocation23_spill] sm:$0xff]  ;;  %vm2406_vm1 = vcmp.ge.f32.partialorder %v2291_v21, 0.0 }
  0x83   : > { %696 = vst.msk [vmem:[%s1684_s12 + $0x190] sm:$0xff] %vm645_vm8, %v631_v53  ;;  %697 = vst.msk [vmem:[%s1684_s12 + $0x198] sm:$0xff] %vm645_vm8, %v632_v0  ;;  %v637_v25 = vsel %vm2394_vm12, %v1394_v33, %v2393_v20  ;;  %v638_v13 = vsel %vm2396_vm13, %v2279_v24, %v2395_v26  ;;  %v2397_v35 = vld [vmem:[#allocation24_spill] sm:$0xff]  ;;  %v2399_v37 = vld [vmem:[#allocation25_spill] sm:$0xff] }
  0x84   : > { %v639_v19 = vsel %vm2398_vm14, %v2281_v10, %v2397_v35  ;;  %v640_v44 = vsel %vm2400_vm15, %v2283_v15, %v2399_v37  ;;  %698 = vst.msk [vmem:[%s1684_s12 + $0x1a0] sm:$0xff] %vm645_vm8, %v633_v38  ;;  %699 = vst.msk [vmem:[%s1684_s12 + $0x1a8] sm:$0xff] %vm645_vm8, %v634_v12  ;;  %v2401_v33 = vld [vmem:[#allocation26_spill] sm:$0xff]  ;;  %v2402_v10 = vld [vmem:[#allocation27_spill] sm:$0xff] }
  0x85   : > { %700 = vst.msk [vmem:[%s1684_s12 + $0x1b0] sm:$0xff] %vm645_vm8, %v635_v7  ;;  %701 = vst.msk [vmem:[%s1684_s12 + $0x1b8] sm:$0xff] %vm645_vm8, %v636_v4  ;;  %v641_v24 = vsel %vm512_vm11, %v2285_v27, %v2401_v33  ;;  %v642_v8 = vsel %vm2403_vm0, %v2287_v39, %v2402_v10  ;;  %v2404_v15 = vld [vmem:[#allocation28_spill] sm:$0xff]  ;;  %v2405_v29 = vld [vmem:[#allocation29_spill] sm:$0xff] }
  0x86   : > { %v643_v14 = vsel %vm514_vm5, %v2289_v16, %v2404_v15  ;;  %v644_v30 = vsel %vm2406_vm1, %v2291_v21, %v2405_v29  ;;  %702 = vst.msk [vmem:[%s1684_s12 + $0x1c0] sm:$0xff] %vm645_vm8, %v637_v25  ;;  %703 = vst.msk [vmem:[%s1684_s12 + $0x1c8] sm:$0xff] %vm645_vm8, %v638_v13 }
  0x87   : > { %704 = vst.msk [vmem:[%s1684_s12 + $0x1d0] sm:$0xff] %vm645_vm8, %v639_v19  ;;  %705 = vst.msk [vmem:[%s1684_s12 + $0x1d8] sm:$0xff] %vm645_vm8, %v640_v44 }
  0x88   : > { %706 = vst.msk [vmem:[%s1684_s12 + $0x1e0] sm:$0xff] %vm645_vm8, %v641_v24  ;;  %707 = vst.msk [vmem:[%s1684_s12 + $0x1e8] sm:$0xff] %vm645_vm8, %v642_v8 }
  0x89   : > { %708 = vst.msk [vmem:[%s1684_s12 + $0x1f0] sm:$0xff] %vm645_vm8, %v643_v14  ;;  %709 = vst.msk [vmem:[%s1684_s12 + $0x1f8] sm:$0xff] %vm645_vm8, %v644_v30 }
  0x8a PF: > { %s16_s21 = sadd.s32 1, %s906_s21   ;;  %s2407_s17 = smov %s898_s19 }
  0x8b   : > { %p13_p7 = scmp.ge.s32.totalorder %s16_s21, 6   ;;  %s2408_s18 = smov %s902_s20 }
  0x8c   : > { %s2409_s19 = smov %s2412_s3  ;;  %s2410_s20 = smov %s2416_s22 }
  0x8d   :  { %15 = sbr.rel (!%p13_p7) target bundleno = 3 (0x3), region = 66 }

// kernel: psp_upsample_forward.2
= control target key start
LH: loop header
LB: loop body
LE: loop exit
PB: predicated region body
PF: predicated region fallthrough
CT: control target
= control target key end

     0   :  { %s3458_s15 = smov 0   ;;  %s3460_s16 = smov 0   ;;  %s5607_s0 = inlined_call_operand.vmem [shape: bf16[2,18,34,8], index: 0, kind: input, shape index: {}]   ;;  %s5608_s1 = inlined_call_operand.vmem [shape: bf16[72,32], index: 1, kind: input, shape index: {}]   ;;  %s5609_s2 = inlined_call_operand.vmem [shape: f32[1,32], index: 2, kind: input, shape index: {}]   ;;  %s5610_s3 = inlined_call_operand.vmem [shape: f32[2,32,32,32], index: 3, kind: output, shape index: {0}]   ;;  %s5611_s4 = inlined_call_operand.vmem [shape: f32[4,2,32], index: 4, kind: output, shape index: {1}]  }
   0x1   :  { %s3462_s17 = smov 0   ;;  %s3464_s18 = smov 0  }
   0x2   :  { %s3466_s19 = smov 0  }
   0x3 LB: > { %s24_s20 = sadd.s32 1, %s3415_s17  ;;  %s27_s21 = sadd.s32 1, %s3419_s18  ;;  %s3423_s19 = sphi %s3466_s19, %s15_s19   ;;  %s3419_s18 = sphi %s3464_s18, %s5854_s18   ;;  %s3415_s17 = sphi %s3462_s17, %s5853_s17   ;;  %s3411_s16 = sphi %s3460_s16, %s5852_s16   ;;  %s3407_s15 = sphi %s3458_s15, %s5851_s15  }
   0x4   : > { %p25_p0 = scmp.ge.s32.totalorder %s24_s20, 2  ;;  %p3081_p1 = scmp.ge.s32.totalorder %s3423_s19, 1 }
   0x5   : > { %p183_p2 = scmp.lt.s32.totalorder %s3423_s19, 5 }
   0x6   : > { %s5856_s20 = smov (%p25_p0, %s24_s20), 0  ;;  %s5858_s21 = smov (!%p25_p0, %s27_s21), %s3419_s18 }
   0x7   : > { %p184_p3 = pnand %p3081_p1, %p183_p2  ;;  %p29_p4 = scmp.ge.s32.totalorder %s5858_s21, 2 }
   0x9   : > { %s5860_s21 = smov (%p29_p4, %s5858_s21), 0  ;;  %187 = sbr.rel (%p184_p3) target bundleno = 951 (0x3b7), region = 32 }
  0x10   : > { %p220_p5 = scmp.lt.s32.totalorder %s3411_s16, 1  ;;  %s3132_s23 = smul.u32 160, %s3407_s15  ;;  %vm609_vm0 = vsmask.f32 7424  ;;  %vm1042_vm1 = vcmask 1046528   ;;  %vm2255_vm2 = vcmask 1043456  }
  0x11   : > { %s3425_s29 = smov 8   ;;  %p519_p6 = scmp.gt.s32.totalorder %s3407_s15, 0  ;;  %vm1692_vm3 = vcmask 130048   ;;  %vm1627_vm4 = vcmask 64512   ;;  %vm1757_vm5 = vcmask 195584   ;;  %vm1822_vm6 = vcmask 261120  }
  0x12   : > { %s3494_s22 = scalar_select %p220_p5, %s3411_s16, 1  ;;  %vm1887_vm7 = vcmask 326656   ;;  %vm1952_vm8 = vcmask 392192   ;;  %vm2017_vm9 = vcmask 457728   ;;  %vm2082_vm10 = vcmask 523264  }
  0x13   : > { %s520_s30 = scalar_select %p519_p6, 1.0, 0.0  ;;  %vm2190_vm11 = vcmask 588800   ;;  %vm2878_vm12 = vcmask 1040384   ;;  %vm2880_vm13 = vcmask 254976  }
  0x14   : > { %s3330_s24 = smul.u32 360, %s3494_s22  ;;  %s3426_s5 = smov 16  }
  0x15   : > { %s3427_s12 = smov 24   ;;  %s3429_s26 = smov 40  }
  0x16   : > { %s224_s27 = scalar_lea.vmem %s5607_s0, %s3330_s24  ;;  %s3083_s6 = sshll.u32 %s3407_s15, 4 }
  0x17   : > { %s3501_s28 = scalar_lea.vmem %s224_s27, %s3132_s23  ;;  %s3428_s23 = smov 32  }
  0x18   : > { %v254_v0 = vld [vmem:[%s3501_s28 + $0x14] ss:$12 sps:$4 sm:$0xff]   ;;  %v3194_v1 = vld [vmem:[%s3501_s28 + $0x18] sm:$0xff]   ;;  %v3195_v2 = vld [vmem:[%s3501_s28 + $0x28] sm:$0xff]   ;;  %s3430_s27 = smov 48   ;;  %p228_p7 = scmp.lt.s32.totalorder %s3083_s6, 31 }
  0x19   : > { %v3143_v3 = vunpack.c.l.bf16 %v3194_v1  ;;  %v3144_v4 = vunpack.c.h.bf16 %v3194_v1  ;;  %v3147_v5 = vunpack.c.l.bf16 %v3195_v2  ;;  %v3148_v6 = vunpack.c.h.bf16 %v3195_v2  ;;  %v3196_v7 = vld [vmem:[%s3501_s28 + $0x30] sm:$0xff]   ;;  %v3508_v12 = vld [vmem:[%s3501_s28] sm:$0xff]   ;;  %v3511_v13 = vld [vmem:[%s3501_s28 + $0x8] sm:$0xff]   ;;  %s3085_s8 = sshll.u32 %s3494_s22, 7  ;;  %p521_p8 = scmp.lt.s32.totalorder %s3407_s15, 1 }
  0x1a   : > { %v3151_v8 = vunpack.c.l.bf16 %v3196_v7  ;;  %v3152_v9 = vunpack.c.h.bf16 %v3196_v7  ;;  %v304_v10 = vunpack.c.l.bf16 %v254_v0  ;;  %v307_v11 = vunpack.c.h.bf16 %v254_v0  ;;  %v3555_v50 = vld [vmem:[%s3501_s28 + $0x10] sm:$0x1]  ;;  %v3560_v55 = vld [vmem:[%s3501_s28 + $0x24] sm:$0x1]  ;;  %s5862_s6 = smov (!%p228_p7, %s3083_s6), 31 }
  0x1b   : > { %v3513_v14 = vmul.f32 0.25, %v3147_v5  ;;  %v3515_v15 = vmul.f32 0.25, %v3148_v6  ;;  %v390_v16 = vmul.f32 0.75, %v3143_v3  ;;  %v391_v17 = vmul.f32 0.75, %v3144_v4  ;;  %s3084_s7 = sshll.u32 %s5862_s6, 2 }
  0x1c   : > { %v3517_v18 = vmul.f32 0.25, %v3151_v8  ;;  %v3519_v19 = vmul.f32 0.25, %v3152_v9  ;;  %v389_v20 = vmul.f32 0.75, %v304_v10  ;;  %v392_v21 = vmul.f32 0.75, %v307_v11  ;;  %s232_s9 = sadd.s32 %s3085_s8, %s3084_s7 }
  0x1d   : > { %v480_v22 = vadd.f32 %v390_v16, %v3515_v15  ;;  %v3135_v23 = vunpack.c.l.bf16 %v3508_v12  ;;  %v3136_v24 = vunpack.c.h.bf16 %v3508_v12  ;;  %v3139_v25 = vunpack.c.l.bf16 %v3511_v13  ;;  %s3086_s22 = sshll.u32 %s232_s9, 3 }
  0x1e   : > { %v479_v26 = vadd.f32 %v389_v20, %v3513_v14  ;;  %v481_v27 = vadd.f32 %v391_v17, %v3517_v18  ;;  %v482_v28 = vadd.f32 %v392_v21, %v3519_v19  ;;  %v3140_v29 = vunpack.c.h.bf16 %v3511_v13  ;;  %s4903_s24 = scalar_lea.vmem %s5610_s3, %s3086_s22 }
  0x1f   : > { %v349_v30 = vmul.f32 0.25, %v3135_v23  ;;  %v350_v31 = vmul.f32 0.25, %v3136_v24  ;;  %v351_v32 = vmul.f32 0.25, %v3139_v25  ;;  %v3535_v33 = vmul.f32 0.25, %v304_v10 }
  0x20   : > { %v3537_v34 = vpack.c.bf16 %v480_v22, %v479_v26  ;;  %v3539_v35 = vpack.c.bf16 %v482_v28, %v481_v27  ;;  %v352_v36 = vmul.f32 0.25, %v3140_v29  ;;  %v3543_v37 = vmul.f32 0.25, %v3143_v3  ;;  %v263_v27 = vld [vmem:[%s3501_s28 + $0x38] sm:$0x1] }
  0x21   : > { %v429_v38 = vadd.f32 %v389_v20, %v349_v30  ;;  %v430_v39 = vadd.f32 %v390_v16, %v350_v31  ;;  %v431_v40 = vadd.f32 %v391_v17, %v351_v32  ;;  %v3545_v41 = vmul.f32 0.25, %v3144_v4  ;;  %v3197_v4 = vld [vmem:[%s3501_s28 + $0x40] sm:$0xff]   ;;  %v264_v17 = vld [vmem:[%s3501_s28 + $0x3c] ss:$12 sps:$4 sm:$0xff]  }
  0x22   : > { %v651_v42 = vshrl.u32 %v3537_v34, 16  ;;  %v653_v43 = vshll.u32 %v3537_v34, 16  ;;  %v658_v44 = vshll.u32 %v3539_v35, 16  ;;  %v432_v45 = vadd.f32 %v392_v21, %v352_v36 }
  0x23   : > { %v3550_v46 = vpack.c.bf16 %v430_v39, %v429_v38  ;;  %v3552_v47 = vmul.f32 0.25, %v307_v11  ;;  %v394_v48 = vmul.f32 0.75, %v3147_v5  ;;  %v395_v49 = vmul.f32 0.75, %v3148_v6 }
  0x24   : > { %v655_v51 = vrot.slane %v653_v43, 1  ;;  %v660_v52 = vrot.slane %v658_v44, 1  ;;  %v3557_v53 = vpack.c.bf16 %v432_v45, %v431_v40  ;;  %v396_v54 = vmul.f32 0.75, %v3151_v8 }
  0x25   : > { %v631_v56 = vshrl.u32 %v3550_v46, 16  ;;  %v633_v57 = vshll.u32 %v3550_v46, 16  ;;  %v397_v58 = vmul.f32 0.75, %v3152_v9  ;;  %v434_v59 = vadd.f32 %v394_v48, %v3535_v33 }
  0x26   : > { %v656_v60 = vor.u32 %v655_v51, %v651_v42  ;;  %v638_v61 = vshll.u32 %v3557_v53, 16  ;;  %v435_v62 = vadd.f32 %v395_v49, %v3543_v37  ;;  %v436_v63 = vadd.f32 %v396_v54, %v3545_v41 }
  0x27   : > { %v635_v0 = vrot.slane %v633_v57, 1  ;;  %v437_v1 = vadd.f32 %v397_v58, %v3552_v47  ;;  %v5616_v2 = vunpack.c.l.bf16 %v3555_v50  ;;  %v308_v3 = vunpack.c.l.bf16 %v3560_v55 }
  0x28   : > { %v3573_v5 = vsel %vm609_vm0, %v656_v60, %v660_v52  ;;  %v640_v6 = vrot.slane %v638_v61, 1  ;;  %v3575_v7 = vpack.c.bf16 %v435_v62, %v434_v59  ;;  %v642_v8 = vshrl.u32 %v3557_v53, 16 }
  0x29   : > { %938 = vrot.lane.b32.xlu0 %v3573_v5, %s3425_s29  ;;  %v636_v9 = vor.u32 %v635_v0, %v631_v56  ;;  %v3580_v10 = vpack.c.bf16 %v437_v1, %v436_v63  ;;  %v353_v11 = vmul.f32 0.25, %v5616_v2  ;;  %v393_v16 = vmul.f32 0.75, %v308_v3 }
  0x2a   : > { %v671_v20 = vshrl.u32 %v3575_v7, 16  ;;  %v673_v21 = vshll.u32 %v3575_v7, 16  ;;  %v644_v22 = vor.u32 %v642_v8, %v640_v6  ;;  %v3155_v26 = vunpack.c.l.bf16 %v3197_v4 }
  0x2b   : > { %v3591_v28 = vsel %vm609_vm0, %v636_v9, %v640_v6  ;;  %v678_v30 = vshll.u32 %v3580_v10, 16  ;;  %v433_v31 = vadd.f32 %v393_v16, %v353_v11  ;;  %v3156_v32 = vunpack.c.h.bf16 %v3197_v4 }
  0x2c   : > { %934 = vrot.lane.b32.xlu1 %v3591_v28, %s3425_s29  ;;  %v675_v36 = vrot.slane %v673_v21, 1  ;;  %v314_v38 = vunpack.c.l.bf16 %v264_v17  ;;  %v317_v39 = vunpack.c.h.bf16 %v264_v17  ;;  %v3596_v40 = vmul.f32 0.25, %v3155_v26 }
  0x2d   : > { %v680_v42 = vrot.slane %v678_v30, 1  ;;  %v3598_v43 = vpack.c.bf16 %v433_v31, %v433_v31  ;;  %v3600_v44 = vmul.f32 0.25, %v3156_v32  ;;  %v313_v45 = vunpack.c.l.bf16 %v263_v27 }
  0x2e   : > { %v676_v51 = vor.u32 %v675_v36, %v671_v20  ;;  %v3602_v56 = vmul.f32 0.25, %v314_v38  ;;  %v3604_v57 = vmul.f32 0.25, %v317_v39  ;;  %v485_v59 = vadd.f32 %v395_v49, %v3596_v40 }
  0x2f   : > { %v646_v60 = vshll.u32 %v3598_v43, 16  ;;  %v486_v61 = vadd.f32 %v396_v54, %v3600_v44  ;;  %v3609_v62 = vmul.f32 0.25, %v313_v45  ;;  %v662_v63 = vshrl.u32 %v3539_v35, 16 }
  0x30   : > { %v3613_v0 = vsel %vm609_vm0, %v676_v51, %v680_v42  ;;  %v484_v1 = vadd.f32 %v394_v48, %v3602_v56  ;;  %v487_v4 = vadd.f32 %v397_v58, %v3604_v57  ;;  %v399_v6 = vmul.f32 0.75, %v314_v38 }
  0x31   : > { %942 = vrot.lane.b32.xlu0 %v3613_v0, %s3425_s29  ;;  %v648_v49 = vrot.slane %v646_v60, 1  ;;  %v483_v8 = vadd.f32 %v393_v16, %v3609_v62  ;;  %v664_v9 = vor.u32 %v662_v63, %v660_v52  ;;  %v400_v54 = vmul.f32 0.75, %v3155_v26  ;;  %v3654_v63 = vld [vmem:[%s3501_s28 + $0x58] sm:$0xff]  }
  0x32   : > { %v3620_v11 = vpack.c.bf16 %v485_v59, %v484_v1  ;;  %v3622_v17 = vpack.c.bf16 %v487_v4, %v486_v61  ;;  %v401_v20 = vmul.f32 0.75, %v3156_v32  ;;  %v402_v21 = vmul.f32 0.75, %v317_v39 }
  0x33   : > { %v3625_v48 = vsel %vm609_vm0, %v644_v22, %v648_v49  ;;  %v3627_v58 = vpack.c.bf16 %v483_v8, %v483_v8  ;;  %v439_v27 = vadd.f32 %v399_v6, %v3513_v14  ;;  %v440_v30 = vadd.f32 %v400_v54, %v3515_v15  ;;  %v3646_v15 = vld [vmem:[%s3501_s28 + $0x50] sm:$0xff]  }
  0x34   : > { %936 = vrot.lane.b32.xlu1 %v3625_v48, %s3425_s29  ;;  %v691_v52 = vshrl.u32 %v3620_v11, 16  ;;  %v693_v16 = vshll.u32 %v3620_v11, 16  ;;  %v698_v26 = vshll.u32 %v3622_v17, 16  ;;  %v441_v31 = vadd.f32 %v401_v20, %v3517_v18 }
  0x35   : > { %v666_v22 = vshll.u32 %v3627_v58, 16  ;;  %v442_v32 = vadd.f32 %v402_v21, %v3519_v19  ;;  %v3639_v36 = vpack.c.bf16 %v440_v30, %v439_v27  ;;  %v3643_v14 = vmul.f32 0.25, %v308_v3  ;;  %v268_v30 = vld [vmem:[%s3501_s28 + $0x4c] sm:$0x1] }
  0x36   : > { %v695_v38 = vrot.slane %v693_v16, 1  ;;  %v700_v39 = vrot.slane %v698_v26, 1  ;;  %v398_v51 = vmul.f32 0.75, %v313_v45  ;;  %v682_v59 = vshrl.u32 %v3580_v10, 16 }
  0x37   : > { %v668_v60 = vrot.slane %v666_v22, 1  ;;  %v3649_v18 = vpack.c.bf16 %v442_v32, %v441_v31  ;;  %v711_v61 = vshrl.u32 %v3639_v36, 16  ;;  %v713_v19 = vshll.u32 %v3639_v36, 16 }
  0x38   : > { %v696_v55 = vor.u32 %v695_v38, %v691_v52  ;;  %v438_v3 = vadd.f32 %v398_v51, %v3643_v14  ;;  %v684_v1 = vor.u32 %v682_v59, %v680_v42  ;;  %v5614_v4 = vunpack.c.l.bf16 %v3646_v15 }
  0x39   : > { %v3659_v45 = vsel %vm609_vm0, %v664_v9, %v668_v60  ;;  %v715_v49 = vrot.slane %v713_v19, 1  ;;  %v718_v8 = vshll.u32 %v3649_v18, 16  ;;  %v5612_v27 = vunpack.c.h.bf16 %v3646_v15 }
  0x3a   : > { %v3665_v16 = vsel %vm609_vm0, %v696_v55, %v700_v39  ;;  %940 = vrot.lane.b32.xlu1 %v3659_v45, %s3425_s29  ;;  %v3669_v52 = vpack.c.bf16 %v438_v3, %v438_v3  ;;  %v5613_v42 = vunpack.c.l.bf16 %v3654_v63  ;;  %v5615_v26 = vunpack.c.h.bf16 %v3654_v63 }
  0x3b   : > { %5706 = vst [vmem:[#allocation2_spill] sm:$0xff] %v3665_v16  ;;  %946 = vrot.lane.b32.xlu0 %v3665_v16, %s3425_s29  ;;  %v716_v9 = vor.u32 %v715_v49, %v711_v61  ;;  %v720_v31 = vrot.slane %v718_v8, 1  ;;  %v3677_v22 = vmul.f32 0.25, %v5614_v4  ;;  %v3681_v32 = vmul.f32 0.25, %v5612_v27 }
  0x3c   : > { %v686_v38 = vshll.u32 %v3669_v52, 16  ;;  %v3687_v59 = vmul.f32 0.25, %v5613_v42  ;;  %v3691_v60 = vmul.f32 0.25, %v5615_v26  ;;  %v318_v61 = vunpack.c.l.bf16 %v268_v30 }
  0x3d   : > { %v3694_v19 = vsel %vm609_vm0, %v716_v9, %v720_v31  ;;  %v489_v55 = vadd.f32 %v399_v6, %v3677_v22  ;;  %v490_v3 = vadd.f32 %v400_v54, %v3681_v32  ;;  %v702_v49 = vshrl.u32 %v3622_v17, 16 }
  0x3e   : > { %5707 = vst [vmem:[#allocation3_spill] sm:$0xff] %v3694_v19  ;;  %v688_v8 = vrot.slane %v686_v38, 1  ;;  %v491_v27 = vadd.f32 %v401_v20, %v3687_v59  ;;  %v492_v42 = vadd.f32 %v402_v21, %v3691_v60  ;;  %v3701_v4 = vmul.f32 0.25, %v318_v61 }
  0x3f   : > { %950 = vrot.lane.b32.xlu0 %v3694_v19, %s3425_s29  ;;  %v3705_v30 = vpack.c.bf16 %v490_v3, %v489_v55  ;;  %v704_v9 = vor.u32 %v702_v49, %v700_v39  ;;  %v523_v6 = vmul.f32 0.75, %v3135_v23  ;;  %v524_v54 = vmul.f32 0.75, %v3136_v24 }
  0x40   : > { %v3714_v20 = vsel %vm609_vm0, %v684_v1, %v688_v8  ;;  %v3716_v21 = vpack.c.bf16 %v492_v42, %v491_v27  ;;  %v488_v38 = vadd.f32 %v398_v51, %v3701_v4  ;;  %v525_v55 = vmul.f32 0.75, %v3139_v25 }
  0x41   : > { %5708 = vst [vmem:[#allocation4_spill] sm:$0xff] %v3705_v30  ;;  %944 = vrot.lane.b32.xlu1 %v3714_v20, %s3425_s29  ;;  %v731_v39 = vshrl.u32 %v3705_v30, 16  ;;  %v733_v23 = vshll.u32 %v3705_v30, 16  ;;  %v526_v12 = vmul.f32 0.75, %v3140_v29  ;;  %v528_v24 = vadd.f32 %v523_v6, %v3535_v33  ;;  %v273_v30 = vld [vmem:[%s3501_s28 + $0x60] sm:$0x1] }
  0x42   : > { %v738_v1 = vshll.u32 %v3716_v21, 16  ;;  %v3729_v27 = vpack.c.bf16 %v488_v38, %v488_v38  ;;  %v529_v51 = vadd.f32 %v524_v54, %v3543_v37  ;;  %v530_v25 = vadd.f32 %v525_v55, %v3545_v41 }
  0x43   : > { %v735_v42 = vrot.slane %v733_v23, 1  ;;  %v531_v3 = vadd.f32 %v526_v12, %v3552_v47  ;;  %v533_v49 = vstv %s520_s30  ;;  %v403_v8 = vmul.f32 0.75, %v318_v61  ;;  %s3432_s30 = smov 64  }
  0x44   : > { %v740_v26 = vrot.slane %v738_v1, 1  ;;  %v706_v2 = vshll.u32 %v3729_v27, 16  ;;  %v534_v13 = vmul.f32 %v533_v49, %v528_v24  ;;  %v535_v29 = vmul.f32 %v533_v49, %v529_v51 }
  0x45   : > { %v736_v33 = vor.u32 %v735_v42, %v731_v39  ;;  %v536_v6 = vmul.f32 %v533_v49, %v530_v25  ;;  %v537_v19 = vmul.f32 %v533_v49, %v531_v3  ;;  %v443_v38 = vadd.f32 %v403_v8, %v3609_v62 }
  0x46   : > { %v708_v16 = vrot.slane %v706_v2, 1  ;;  %v3737_v37 = vpack.c.bf16 %v535_v29, %v534_v13  ;;  %v722_v41 = vshrl.u32 %v3649_v18, 16  ;;  %v5709_v47 = vunpack.c.l.bf16 %v3555_v50 }
  0x47   : > { %v3743_v61 = vsel %vm609_vm0, %v736_v33, %v740_v26  ;;  %v3745_v55 = vpack.c.bf16 %v537_v19, %v536_v6  ;;  %v3747_v23 = vpack.c.bf16 %v443_v38, %v443_v38  ;;  %v323_v39 = vunpack.c.l.bf16 %v273_v30 }
  0x48   : > { %v527_v54 = vmul.f32 0.75, %v5709_v47  ;;  %954 = vrot.lane.b32.xlu0 %v3743_v61, %s3425_s29  ;;  %v3752_v2 = vsel %vm609_vm0, %v704_v9, %v708_v16  ;;  %v611_v62 = vshrl.u32 %v3737_v37, 16  ;;  %v613_v12 = vshll.u32 %v3737_v37, 16 }
  0x49   : > { %v724_v50 = vor.u32 %v722_v41, %v720_v31  ;;  %948 = vrot.lane.b32.xlu1 %v3752_v2, %s3425_s29  ;;  %v618_v19 = vshll.u32 %v3745_v55, 16  ;;  %v726_v24 = vshll.u32 %v3747_v23, 16  ;;  %v622_v1 = vshrl.u32 %v3745_v55, 16 }
  0x4a   : > { %v532_v30 = vadd.f32 %v527_v54, %v3643_v14  ;;  %v615_v51 = vrot.slane %v613_v12, 1  ;;  %v3762_v16 = vmul.f32 0.25, %v323_v39  ;;  %v742_v9 = vshrl.u32 %v3716_v21, 16 }
  0x4b   : > { %v5710_v25 = vunpack.c.l.bf16 %v3646_v15  ;;  %v620_v42 = vrot.slane %v618_v19, 1  ;;  %v728_v3 = vrot.slane %v726_v24, 1  ;;  %v5711_v29 = vunpack.c.h.bf16 %v3646_v15  ;;  %v3200_v24 = vld [vmem:[%s3501_s28 + $0x68] sm:$0xff]  }
  0x4c   : > { %v538_v13 = vmul.f32 %v533_v49, %v532_v30  ;;  %v616_v6 = vor.u32 %v615_v51, %v611_v62  ;;  %v493_v14 = vadd.f32 %v403_v8, %v3762_v16  ;;  %v744_v38 = vor.u32 %v742_v9, %v740_v26 }
  0x4d   : > { %v404_v31 = vmul.f32 0.75, %v5710_v25  ;;  %v405_v33 = vmul.f32 0.75, %v5711_v29  ;;  %v5712_v41 = vunpack.c.l.bf16 %v3654_v63  ;;  %v3773_v54 = vsel %vm609_vm0, %v724_v50, %v728_v3  ;;  %v274_v50 = vld [vmem:[%s3501_s28 + $0x64] ss:$12 sps:$4 sm:$0xff]  }
  0x4e   : > { %v3775_v12 = vpack.c.bf16 %v538_v13, %v538_v13  ;;  %v624_v25 = vor.u32 %v622_v1, %v620_v42  ;;  %v5713_v19 = vunpack.c.h.bf16 %v3654_v63  ;;  %v621_v15 = vsel %vm609_vm0, %v616_v6, %v620_v42  ;;  %952 = vrot.lane.b32.xlu1 %v3773_v54, %s3425_s29 }
  0x4f   : > { %v406_v47 = vmul.f32 0.75, %v5712_v41  ;;  %v3783_v8 = vpack.c.bf16 %v493_v14, %v493_v14  ;;  %v444_v26 = vadd.f32 %v404_v31, %v3602_v56  ;;  %v445_v62 = vadd.f32 %v405_v33, %v3596_v40  ;;  %930 = vrot.lane.b32.xlu0 %v621_v15, %s3425_s29 }
  0x50   : > { %v407_v49 = vmul.f32 0.75, %v5713_v19  ;;  %v626_v30 = vshll.u32 %v3775_v12, 16  ;;  %v408_v51 = vmul.f32 0.75, %v323_v39  ;;  %v3167_v3 = vunpack.c.l.bf16 %v3200_v24 }
  0x51   : > { %v446_v63 = vadd.f32 %v406_v47, %v3600_v44  ;;  %v746_v9 = vshll.u32 %v3783_v8, 16  ;;  %v3793_v42 = vpack.c.bf16 %v445_v62, %v444_v26  ;;  %v3168_v13 = vunpack.c.h.bf16 %v3200_v24  ;;  %v278_v26 = vld [vmem:[%s3501_s28 + $0x74] sm:$0x1] }
  0x52   : > { %v447_v1 = vadd.f32 %v407_v49, %v3604_v57  ;;  %v628_v56 = vrot.slane %v626_v30, 1  ;;  %v448_v40 = vadd.f32 %v408_v51, %v3701_v4  ;;  %v324_v6 = vunpack.c.l.bf16 %v274_v50 }
  0x53   : > { %5714 = vst [vmem:[#allocation5_spill] sm:$0xff] %v3793_v42  ;;  %v748_v14 = vrot.slane %v746_v9, 1  ;;  %v751_v41 = vshrl.u32 %v3793_v42, 16  ;;  %v753_v44 = vshll.u32 %v3793_v42, 16  ;;  %v327_v57 = vunpack.c.h.bf16 %v274_v50 }
  0x54   : > { %v3795_v29 = vpack.c.bf16 %v447_v1, %v446_v63  ;;  %v629_v39 = vsel %vm609_vm0, %v624_v25, %v628_v56  ;;  %v3802_v15 = vpack.c.bf16 %v448_v40, %v448_v40  ;;  %v3810_v30 = vmul.f32 0.25, %v324_v6 }
  0x55   : > { %932 = vrot.lane.b32.xlu0 %v629_v39, %s3425_s29  ;;  %v3808_v4 = vsel %vm609_vm0, %v744_v38, %v748_v14  ;;  %v755_v62 = vrot.slane %v753_v44, 1  ;;  %v3812_v63 = vmul.f32 0.25, %v3167_v3  ;;  %v3817_v1 = vmul.f32 0.25, %v3168_v13 }
  0x56   : > { %5715 = vst [vmem:[#allocation6_spill] sm:$0xff] %v3795_v29  ;;  %v758_v19 = vshll.u32 %v3795_v29, 16  ;;  %5716 = vst [vmem:[#allocation7_spill] sm:$0xff] %v3802_v15  ;;  %v762_v24 = vshrl.u32 %v3795_v29, 16  ;;  %956 = vrot.lane.b32.xlu1 %v3808_v4, %s3425_s29  ;;  %v766_v50 = vshll.u32 %v3802_v15, 16  ;;  %v3819_v9 = vmul.f32 0.25, %v327_v57 }
  0x57   : > { %5717 = vst [vmem:[#allocation8_spill] sm:$0xff] %v3808_v4  ;;  %v756_v56 = vor.u32 %v755_v62, %v751_v41  ;;  %v494_v40 = vadd.f32 %v404_v31, %v3810_v30  ;;  %v495_v38 = vadd.f32 %v405_v33, %v3812_v63  ;;  %v328_v14 = vunpack.c.l.bf16 %v278_v26 }
  0x58   : > { %v760_v25 = vrot.slane %v758_v19, 1  ;;  %v768_v39 = vrot.slane %v766_v50, 1  ;;  %v496_v29 = vadd.f32 %v406_v47, %v3817_v1  ;;  %v497_v42 = vadd.f32 %v407_v49, %v3819_v9 }
  0x59   : > { %v3828_v15 = vpack.c.bf16 %v495_v38, %v494_v40  ;;  %v3830_v4 = vmul.f32 0.25, %v328_v14  ;;  %v409_v41 = vmul.f32 0.75, %v324_v6  ;;  %v410_v47 = vmul.f32 0.75, %v3167_v3 }
  0x5a   : > { %v764_v44 = vor.u32 %v762_v24, %v760_v25  ;;  %v3826_v19 = vsel %vm609_vm0, %v756_v56, %v760_v25  ;;  %v3837_v33 = vpack.c.bf16 %v497_v42, %v496_v29  ;;  %v411_v24 = vmul.f32 0.75, %v3168_v13  ;;  %v3201_v25 = vld [vmem:[%s3501_s28 + $0x78] sm:$0xff]  }
  0x5b   : > { %5718 = vst [vmem:[#allocation9_spill] sm:$0xff] %v3826_v19  ;;  %5719 = vst [vmem:[#allocation10_spill] sm:$0xff] %v3828_v15  ;;  %958 = vrot.lane.b32.xlu0 %v3826_v19, %s3425_s29  ;;  %v771_v49 = vshrl.u32 %v3828_v15, 16  ;;  %v773_v26 = vshll.u32 %v3828_v15, 16  ;;  %v498_v62 = vadd.f32 %v408_v51, %v3830_v4  ;;  %v412_v6 = vmul.f32 0.75, %v327_v57 }
  0x5c   : > { %v3835_v31 = vsel %vm609_vm0, %v764_v44, %v768_v39  ;;  %5721 = vst [vmem:[#allocation12_spill] sm:$0xff] %v3837_v33  ;;  %v778_v50 = vshll.u32 %v3837_v33, 16  ;;  %v782_v56 = vshrl.u32 %v3837_v33, 16  ;;  %v449_v42 = vadd.f32 %v409_v41, %v3677_v22 }
  0x5d   : > { %5720 = vst [vmem:[#allocation11_spill] sm:$0xff] %v3835_v31  ;;  %960 = vrot.lane.b32.xlu1 %v3835_v31, %s3425_s29  ;;  %v450_v3 = vadd.f32 %v410_v47, %v3681_v32  ;;  %v775_v13 = vrot.slane %v773_v26, 1  ;;  %v3849_v29 = vpack.c.bf16 %v498_v62, %v498_v62  ;;  %v451_v40 = vadd.f32 %v411_v24, %v3687_v59  ;;  %v3202_v32 = vld [vmem:[%s3501_s28 + $0x80] sm:$0xff]  }
  0x5e   : > { %v452_v38 = vadd.f32 %v412_v6, %v3691_v60  ;;  %v780_v44 = vrot.slane %v778_v50, 1  ;;  %v413_v57 = vmul.f32 0.75, %v328_v14  ;;  %v3171_v39 = vunpack.c.l.bf16 %v3201_v25 }
  0x5f   : > { %5722 = vst [vmem:[#allocation13_spill] sm:$0xff] %v3849_v29  ;;  %v3853_v51 = vpack.c.bf16 %v450_v3, %v449_v42  ;;  %v776_v15 = vor.u32 %v775_v13, %v771_v49  ;;  %v786_v31 = vshll.u32 %v3849_v29, 16  ;;  %v3172_v22 = vunpack.c.h.bf16 %v3201_v25 }
  0x60   : > { %v3856_v33 = vpack.c.bf16 %v452_v38, %v451_v40  ;;  %v784_v26 = vor.u32 %v782_v56, %v780_v44  ;;  %v453_v60 = vadd.f32 %v413_v57, %v3762_v16  ;;  %v3175_v56 = vunpack.c.l.bf16 %v3202_v32  ;;  %v283_v40 = vld [vmem:[%s3501_s28 + $0x88] sm:$0x1] }
  0x61   : > { %5723 = vst [vmem:[#allocation14_spill] sm:$0xff] %v3853_v51  ;;  %v791_v62 = vshrl.u32 %v3853_v51, 16  ;;  %v793_v59 = vshll.u32 %v3853_v51, 16  ;;  %v3863_v50 = vsel %vm609_vm0, %v776_v15, %v780_v44  ;;  %v788_v14 = vrot.slane %v786_v31, 1 }
  0x62   : > { %5724 = vst [vmem:[#allocation15_spill] sm:$0xff] %v3856_v33  ;;  %5725 = vst [vmem:[#allocation16_spill] sm:$0xff] %v3863_v50  ;;  %v798_v49 = vshll.u32 %v3856_v33, 16  ;;  %v802_v42 = vshrl.u32 %v3856_v33, 16  ;;  %962 = vrot.lane.b32.xlu0 %v3863_v50, %s3425_s29  ;;  %v3869_v3 = vpack.c.bf16 %v453_v60, %v453_v60  ;;  %v3176_v13 = vunpack.c.h.bf16 %v3202_v32 }
  0x63   : > { %v795_v25 = vrot.slane %v793_v59, 1  ;;  %v3873_v38 = vsel %vm609_vm0, %v784_v26, %v788_v14  ;;  %v3875_v15 = vmul.f32 0.25, %v3171_v39  ;;  %v3877_v31 = vmul.f32 0.25, %v3172_v22 }
  0x64   : > { %5726 = vst [vmem:[#allocation17_spill] sm:$0xff] %v3869_v3  ;;  %5727 = vst [vmem:[#allocation18_spill] sm:$0xff] %v3873_v38  ;;  %v800_v16 = vrot.slane %v798_v49, 1  ;;  %964 = vrot.lane.b32.xlu1 %v3873_v38, %s3425_s29  ;;  %v806_v33 = vshll.u32 %v3869_v3, 16  ;;  %v3882_v59 = vmul.f32 0.25, %v3175_v56  ;;  %v3884_v60 = vmul.f32 0.25, %v3176_v13 }
  0x65   : > { %v796_v44 = vor.u32 %v795_v25, %v791_v62  ;;  %v499_v51 = vadd.f32 %v409_v41, %v3875_v15  ;;  %v500_v26 = vadd.f32 %v410_v47, %v3877_v31  ;;  %v333_v14 = vunpack.c.l.bf16 %v283_v40 }
  0x66   : > { %v804_v32 = vor.u32 %v802_v42, %v800_v16  ;;  %v808_v50 = vrot.slane %v806_v33, 1  ;;  %v501_v29 = vadd.f32 %v411_v24, %v3882_v59  ;;  %v502_v62 = vadd.f32 %v412_v6, %v3884_v60 }
  0x67   : > { %v3889_v49 = vsel %vm609_vm0, %v796_v44, %v800_v16  ;;  %v3895_v25 = vpack.c.bf16 %v500_v26, %v499_v51  ;;  %v3897_v42 = vmul.f32 0.25, %v333_v14  ;;  %v414_v41 = vmul.f32 0.75, %v3171_v39 }
  0x68   : > { %5728 = vst [vmem:[#allocation19_spill] sm:$0xff] %v3889_v49  ;;  %966 = vrot.lane.b32.xlu0 %v3889_v49, %s3425_s29  ;;  %v415_v3 = vmul.f32 0.75, %v3172_v22  ;;  %v3900_v47 = vsel %vm609_vm0, %v804_v32, %v808_v50  ;;  %v3902_v40 = vpack.c.bf16 %v502_v62, %v501_v29  ;;  %v416_v33 = vmul.f32 0.75, %v3175_v56  ;;  %v3203_v22 = vld [vmem:[%s3501_s28 + $0x90] sm:$0xff]  }
  0x69   : > { %5729 = vst [vmem:[#allocation20_spill] sm:$0xff] %v3895_v25  ;;  %5730 = vst [vmem:[#allocation21_spill] sm:$0xff] %v3900_v47  ;;  %v417_v24 = vmul.f32 0.75, %v3176_v13  ;;  %968 = vrot.lane.b32.xlu1 %v3900_v47, %s3425_s29  ;;  %v811_v6 = vshrl.u32 %v3895_v25, 16  ;;  %v813_v51 = vshll.u32 %v3895_v25, 16  ;;  %v503_v16 = vadd.f32 %v413_v57, %v3897_v42 }
  0x6a   : > { %5731 = vst [vmem:[#allocation22_spill] sm:$0xff] %v3902_v40  ;;  %v454_v39 = vadd.f32 %v414_v41, %v3810_v30  ;;  %v818_v50 = vshll.u32 %v3902_v40, 16  ;;  %v822_v29 = vshrl.u32 %v3902_v40, 16  ;;  %v455_v56 = vadd.f32 %v415_v3, %v3812_v63  ;;  %v284_v25 = vld [vmem:[%s3501_s28 + $0x8c] ss:$12 sps:$4 sm:$0xff]  }
  0x6b   : > { %v456_v13 = vadd.f32 %v416_v33, %v3817_v1  ;;  %v815_v44 = vrot.slane %v813_v51, 1  ;;  %v3915_v32 = vpack.c.bf16 %v503_v16, %v503_v16  ;;  %v457_v26 = vadd.f32 %v417_v24, %v3819_v9 }
  0x6c   : > { %v418_v62 = vmul.f32 0.75, %v333_v14  ;;  %v820_v47 = vrot.slane %v818_v50, 1  ;;  %v3919_v57 = vpack.c.bf16 %v455_v56, %v454_v39  ;;  %v3179_v30 = vunpack.c.l.bf16 %v3203_v22 }
  0x6d   : > { %5732 = vst [vmem:[#allocation23_spill] sm:$0xff] %v3915_v32  ;;  %v3180_v49 = vunpack.c.h.bf16 %v3203_v22  ;;  %v816_v38 = vor.u32 %v815_v44, %v811_v6  ;;  %v826_v19 = vshll.u32 %v3915_v32, 16  ;;  %v3922_v40 = vpack.c.bf16 %v457_v26, %v456_v13  ;;  %v288_v13 = vld [vmem:[%s3501_s28 + $0x9c] sm:$0x1] }
  0x6e   : > { %5733 = vst [vmem:[#allocation24_spill] sm:$0xff] %v3919_v57  ;;  %v458_v63 = vadd.f32 %v418_v62, %v3830_v4  ;;  %v824_v1 = vor.u32 %v822_v29, %v820_v47  ;;  %v831_v51 = vshrl.u32 %v3919_v57, 16  ;;  %v833_v9 = vshll.u32 %v3919_v57, 16 }
  0x6f   : > { %5734 = vst [vmem:[#allocation25_spill] sm:$0xff] %v3922_v40  ;;  %v334_v14 = vunpack.c.l.bf16 %v284_v25  ;;  %v3928_v16 = vsel %vm609_vm0, %v816_v38, %v820_v47  ;;  %v828_v39 = vrot.slane %v826_v19, 1  ;;  %v838_v22 = vshll.u32 %v3922_v40, 16 }
  0x70   : > { %5735 = vst [vmem:[#allocation26_spill] sm:$0xff] %v3928_v16  ;;  %v3931_v6 = vpack.c.bf16 %v458_v63, %v458_v63  ;;  %970 = vrot.lane.b32.xlu0 %v3928_v16, %s3425_s29  ;;  %v835_v50 = vrot.slane %v833_v9, 1  ;;  %v842_v4 = vshrl.u32 %v3922_v40, 16  ;;  %v337_v29 = vunpack.c.h.bf16 %v284_v25 }
  0x71   : > { %v3936_v56 = vmul.f32 0.25, %v334_v14  ;;  %v3940_v44 = vsel %vm609_vm0, %v824_v1, %v828_v39  ;;  %v840_v38 = vrot.slane %v838_v22, 1  ;;  %v3943_v47 = vmul.f32 0.25, %v3179_v30 }
  0x72   : > { %5736 = vst [vmem:[#allocation27_spill] sm:$0xff] %v3931_v6  ;;  %5737 = vst [vmem:[#allocation28_spill] sm:$0xff] %v3940_v44  ;;  %v846_v19 = vshll.u32 %v3931_v6, 16  ;;  %972 = vrot.lane.b32.xlu1 %v3940_v44, %s3425_s29  ;;  %v836_v26 = vor.u32 %v835_v50, %v831_v51  ;;  %v3947_v63 = vmul.f32 0.25, %v3180_v49  ;;  %v3949_v9 = vmul.f32 0.25, %v337_v29 }
  0x73   : > { %v504_v25 = vadd.f32 %v414_v41, %v3936_v56  ;;  %v844_v40 = vor.u32 %v842_v4, %v840_v38  ;;  %v505_v1 = vadd.f32 %v415_v3, %v3943_v47  ;;  %v338_v39 = vunpack.c.l.bf16 %v288_v13 }
  0x74   : > { %v848_v57 = vrot.slane %v846_v19, 1  ;;  %v3954_v22 = vsel %vm609_vm0, %v836_v26, %v840_v38  ;;  %v506_v6 = vadd.f32 %v416_v33, %v3947_v63  ;;  %v507_v16 = vadd.f32 %v417_v24, %v3949_v9  ;;  %v3204_v26 = vld [vmem:[%s3501_s28 + $0xa0] sm:$0xff]  }
  0x75   : > { %5738 = vst [vmem:[#allocation29_spill] sm:$0xff] %v3954_v22  ;;  %v419_v51 = vmul.f32 0.75, %v334_v14  ;;  %974 = vrot.lane.b32.xlu0 %v3954_v22, %s3425_s29  ;;  %v3963_v41 = vpack.c.bf16 %v505_v1, %v504_v25  ;;  %v3965_v4 = vmul.f32 0.25, %v338_v39  ;;  %v420_v3 = vmul.f32 0.75, %v3179_v30  ;;  %v3205_v22 = vld [vmem:[%s3501_s28 + $0xa8] sm:$0xff]  }
  0x76   : > { %v3961_v50 = vsel %vm609_vm0, %v844_v40, %v848_v57  ;;  %v3969_v13 = vpack.c.bf16 %v507_v16, %v506_v6  ;;  %v421_v33 = vmul.f32 0.75, %v3180_v49  ;;  %v422_v24 = vmul.f32 0.75, %v337_v29 }
  0x77   : > { %5739 = vst [vmem:[#allocation30_spill] sm:$0xff] %v3961_v50  ;;  %5740 = vst [vmem:[#allocation31_spill] sm:$0xff] %v3963_v41  ;;  %976 = vrot.lane.b32.xlu1 %v3961_v50, %s3425_s29  ;;  %v459_v14 = vadd.f32 %v419_v51, %v3875_v15  ;;  %v851_v38 = vshrl.u32 %v3963_v41, 16  ;;  %v853_v19 = vshll.u32 %v3963_v41, 16  ;;  %v508_v40 = vadd.f32 %v418_v62, %v3965_v4 }
  0x78   : > { %v460_v57 = vadd.f32 %v420_v3, %v3877_v31  ;;  %v858_v30 = vshll.u32 %v3969_v13, 16  ;;  %v862_v25 = vshrl.u32 %v3969_v13, 16  ;;  %v461_v16 = vadd.f32 %v421_v33, %v3882_v59 }
  0x79   : > { %v462_v49 = vadd.f32 %v422_v24, %v3884_v60  ;;  %v855_v6 = vrot.slane %v853_v19, 1  ;;  %v3981_v15 = vpack.c.bf16 %v508_v40, %v508_v40  ;;  %v423_v1 = vmul.f32 0.75, %v338_v39 }
  0x7a   : > { %v3983_v29 = vpack.c.bf16 %v460_v57, %v459_v14  ;;  %v860_v41 = vrot.slane %v858_v30, 1  ;;  %v3183_v62 = vunpack.c.l.bf16 %v3204_v26  ;;  %v3184_v31 = vunpack.c.h.bf16 %v3204_v26 }
  0x7b   : > { %5741 = vst [vmem:[#allocation32_spill] sm:$0xff] %v3981_v15  ;;  %v3985_v50 = vpack.c.bf16 %v462_v49, %v461_v16  ;;  %v856_v44 = vor.u32 %v855_v6, %v851_v38  ;;  %v866_v32 = vshll.u32 %v3981_v15, 16  ;;  %v463_v14 = vadd.f32 %v423_v1, %v3897_v42 }
  0x7c   : > { %5742 = vst [vmem:[#allocation33_spill] sm:$0xff] %v3983_v29  ;;  %v871_v59 = vshrl.u32 %v3983_v29, 16  ;;  %v873_v60 = vshll.u32 %v3983_v29, 16  ;;  %v864_v19 = vor.u32 %v862_v25, %v860_v41  ;;  %v3187_v38 = vunpack.c.l.bf16 %v3205_v22  ;;  %v293_v29 = vld [vmem:[%s3501_s28 + $0xb0] sm:$0x1] }
  0x7d   : > { %5743 = vst [vmem:[#allocation34_spill] sm:$0xff] %v3985_v50  ;;  %v878_v40 = vshll.u32 %v3985_v50, 16  ;;  %v882_v39 = vshrl.u32 %v3985_v50, 16  ;;  %v3995_v57 = vsel %vm609_vm0, %v856_v44, %v860_v41  ;;  %v868_v26 = vrot.slane %v866_v32, 1 }
  0x7e   : > { %v875_v30 = vrot.slane %v873_v60, 1  ;;  %978 = vrot.lane.b32.xlu0 %v3995_v57, %s3425_s29  ;;  %v3999_v49 = vpack.c.bf16 %v463_v14, %v463_v14  ;;  %v3188_v6 = vunpack.c.h.bf16 %v3205_v22  ;;  %v4001_v25 = vmul.f32 0.25, %v3183_v62 }
  0x7f   : > { %v880_v16 = vrot.slane %v878_v40, 1  ;;  %v4005_v42 = vsel %vm609_vm0, %v864_v19, %v868_v26  ;;  %v4007_v15 = vmul.f32 0.25, %v3184_v31  ;;  %v4009_v44 = vmul.f32 0.25, %v3187_v38 }
  0x80   : > { %5744 = vst [vmem:[#allocation35_spill] sm:$0xff] %v3999_v49  ;;  %5745 = vst [vmem:[#allocation36_spill] sm:$0xff] %v4001_v25  ;;  %v876_v50 = vor.u32 %v875_v30, %v871_v59  ;;  %980 = vrot.lane.b32.xlu1 %v4005_v42, %s3425_s29  ;;  %v886_v41 = vshll.u32 %v3999_v49, 16  ;;  %v4014_v60 = vmul.f32 0.25, %v3188_v6  ;;  %v509_v22 = vadd.f32 %v4001_v25, %v419_v51 }
  0x81   : > { %5746 = vst [vmem:[#allocation37_spill] sm:$0xff] %v4005_v42  ;;  %5747 = vst [vmem:[#allocation38_spill] sm:$0xff] %v4007_v15  ;;  %v884_v32 = vor.u32 %v882_v39, %v880_v16  ;;  %v510_v19 = vadd.f32 %v4007_v15, %v420_v3  ;;  %v511_v59 = vadd.f32 %v4009_v44, %v421_v33  ;;  %v343_v14 = vunpack.c.l.bf16 %v293_v29 }
  0x82   : > { %5748 = vst [vmem:[#allocation39_spill] sm:$0xff] %v4009_v44  ;;  %5749 = vst [vmem:[#allocation40_spill] sm:$0xff] %v4014_v60  ;;  %v4018_v40 = vsel %vm609_vm0, %v876_v50, %v880_v16  ;;  %v888_v26 = vrot.slane %v886_v41, 1  ;;  %v512_v39 = vadd.f32 %v4014_v60, %v422_v24  ;;  %v4025_v30 = vmul.f32 0.75, %v3183_v62 }
  0x83   : > { %982 = vrot.lane.b32.xlu0 %v4018_v40, %s3425_s29  ;;  %v4027_v49 = vmul.f32 0.75, %v3184_v31  ;;  %v4029_v42 = vpack.c.bf16 %v510_v19, %v509_v22  ;;  %v4031_v51 = vmul.f32 0.25, %v343_v14  ;;  %v4033_v50 = vmul.f32 0.75, %v3187_v38 }
  0x84   : > { %5750 = vst [vmem:[#allocation41_spill] sm:$0xff] %v4025_v30  ;;  %v4035_v3 = vmul.f32 0.75, %v3188_v6  ;;  %v4038_v33 = vsel %vm609_vm0, %v884_v32, %v888_v26  ;;  %v4040_v29 = vpack.c.bf16 %v512_v39, %v511_v59  ;;  %v464_v24 = vadd.f32 %v4025_v30, %v3936_v56  ;;  %v5783_v30 = vld [vmem:[#allocation4_spill] sm:$0xff] }
  0x85   : > { %5751 = vst [vmem:[#allocation42_spill] sm:$0xff] %v4027_v49  ;;  %5752 = vst [vmem:[#allocation43_spill] sm:$0xff] %v4031_v51  ;;  %v465_v62 = vadd.f32 %v4027_v49, %v3943_v47  ;;  %984 = vrot.lane.b32.xlu1 %v4038_v33, %s3425_s29  ;;  %v891_v31 = vshrl.u32 %v4029_v42, 16  ;;  %v893_v38 = vshll.u32 %v4029_v42, 16  ;;  %v513_v16 = vadd.f32 %v4031_v51, %v423_v1 }
  0x86   : > { %5753 = vst [vmem:[#allocation44_spill] sm:$0xff] %v4033_v50  ;;  %5754 = vst [vmem:[#allocation45_spill] sm:$0xff] %v4035_v3  ;;  %v466_v6 = vadd.f32 %v4033_v50, %v3947_v63  ;;  %v898_v32 = vshll.u32 %v4040_v29, 16  ;;  %v902_v41 = vshrl.u32 %v4040_v29, 16  ;;  %v467_v56 = vadd.f32 %v4035_v3, %v3949_v9 }
  0x87   : > { %5755 = vst [vmem:[#allocation46_spill] sm:$0xff] %v4040_v29  ;;  %v4057_v47 = vpack.c.bf16 %v465_v62, %v464_v24  ;;  %v895_v22 = vrot.slane %v893_v38, 1  ;;  %v4059_v19 = vpack.c.bf16 %v513_v16, %v513_v16  ;;  %v4061_v59 = vmul.f32 0.75, %v343_v14  ;;  %v5785_v29 = vld [vmem:[#allocation5_spill] sm:$0xff] }
  0x88   : > { %v900_v26 = vrot.slane %v898_v32, 1  ;;  %v4063_v39 = vpack.c.bf16 %v467_v56, %v466_v6 }
  0x89   : > { %5756 = vst [vmem:[#allocation47_spill] sm:$0xff] %v4057_v47  ;;  %5757 = vst [vmem:[#allocation48_spill] sm:$0xff] %v4059_v19  ;;  %v911_v1 = vshrl.u32 %v4057_v47, 16  ;;  %v913_v63 = vshll.u32 %v4057_v47, 16  ;;  %v896_v51 = vor.u32 %v895_v22, %v891_v31  ;;  %v906_v60 = vshll.u32 %v4059_v19, 16 }
  0x8a   : > { %5758 = vst [vmem:[#allocation49_spill] sm:$0xff] %v4061_v59  ;;  %5759 = vst [vmem:[#allocation50_spill] sm:$0xff] %v4063_v39  ;;  %v468_v9 = vadd.f32 %v4061_v59, %v3965_v4  ;;  %v904_v24 = vor.u32 %v902_v41, %v900_v26  ;;  %v918_v38 = vshll.u32 %v4063_v39, 16  ;;  %v922_v14 = vshrl.u32 %v4063_v39, 16 }
  0x8b   : > { %v915_v62 = vrot.slane %v913_v63, 1  ;;  %v4073_v16 = vsel %vm609_vm0, %v896_v51, %v900_v26  ;;  %v908_v6 = vrot.slane %v906_v60, 1  ;;  %v1043_v41 = vrot.slane %v3737_v37, 1 }
  0x8c   : > { %5760 = vst [vmem:[#allocation51_spill] sm:$0xff] %v4073_v16  ;;  %v4075_v32 = vpack.c.bf16 %v468_v9, %v468_v9  ;;  %986 = vrot.lane.b32.xlu0 %v4073_v16, %s3425_s29  ;;  %v920_v56 = vrot.slane %v918_v38, 1  ;;  %v1044_v63 = vrot.slane %v3745_v55, 1  ;;  %v1049_v38 = vrot.slane %v3557_v53, 1 }
  0x8d   : > { %v916_v31 = vor.u32 %v915_v62, %v911_v1  ;;  %v4080_v22 = vsel %vm609_vm0, %v904_v24, %v908_v6  ;;  %v1046_v1 = vrot.slane %v3775_v12, 1  ;;  %v1048_v62 = vrot.slane %v3550_v46, 1 }
  0x8e   : > { %5761 = vst [vmem:[#allocation52_spill] sm:$0xff] %v4075_v32  ;;  %5762 = vst [vmem:[#allocation53_spill] sm:$0xff] %v4080_v22  ;;  %v926_v4 = vshll.u32 %v4075_v32, 16  ;;  %988 = vrot.lane.b32.xlu1 %v4080_v22, %s3425_s29  ;;  %v924_v51 = vor.u32 %v922_v14, %v920_v56  ;;  %v1045_v24 = vsel %vm1042_vm1, %v1043_v41, %v1044_v63  ;;  %v1051_v6 = vrot.slane %v3598_v43, 1  ;;  %v5784_v32 = vld [vmem:[#allocation8_spill] sm:$0xff] }
  0x8f   : > { %v4088_v60 = vsel %vm609_vm0, %v916_v31, %v920_v56  ;;  %v1047_v14 = vsel %vm1042_vm1, %v1044_v63, %v1046_v1  ;;  %v4105_v12 = vsel %vm1042_vm1, %v1048_v62, %v1049_v38  ;;  %v1053_v31 = vrot.slane %v3537_v34, 1 }
  0x90   : > { %5763 = vst [vmem:[#allocation54_spill] sm:$0xff] %v4088_v60  ;;  %v928_v26 = vrot.slane %v926_v4, 1  ;;  %990 = vrot.lane.b32.xlu0 %v4088_v60, %s3425_s29  ;;  %v1054_v56 = vrot.slane %v3539_v35, 1  ;;  %v4111_v4 = vsel %vm1042_vm1, %v1049_v38, %v1051_v6  ;;  %v1056_v41 = vrot.slane %v3627_v58, 1 }
  0x91   : > { %v1058_v63 = vrot.slane %v3575_v7, 1  ;;  %v1061_v1 = vrot.slane %v3669_v52, 1  ;;  %v1064_v62 = vrot.slane %v3622_v17, 1  ;;  %v1068_v6 = vrot.slane %v3639_v36, 1 }
  0x92   : > { %v4094_v9 = vsel %vm609_vm0, %v924_v51, %v928_v26  ;;  %v4117_v43 = vsel %vm1042_vm1, %v1053_v31, %v1054_v56  ;;  %v1059_v51 = vrot.slane %v3580_v10, 1  ;;  %v4124_v26 = vsel %vm1042_vm1, %v1054_v56, %v1056_v41  ;;  %v3379_v56 = vld [vmem:[%s5608_s1] sm:$0xff]  }
  0x93   : > { %5764 = vst [vmem:[#allocation55_spill] sm:$0xff] %v4094_v9  ;;  %992 = vrot.lane.b32.xlu1 %v4094_v9, %s3425_s29  ;;  %v1069_v31 = vrot.slane %v3649_v18, 1  ;;  %3244 = vmatprep.subr.bf16.mxu0 %v3379_v56  ;;  %s3431_s29 = smov 56  }
  0x94   : > { %1123 = vrot.lane.b32.xlu0 %v1045_v24, %s3426_s5  ;;  %v4130_v58 = vsel %vm1042_vm1, %v1058_v63, %v1059_v51  ;;  %v1063_v24 = vrot.slane %v3620_v11, 1  ;;  %v4137_v38 = vsel %vm1042_vm1, %v1059_v51, %v1061_v1  ;;  %3318 = vmatprep.subr.bf16.mxu1 %v3379_v56  ;;  %v3380_v51 = vld [vmem:[%s5608_s1 + $0x8] sm:$0xff]  }
  0x95   : > { %3245 = vmatpush3.bf16.msra.mxu0 %v3379_v56  ;;  %v4159_v63 = vsel %vm1042_vm1, %v1068_v6, %v1069_v31  ;;  %3323 = vmatpush3.bf16.msra.mxu1 %v3379_v56 }
  0x96   : > { %v4143_v52 = vsel %vm1042_vm1, %v1063_v24, %v1064_v62  ;;  %3246 = vmatprep.subr.bf16.mxu0 %v3380_v51  ;;  %3319 = vmatprep.subr.bf16.mxu1 %v3380_v51 }
  0x97   : > { %1125 = vrot.lane.b32.xlu1 %v1047_v14, %s3426_s5  ;;  %v1066_v14 = vrot.slane %v3729_v27, 1  ;;  %v1071_v27 = vrot.slane %v3747_v23, 1  ;;  %v3381_v23 = vld [vmem:[%s5608_s1 + $0x10] sm:$0xff]  }
  0x98   : > { %1127 = vrot.lane.b32.xlu0 %v4105_v12, %s3426_s5 }
  0x99   : > { %v4153_v41 = vsel %vm1042_vm1, %v1064_v62, %v1066_v14  ;;  %v4167_v1 = vsel %vm1042_vm1, %v1069_v31, %v1071_v27  ;;  %3247 = vmatpush3.bf16.msra.mxu0 %v3380_v51  ;;  %3324 = vmatpush3.bf16.msra.mxu1 %v3380_v51  ;;  %v3382_v14 = vld [vmem:[%s5608_s1 + $0x18] sm:$0xff]   ;;  %v3383_v31 = vld [vmem:[%s5608_s1 + $0x20] ss:$0 sps:$4 sm:$0xff]  }
  0x9a   : > { %3248 = vmatprep.subr.bf16.mxu0 %v3381_v23  ;;  %3320 = vmatprep.subr.bf16.mxu1 %v3381_v23  ;;  %v2257_v27 = vsel %vm2255_vm2, %v3383_v31, 0 }
  0x9b   : > { %1129 = vrot.lane.b32.xlu1 %v4111_v4, %s3426_s5  ;;  %v4176_v24 = vpop.permute.xlu0 %938 }
  0x9c   : > { %1131 = vrot.lane.b32.xlu0 %v4117_v43, %s3426_s5 }
  0x9d   : > { %3249 = vmatpush3.bf16.msra.mxu0 %v3381_v23  ;;  %3325 = vmatpush3.bf16.msra.mxu1 %v3381_v23 }
  0x9e   : > { %v4180_v62 = vpop.permute.xlu1 %934  ;;  %3250 = vmatprep.subr.bf16.mxu0 %v3382_v14  ;;  %3321 = vmatprep.subr.bf16.mxu1 %v3382_v14 }
  0x9f   : > { %1133 = vrot.lane.b32.xlu1 %v4124_v26, %s3426_s5 }
  0xa0   : > { %1135 = vrot.lane.b32.xlu0 %v4130_v58, %s3426_s5 }
  0xa1   : > { %3251 = vmatpush3.bf16.msra.mxu0 %v3382_v14  ;;  %3326 = vmatpush3.bf16.msra.mxu1 %v3382_v14 }
  0xa2   : > { %3328 = vmatprep.subr.msk.bf16.mxu0 %vm2255_vm2, %v3383_v31  ;;  %3329 = vmatprep.subr.msk.bf16.mxu1 %vm2255_vm2, %v3383_v31 }
  0xa3   : > { %1137 = vrot.lane.b32.xlu1 %v4137_v38, %s3426_s5  ;;  %v4189_v6 = vpop.permute.xlu0 %942 }
  0xa4   : > { %1139 = vrot.lane.b32.xlu0 %v4143_v52, %s3426_s5 }
  0xa5   : > { %3253 = vmatpush3.bf16.msra.mxu0 %v2257_v27  ;;  %3327 = vmatpush3.bf16.msra.mxu1 %v2257_v27 }
  0xa6   : > { %v4196_v56 = vpop.permute.xlu1 %936 }
  0xa7   : > { %1141 = vrot.lane.b32.xlu1 %v4153_v41, %s3426_s5 }
  0xa8   : > { %1143 = vrot.lane.b32.xlu0 %v4159_v63, %s3426_s5 }
  0xab   : > { %1145 = vrot.lane.b32.xlu1 %v4167_v1, %s3426_s5 }
  0xac   : > { %1189 = vrot.lane.b32.xlu0 %v3550_v46, %s3427_s12 }
  0xaf   : > { %1191 = vrot.lane.b32.xlu1 %v3557_v53, %s3427_s12 }
  0xb0   : > { %1273 = vrot.lane.b32.xlu0 %v3591_v28, %s3428_s23  ;;  %v4202_v28 = vpop.permute.xlu0 %946 }
  0xb3   : > { %1275 = vrot.lane.b32.xlu1 %v3625_v48, %s3428_s23  ;;  %v4206_v48 = vpop.permute.xlu1 %940 }
  0xb4   : > { %1343 = vrot.lane.b32.xlu0 %v4105_v12, %s3429_s26  ;;  %v4212_v12 = vpop.permute.xlu0 %950 }
  0xb7   : > { %1345 = vrot.lane.b32.xlu1 %v4111_v4, %s3429_s26  ;;  %v4216_v4 = vpop.permute.xlu1 %944 }
  0xb8   : > { %1409 = vrot.lane.b32.xlu0 %v3537_v34, %s3430_s27 }
  0xba   : > { %v4222_v51 = vpop.permute.xlu0 %954 }
  0xbb   : > { %1411 = vrot.lane.b32.xlu1 %v3539_v35, %s3430_s27  ;;  %v4226_v23 = vpop.permute.xlu1 %948 }
  0xbc   : > { %1493 = vrot.lane.b32.xlu0 %v3573_v5, %s3431_s29 }
  0xbf   : > { %1495 = vrot.lane.b32.xlu1 %v3659_v45, %s3431_s29 }
  0xc0   : > { %1563 = vrot.lane.b32.xlu0 %v4117_v43, %s3432_s30  ;;  %v4236_v31 = vpop.permute.xlu1 %952 }
  0xc1   : > { %v4232_v14 = vpop.permute.xlu0 %930 }
  0xc3   : > { %1565 = vrot.lane.b32.xlu1 %v4124_v26, %s3432_s30 }
  0xc4   : > { %1193 = vrot.lane.b32.xlu0 %v3537_v34, %s3427_s12 }
  0xc7   : > { %1195 = vrot.lane.b32.xlu1 %v3539_v35, %s3427_s12  ;;  %v4242_v27 = vpop.permute.xlu0 %932 }
  0xc8   : > { %1277 = vrot.lane.b32.xlu0 %v3573_v5, %s3428_s23  ;;  %v4246_v44 = vpop.permute.xlu1 %956 }
  0xcb   : > { %1279 = vrot.lane.b32.xlu1 %v3659_v45, %s3428_s23 }
  0xcc   : > { %1347 = vrot.lane.b32.xlu0 %v4117_v43, %s3429_s26 }
  0xcd   : > { %v4252_v5 = vpop.permute.xlu0 %958 }
  0xcf   : > { %1349 = vrot.lane.b32.xlu1 %v4124_v26, %s3429_s26  ;;  %v4256_v45 = vpop.permute.xlu1 %960 }
  0xd0   : > { %1413 = vrot.lane.b32.xlu0 %v3575_v7, %s3430_s27 }
  0xd3   : > { %1415 = vrot.lane.b32.xlu1 %v3580_v10, %s3430_s27 }
  0xd4   : > { %1497 = vrot.lane.b32.xlu0 %v3613_v0, %s3431_s29  ;;  %v4262_v43 = vpop.permute.xlu0 %962 }
  0xd5   : > { %5765 = vst [vmem:[#allocation56_spill] sm:$0xff] %v4262_v43 }
  0xd6   : > { %v4266_v26 = vpop.permute.xlu1 %964 }
  0xd7   : > { %1499 = vrot.lane.b32.xlu1 %v3714_v20, %s3431_s29  ;;  %5766 = vst [vmem:[#allocation57_spill] sm:$0xff] %v4266_v26 }
  0xd8   : > { %1567 = vrot.lane.b32.xlu0 %v4130_v58, %s3432_s30 }
  0xda   : > { %v4272_v15 = vpop.permute.xlu0 %966 }
  0xdb   : > { %1569 = vrot.lane.b32.xlu1 %v4137_v38, %s3432_s30  ;;  %5767 = vst [vmem:[#allocation58_spill] sm:$0xff] %v4272_v15  ;;  %v4276_v25 = vpop.permute.xlu1 %968 }
  0xdc   : > { %1197 = vrot.lane.b32.xlu0 %v3575_v7, %s3427_s12  ;;  %5768 = vst [vmem:[#allocation59_spill] sm:$0xff] %v4276_v25 }
  0xdf   : > { %1199 = vrot.lane.b32.xlu1 %v3580_v10, %s3427_s12 }
  0xe0   : > { %1281 = vrot.lane.b32.xlu0 %v3613_v0, %s3428_s23  ;;  %v5771_v0 = vld [vmem:[#allocation2_spill] sm:$0xff] }
  0xe2   : > { %v4282_v59 = vpop.permute.xlu0 %970 }
  0xe3   : > { %1283 = vrot.lane.b32.xlu1 %v3714_v20, %s3428_s23  ;;  %5769 = vst [vmem:[#allocation60_spill] sm:$0xff] %v4282_v59 }
  0xe4   : > { %1351 = vrot.lane.b32.xlu0 %v4130_v58, %s3429_s26  ;;  %v4286_v3 = vpop.permute.xlu1 %972 }
  0xe5   : > { %5770 = vst [vmem:[#allocation61_spill] sm:$0xff] %v4286_v3 }
  0xe7   : > { %1353 = vrot.lane.b32.xlu1 %v4137_v38, %s3429_s26  ;;  %v4292_v20 = vpop.permute.xlu0 %974 }
  0xe8   : > { %1417 = vrot.lane.b32.xlu0 %v3620_v11, %s3430_s27  ;;  %5772 = vst [vmem:[#allocation2_spill] sm:$0xff] %v4292_v20 }
  0xe9   : > { %v4296_v58 = vpop.permute.xlu1 %976 }
  0xea   : > { %5773 = vst [vmem:[#allocation62_spill] sm:$0xff] %v4296_v58 }
  0xeb   : > { %1419 = vrot.lane.b32.xlu1 %v3622_v17, %s3430_s27 }
  0xec   : > { %1501 = vrot.lane.b32.xlu0 %v5771_v0, %s3431_s29 }
  0xef   : > { %1503 = vrot.lane.b32.xlu1 %v3752_v2, %s3431_s29 }
  0xf0   : > { %1571 = vrot.lane.b32.xlu0 %v4143_v52, %s3432_s30  ;;  %v4302_v38 = vpop.permute.xlu0 %978 }
  0xf1   : > { %5774 = vst [vmem:[#allocation63_spill] sm:$0xff] %v4302_v38 }
  0xf2   : > { %v4306_v3 = vpop.permute.xlu1 %980 }
  0xf3   : > { %1573 = vrot.lane.b32.xlu1 %v4153_v41, %s3432_s30  ;;  %5775 = vst [vmem:[#allocation64_spill] sm:$0xff] %v4306_v3 }
  0xf4   : > { %1201 = vrot.lane.b32.xlu0 %v3620_v11, %s3427_s12 }
  0xf5   : > { %v4312_v58 = vpop.permute.xlu0 %982 }
  0xf6   : > { %5776 = vst [vmem:[#allocation65_spill] sm:$0xff] %v4312_v58 }
  0xf7   : > { %1203 = vrot.lane.b32.xlu1 %v3622_v17, %s3427_s12  ;;  %v4316_v20 = vpop.permute.xlu1 %984 }
  0xf8   : > { %1285 = vrot.lane.b32.xlu0 %v5771_v0, %s3428_s23  ;;  %5777 = vst [vmem:[#allocation66_spill] sm:$0xff] %v4316_v20  ;;  %v5782_v20 = vld [vmem:[#allocation3_spill] sm:$0xff] }
  0xfb   : > { %1287 = vrot.lane.b32.xlu1 %v3752_v2, %s3428_s23 }
  0xfc   : > { %1355 = vrot.lane.b32.xlu0 %v4143_v52, %s3429_s26 }
  0xfe   : > { %v4322_v3 = vpop.permute.xlu0 %986 }
  0xff   : > { %1357 = vrot.lane.b32.xlu1 %v4153_v41, %s3429_s26  ;;  %5778 = vst [vmem:[#allocation67_spill] sm:$0xff] %v4322_v3 }
 0x100   : > { %v4324_v38 = vpop.permute.xlu1 %988  ;;  %1421 = vrot.lane.b32.xlu0 %v3639_v36, %s3430_s27 }
 0x101   : > { %5779 = vst [vmem:[#allocation68_spill] sm:$0xff] %v4324_v38 }
 0x102   : > { %v4330_v0 = vpop.permute.xlu0 %990 }
 0x103   : > { %1423 = vrot.lane.b32.xlu1 %v3649_v18, %s3430_s27  ;;  %5780 = vst [vmem:[#allocation69_spill] sm:$0xff] %v4330_v0 }
 0x104   : > { %1505 = vrot.lane.b32.xlu0 %v5782_v20, %s3431_s29 }
 0x105   : > { %v4332_v2 = vpop.permute.xlu1 %992 }
 0x106   : > { %5781 = vst [vmem:[#allocation70_spill] sm:$0xff] %v4332_v2  ;;  %v1124_v52 = vpop.permute.xlu0 %1123 }
 0x107   : > { %1507 = vrot.lane.b32.xlu1 %v3773_v54, %s3431_s29 }
 0x108   : > { %1575 = vrot.lane.b32.xlu0 %v4159_v63, %s3432_s30 }
 0x109   : > { %v1126_v41 = vpop.permute.xlu1 %1125 }
 0x10a   : > { %v4342_v38 = vpop.permute.xlu0 %1127 }
 0x10b   : > { %1577 = vrot.lane.b32.xlu1 %v4167_v1, %s3432_s30 }
 0x10c   : > { %1205 = vrot.lane.b32.xlu0 %v3639_v36, %s3427_s12 }
 0x10d   : > { %v4344_v3 = vpop.permute.xlu1 %1129 }
 0x10e   : > { %v4350_v2 = vpop.permute.xlu0 %1131 }
 0x10f   : > { %1207 = vrot.lane.b32.xlu1 %v3649_v18, %s3427_s12 }
 0x110   : > { %1289 = vrot.lane.b32.xlu0 %v5782_v20, %s3428_s23  ;;  %v1073_v20 = vrot.slane %v5783_v30, 1 }
 0x111   : > { %v4352_v0 = vpop.permute.xlu1 %1133 }
 0x112   : > { %v4358_v58 = vpop.permute.xlu0 %1135 }
 0x113   : > { %1291 = vrot.lane.b32.xlu1 %v3773_v54, %s3428_s23  ;;  %v1074_v54 = vrot.slane %v3716_v21, 1 }
 0x114   : > { %1359 = vrot.lane.b32.xlu0 %v4159_v63, %s3429_s26  ;;  %v1076_v63 = vrot.slane %v3783_v8, 1 }
 0x115   : > { %v4360_v59 = vpop.permute.xlu1 %1137 }
 0x116   : > { %v4366_v50 = vpop.permute.xlu0 %1139  ;;  %v1077_v15 = vsel %vm1042_vm1, %v1074_v54, %v1076_v63  ;;  %v1629_v63 = vsel %vm1627_vm4, %v3737_v37, %v4232_v14 }
 0x117   : > { %1361 = vrot.lane.b32.xlu1 %v4167_v1, %s3429_s26  ;;  %v4384_v1 = vsel %vm1042_vm1, %v1073_v20, %v1074_v54  ;;  %v1694_v16 = vsel %vm1692_vm3, %v1629_v63, %v1124_v52 }
 0x118   : > { %1425 = vrot.lane.b32.xlu0 %v5783_v30, %s3430_s27 }
 0x119   : > { %v4368_v49 = vpop.permute.xlu1 %1141 }
 0x11a   : > { %v4376_v9 = vpop.permute.xlu0 %1143 }
 0x11b   : > { %1427 = vrot.lane.b32.xlu1 %v3716_v21, %s3430_s27 }
 0x11c   : > { %1509 = vrot.lane.b32.xlu0 %v3743_v61, %s3431_s29 }
 0x11d   : > { %v4379_v60 = vpop.permute.xlu1 %1145 }
 0x11e   : > { %v1190_v25 = vpop.permute.xlu0 %1189 }
 0x11f   : > { %1511 = vrot.lane.b32.xlu1 %v5784_v32, %s3431_s29 }
 0x120   : > { %1579 = vrot.lane.b32.xlu0 %v4384_v1, %s3432_s30 }
 0x121   : > { %v1192_v39 = vpop.permute.xlu1 %1191 }
 0x122   : > { %v1274_v8 = vpop.permute.xlu0 %1273 }
 0x123   : > { %1581 = vrot.lane.b32.xlu1 %v1077_v15, %s3432_s30 }
 0x124   : > { %1209 = vrot.lane.b32.xlu0 %v5783_v30, %s3427_s12 }
 0x125   : > { %v1276_v47 = vpop.permute.xlu1 %1275 }
 0x126   : > { %v1344_v20 = vpop.permute.xlu0 %1343 }
 0x127   : > { %1211 = vrot.lane.b32.xlu1 %v3716_v21, %s3427_s12 }
 0x128   : > { %1293 = vrot.lane.b32.xlu0 %v3743_v61, %s3428_s23  ;;  %v1631_v61 = vsel %vm1627_vm4, %v3745_v55, %v4242_v27  ;;  %v5786_v27 = vld [vmem:[#allocation6_spill] sm:$0xff] }
 0x129   : > { %v1346_v22 = vpop.permute.xlu1 %1345  ;;  %v1696_v37 = vsel %vm1692_vm3, %v1631_v61, %v1126_v41  ;;  %v1079_v41 = vrot.slane %v5786_v27, 1 }
 0x12a   : > { %v1410_v54 = vpop.permute.xlu0 %1409  ;;  %v1761_v19 = vsel %vm1757_vm5, %v1696_v37, %v1192_v39  ;;  %v5787_v37 = vld [vmem:[#allocation7_spill] sm:$0xff] }
 0x12b   : > { %1295 = vrot.lane.b32.xlu1 %v5784_v32, %s3428_s23  ;;  %v1759_v32 = vsel %vm1757_vm5, %v1694_v16, %v1190_v25  ;;  %v1826_v55 = vsel %vm1822_vm6, %v1761_v19, %v1276_v47  ;;  %v1078_v16 = vrot.slane %v5785_v29, 1  ;;  %v1081_v47 = vrot.slane %v5787_v37, 1 }
 0x12c   : > { %1363 = vrot.lane.b32.xlu0 %v4384_v1, %s3429_s26  ;;  %v1824_v14 = vsel %vm1822_vm6, %v1759_v32, %v1274_v8  ;;  %v1891_v8 = vsel %vm1887_vm7, %v1826_v55, %v1346_v22 }
 0x12d   : > { %v1412_v26 = vpop.permute.xlu1 %1411  ;;  %v1889_v52 = vsel %vm1887_vm7, %v1824_v14, %v1344_v20  ;;  %v5788_v14 = vld [vmem:[#allocation9_spill] sm:$0xff]  ;;  %v1082_v55 = vsel %vm1042_vm1, %v1079_v41, %v1081_v47 }
 0x12e   : > { %v1494_v43 = vpop.permute.xlu0 %1493  ;;  %v1954_v25 = vsel %vm1952_vm8, %v1889_v52, %v1410_v54  ;;  %v1956_v61 = vsel %vm1952_vm8, %v1891_v8, %v1412_v26  ;;  %v5789_v52 = vld [vmem:[#allocation11_spill] sm:$0xff] }
 0x12f   : > { %1365 = vrot.lane.b32.xlu1 %v1077_v15, %s3429_s26  ;;  %v2019_v39 = vsel %vm2017_vm9, %v1954_v25, %v1494_v43  ;;  %v1080_v43 = vsel %vm1042_vm1, %v1078_v16, %v1079_v41 }
 0x130   : > { %1429 = vrot.lane.b32.xlu0 %v5785_v29, %s3430_s27 }
 0x131   : > { %v1496_v63 = vpop.permute.xlu1 %1495 }
 0x132   : > { %v1564_v20 = vpop.permute.xlu0 %1563  ;;  %v2021_v19 = vsel %vm2017_vm9, %v1956_v61, %v1496_v63 }
 0x133   : > { %1431 = vrot.lane.b32.xlu1 %v5786_v27, %s3430_s27  ;;  %v2084_v32 = vsel %vm2082_vm10, %v2019_v39, %v1564_v20  ;;  %v1633_v20 = vsel %vm1627_vm4, %v3550_v46, %v4180_v62 }
 0x134   : > { %1513 = vrot.lane.b32.xlu0 %v5788_v14, %s3431_s29  ;;  %3254 = vmatprep.mubr.msk.bf16.mxu0 %vm2190_vm11, %v2084_v32 }
 0x135   : > { %v1566_v54 = vpop.permute.xlu1 %1565 }
 0x136   : > { %v2086_v22 = vsel %vm2082_vm10, %v2021_v19, %v1566_v54  ;;  %v1194_v26 = vpop.permute.xlu0 %1193 }
 0x137   : > { %1515 = vrot.lane.b32.xlu1 %v5789_v52, %s3431_s29  ;;  %3255 = vmatmul.mubr.msk.bf16.vlgmr.msra.gmra.mrb[0].mxu0 %vm2190_vm11, %v2086_v22 }
 0x138   : > { %1583 = vrot.lane.b32.xlu0 %v1080_v43, %s3432_s30 }
 0x139   : > { %v1196_v25 = vpop.permute.xlu1 %1195 }
 0x13a   : > { %v1278_v63 = vpop.permute.xlu0 %1277 }
 0x13b   : > { %1585 = vrot.lane.b32.xlu1 %v1082_v55, %s3432_s30 }
 0x13c   : > { %1147 = vrot.lane.b32.xlu0 %v4384_v1, %s3426_s5  ;;  %v1635_v1 = vsel %vm1627_vm4, %v3557_v53, %v4196_v56 }
 0x13d   : > { %v1280_v8 = vpop.permute.xlu1 %1279  ;;  %v1700_v46 = vsel %vm1692_vm3, %v1635_v1, %v4344_v3 }
 0x13e   : > { %v1348_v16 = vpop.permute.xlu0 %1347  ;;  %v1765_v47 = vsel %vm1757_vm5, %v1700_v46, %v1196_v25  ;;  %v5794_v46 = vld [vmem:[#allocation18_spill] sm:$0xff] }
 0x13f   : > { %1149 = vrot.lane.b32.xlu1 %v1077_v15, %s3426_s5  ;;  %v1698_v15 = vsel %vm1692_vm3, %v1633_v20, %v4342_v38  ;;  %v1830_v53 = vsel %vm1822_vm6, %v1765_v47, %v1280_v8 }
 0x140   : > { %1213 = vrot.lane.b32.xlu0 %v5785_v29, %s3427_s12  ;;  %v1763_v32 = vsel %vm1757_vm5, %v1698_v15, %v1194_v26 }
 0x141   : > { %v1350_v39 = vpop.permute.xlu1 %1349  ;;  %v1828_v62 = vsel %vm1822_vm6, %v1763_v32, %v1278_v63  ;;  %v5790_v63 = vld [vmem:[#allocation10_spill] sm:$0xff]  ;;  %v5793_v32 = vld [vmem:[#allocation16_spill] sm:$0xff] }
 0x142   : > { %v1414_v41 = vpop.permute.xlu0 %1413  ;;  %v1893_v19 = vsel %vm1887_vm7, %v1828_v62, %v1348_v16  ;;  %v1895_v54 = vsel %vm1887_vm7, %v1830_v53, %v1350_v39  ;;  %v1083_v16 = vrot.slane %v5790_v63, 1  ;;  %v5791_v39 = vld [vmem:[#allocation12_spill] sm:$0xff] }
 0x143   : > { %1215 = vrot.lane.b32.xlu1 %v5786_v27, %s3427_s12  ;;  %v1958_v56 = vsel %vm1952_vm8, %v1893_v19, %v1414_v41  ;;  %v1084_v41 = vrot.slane %v5791_v39, 1 }
 0x144   : > { %1297 = vrot.lane.b32.xlu0 %v5788_v14, %s3428_s23 }
 0x145   : > { %v1416_v61 = vpop.permute.xlu1 %1415 }
 0x146   : > { %v1498_v37 = vpop.permute.xlu0 %1497  ;;  %v1960_v22 = vsel %vm1952_vm8, %v1895_v54, %v1416_v61  ;;  %v5792_v61 = vld [vmem:[#allocation13_spill] sm:$0xff]  ;;  %v1637_v54 = vsel %vm1627_vm4, %v3537_v34, %v4176_v24 }
 0x147   : > { %1299 = vrot.lane.b32.xlu1 %v5789_v52, %s3428_s23  ;;  %v2023_v14 = vsel %vm2017_vm9, %v1958_v56, %v1498_v37  ;;  %v1086_v15 = vrot.slane %v5792_v61, 1  ;;  %v1085_v37 = vsel %vm1042_vm1, %v1083_v16, %v1084_v41 }
 0x148   : > { %1367 = vrot.lane.b32.xlu0 %v1080_v43, %s3429_s26 }
 0x149   : > { %v1500_v38 = vpop.permute.xlu1 %1499  ;;  %v4490_v47 = vsel %vm1042_vm1, %v1084_v41, %v1086_v15 }
 0x14a   : > { %v1568_v3 = vpop.permute.xlu0 %1567  ;;  %v2025_v26 = vsel %vm2017_vm9, %v1960_v22, %v1500_v38  ;;  %v1639_v22 = vsel %vm1627_vm4, %v3539_v35, %v4206_v48 }
 0x14b   : > { %1369 = vrot.lane.b32.xlu1 %v1082_v55, %s3429_s26  ;;  %v2088_v52 = vsel %vm2082_vm10, %v2023_v14, %v1568_v3  ;;  %v1702_v3 = vsel %vm1692_vm3, %v1637_v54, %v4350_v2  ;;  %v1704_v34 = vsel %vm1692_vm3, %v1639_v22, %v4352_v0 }
 0x14c   : > { %1433 = vrot.lane.b32.xlu0 %v5790_v63, %s3430_s27  ;;  %3258 = vmatprep.mubr.msk.bf16.mxu0 %vm2190_vm11, %v2088_v52 }
 0x14d   : > { %v1570_v25 = vpop.permute.xlu1 %1569 }
 0x14e   : > { %v2090_v8 = vsel %vm2082_vm10, %v2025_v26, %v1570_v25  ;;  %v1198_v20 = vpop.permute.xlu0 %1197 }
 0x14f   : > { %1435 = vrot.lane.b32.xlu1 %v5791_v39, %s3430_s27  ;;  %3259 = vmatmul.mubr.msk.bf16.gmra.mrb[4].mxu0 %vm2190_vm11, %v2090_v8 }
 0x150   : > { %1517 = vrot.lane.b32.xlu0 %v5793_v32, %s3431_s29 }
 0x151   : > { %v1200_v1 = vpop.permute.xlu1 %1199 }
 0x152   : > { %v1282_v62 = vpop.permute.xlu0 %1281  ;;  %v1769_v52 = vsel %vm1757_vm5, %v1704_v34, %v1200_v1 }
 0x153   : > { %1519 = vrot.lane.b32.xlu1 %v5794_v46, %s3431_s29 }
 0x154   : > { %1587 = vrot.lane.b32.xlu0 %v1085_v37, %s3432_s30 }
 0x155   : > { %v1284_v19 = vpop.permute.xlu1 %1283 }
 0x156   : > { %v1352_v38 = vpop.permute.xlu0 %1351  ;;  %v1834_v35 = vsel %vm1822_vm6, %v1769_v52, %v1284_v19  ;;  %v5796_v19 = vld [vmem:[#allocation15_spill] sm:$0xff] }
 0x157   : > { %1589 = vrot.lane.b32.xlu1 %v4490_v47, %s3432_s30 }
 0x158   : > { %1151 = vrot.lane.b32.xlu0 %v1080_v43, %s3426_s5  ;;  %v1767_v43 = vsel %vm1757_vm5, %v1702_v3, %v1198_v20  ;;  %v5798_v3 = vld [vmem:[#allocation19_spill] sm:$0xff] }
 0x159   : > { %v1354_v53 = vpop.permute.xlu1 %1353  ;;  %v1832_v24 = vsel %vm1822_vm6, %v1767_v43, %v1282_v62  ;;  %v5799_v43 = vld [vmem:[#allocation21_spill] sm:$0xff] }
 0x15a   : > { %v1418_v56 = vpop.permute.xlu0 %1417  ;;  %v1897_v26 = vsel %vm1887_vm7, %v1832_v24, %v1352_v38  ;;  %v1899_v25 = vsel %vm1887_vm7, %v1834_v35, %v1354_v53  ;;  %v1089_v38 = vrot.slane %v5796_v19, 1 }
 0x15b   : > { %1153 = vrot.lane.b32.xlu1 %v1082_v55, %s3426_s5  ;;  %v1962_v48 = vsel %vm1952_vm8, %v1897_v26, %v1418_v56  ;;  %v5797_v56 = vld [vmem:[#allocation17_spill] sm:$0xff]  ;;  %v1641_v26 = vsel %vm1627_vm4, %v3575_v7, %v4189_v6 }
 0x15c   : > { %1217 = vrot.lane.b32.xlu0 %v5790_v63, %s3427_s12  ;;  %v1091_v54 = vrot.slane %v5797_v56, 1  ;;  %v1706_v35 = vsel %vm1692_vm3, %v1641_v26, %v4358_v58  ;;  %v5800_v56 = vld [vmem:[#allocation20_spill] sm:$0xff]  ;;  %v5803_v26 = vld [vmem:[#allocation26_spill] sm:$0xff] }
 0x15d   : > { %v1420_v14 = vpop.permute.xlu1 %1419 }
 0x15e   : > { %v1502_v55 = vpop.permute.xlu0 %1501  ;;  %v1964_v16 = vsel %vm1952_vm8, %v1899_v25, %v1420_v14  ;;  %v4547_v34 = vsel %vm1042_vm1, %v1089_v38, %v1091_v54  ;;  %v1093_v54 = vrot.slane %v5800_v56, 1 }
 0x15f   : > { %1219 = vrot.lane.b32.xlu1 %v5791_v39, %s3427_s12  ;;  %v2027_v8 = vsel %vm2017_vm9, %v1962_v48, %v1502_v55  ;;  %v1643_v48 = vsel %vm1627_vm4, %v3580_v10, %v4216_v4 }
 0x160   : > { %1301 = vrot.lane.b32.xlu0 %v5793_v32, %s3428_s23 }
 0x161   : > { %v1504_v2 = vpop.permute.xlu1 %1503 }
 0x162   : > { %v1572_v0 = vpop.permute.xlu0 %1571  ;;  %v2029_v20 = vsel %vm2017_vm9, %v1964_v16, %v1504_v2 }
 0x163   : > { %1303 = vrot.lane.b32.xlu1 %v5794_v46, %s3428_s23  ;;  %v2092_v41 = vsel %vm2082_vm10, %v2027_v8, %v1572_v0  ;;  %v5795_v46 = vld [vmem:[#allocation14_spill] sm:$0xff]  ;;  %v1708_v0 = vsel %vm1692_vm3, %v1643_v48, %v4360_v59 }
 0x164   : > { %1371 = vrot.lane.b32.xlu0 %v1085_v37, %s3429_s26  ;;  %3262 = vmatprep.mubr.msk.bf16.mxu0 %vm2190_vm11, %v2092_v41  ;;  %v1088_v62 = vrot.slane %v5795_v46, 1 }
 0x165   : > { %v1574_v61 = vpop.permute.xlu1 %1573 }
 0x166   : > { %v2094_v15 = vsel %vm2082_vm10, %v2029_v20, %v1574_v61  ;;  %v1202_v1 = vpop.permute.xlu0 %1201  ;;  %v4542_v22 = vsel %vm1042_vm1, %v1088_v62, %v1089_v38 }
 0x167   : > { %1373 = vrot.lane.b32.xlu1 %v4490_v47, %s3429_s26  ;;  %3263 = vmatmul.mubr.msk.bf16.gmra.mrb[8].mxu0 %vm2190_vm11, %v2094_v15  ;;  %v1771_v25 = vsel %vm1757_vm5, %v1706_v35, %v1202_v1  ;;  %v5804_v35 = vld [vmem:[#allocation28_spill] sm:$0xff] }
 0x168   : > { %1437 = vrot.lane.b32.xlu0 %v5795_v46, %s3430_s27 }
 0x169   : > { %v1204_v32 = vpop.permute.xlu1 %1203 }
 0x16a   : > { %v1286_v53 = vpop.permute.xlu0 %1285  ;;  %v1773_v6 = vsel %vm1757_vm5, %v1708_v0, %v1204_v32 }
 0x16b   : > { %1439 = vrot.lane.b32.xlu1 %v5796_v19, %s3430_s27  ;;  %v1836_v7 = vsel %vm1822_vm6, %v1771_v25, %v1286_v53 }
 0x16c   : > { %1521 = vrot.lane.b32.xlu0 %v5798_v3, %s3431_s29 }
 0x16d   : > { %v1288_v14 = vpop.permute.xlu1 %1287 }
 0x16e   : > { %v1356_v55 = vpop.permute.xlu0 %1355  ;;  %v1838_v10 = vsel %vm1822_vm6, %v1773_v6, %v1288_v14  ;;  %v5801_v14 = vld [vmem:[#allocation22_spill] sm:$0xff]  ;;  %v1647_v6 = vsel %vm1627_vm4, %v3622_v17, %v4226_v23 }
 0x16f   : > { %1523 = vrot.lane.b32.xlu1 %v5799_v43, %s3431_s29 }
 0x170   : > { %1591 = vrot.lane.b32.xlu0 %v4542_v22, %s3432_s30 }
 0x171   : > { %v1358_v24 = vpop.permute.xlu1 %1357 }
 0x172   : > { %v1422_v52 = vpop.permute.xlu0 %1421 }
 0x173   : > { %1593 = vrot.lane.b32.xlu1 %v4547_v34, %s3432_s30 }
 0x174   : > { %1155 = vrot.lane.b32.xlu0 %v1085_v37, %s3426_s5  ;;  %v1901_v37 = vsel %vm1887_vm7, %v1836_v7, %v1356_v55  ;;  %v5802_v55 = vld [vmem:[#allocation23_spill] sm:$0xff] }
 0x175   : > { %v1424_v2 = vpop.permute.xlu1 %1423  ;;  %v1966_v4 = vsel %vm1952_vm8, %v1901_v37, %v1422_v52 }
 0x176   : > { %v1506_v8 = vpop.permute.xlu0 %1505 }
 0x177   : > { %1157 = vrot.lane.b32.xlu1 %v4490_v47, %s3426_s5  ;;  %v1903_v47 = vsel %vm1887_vm7, %v1838_v10, %v1358_v24  ;;  %v2031_v16 = vsel %vm2017_vm9, %v1966_v4, %v1506_v8  ;;  %v1096_v24 = vrot.slane %v5802_v55, 1  ;;  %v1645_v8 = vsel %vm1627_vm4, %v3620_v11, %v4202_v28 }
 0x178   : > { %1221 = vrot.lane.b32.xlu0 %v5795_v46, %s3427_s12  ;;  %v1968_v41 = vsel %vm1952_vm8, %v1903_v47, %v1424_v2  ;;  %v1710_v7 = vsel %vm1692_vm3, %v1645_v8, %v4366_v50  ;;  %v1712_v11 = vsel %vm1692_vm3, %v1647_v6, %v4368_v49 }
 0x179   : > { %v1508_v58 = vpop.permute.xlu1 %1507 }
 0x17a   : > { %v1576_v59 = vpop.permute.xlu0 %1575  ;;  %v2033_v61 = vsel %vm2017_vm9, %v1968_v41, %v1508_v58 }
 0x17b   : > { %1223 = vrot.lane.b32.xlu1 %v5796_v19, %s3427_s12  ;;  %v2096_v20 = vsel %vm2082_vm10, %v2031_v16, %v1576_v59 }
 0x17c   : > { %1305 = vrot.lane.b32.xlu0 %v5798_v3, %s3428_s23  ;;  %3266 = vmatprep.mubr.msk.bf16.mxu0 %vm2190_vm11, %v2096_v20  ;;  %v1094_v3 = vrot.slane %v5801_v14, 1 }
 0x17d   : > { %v1578_v15 = vpop.permute.xlu1 %1577 }
 0x17e   : > { %v2098_v1 = vsel %vm2082_vm10, %v2033_v61, %v1578_v15  ;;  %v1206_v32 = vpop.permute.xlu0 %1205  ;;  %v4602_v2 = vsel %vm1042_vm1, %v1093_v54, %v1094_v3  ;;  %v4607_v25 = vsel %vm1042_vm1, %v1094_v3, %v1096_v24  ;;  %v5806_v3 = vld [vmem:[#allocation25_spill] sm:$0xff]  ;;  %v5807_v24 = vld [vmem:[#allocation27_spill] sm:$0xff] }
 0x17f   : > { %1307 = vrot.lane.b32.xlu1 %v5799_v43, %s3428_s23  ;;  %3267 = vmatmul.mubr.msk.bf16.gmra.mrb[12].mxu0 %vm2190_vm11, %v2098_v1  ;;  %v1775_v37 = vsel %vm1757_vm5, %v1710_v7, %v1206_v32  ;;  %v1651_v7 = vsel %vm1627_vm4, %v3649_v18, %v4236_v31 }
 0x180   : > { %1375 = vrot.lane.b32.xlu0 %v4542_v22, %s3429_s26 }
 0x181   : > { %v1208_v62 = vpop.permute.xlu1 %1207 }
 0x182   : > { %v1290_v38 = vpop.permute.xlu0 %1289  ;;  %v1777_v10 = vsel %vm1757_vm5, %v1712_v11, %v1208_v62 }
 0x183   : > { %1377 = vrot.lane.b32.xlu1 %v4547_v34, %s3429_s26  ;;  %v1840_v28 = vsel %vm1822_vm6, %v1775_v37, %v1290_v38  ;;  %v5809_v37 = vld [vmem:[#allocation30_spill] sm:$0xff] }
 0x184   : > { %1441 = vrot.lane.b32.xlu0 %v5800_v56, %s3430_s27 }
 0x185   : > { %v1292_v53 = vpop.permute.xlu1 %1291 }
 0x186   : > { %v1360_v43 = vpop.permute.xlu0 %1359  ;;  %v1842_v17 = vsel %vm1822_vm6, %v1777_v10, %v1292_v53  ;;  %v5805_v53 = vld [vmem:[#allocation24_spill] sm:$0xff] }
 0x187   : > { %1443 = vrot.lane.b32.xlu1 %v5801_v14, %s3430_s27  ;;  %v1905_v4 = vsel %vm1887_vm7, %v1840_v28, %v1360_v43  ;;  %v1098_v54 = vrot.slane %v5805_v53, 1  ;;  %v1099_v43 = vrot.slane %v5806_v3, 1 }
 0x188   : > { %1525 = vrot.lane.b32.xlu0 %v5803_v26, %s3431_s29 }
 0x189   : > { %v1362_v52 = vpop.permute.xlu1 %1361 }
 0x18a   : > { %v1426_v48 = vpop.permute.xlu0 %1425  ;;  %v1907_v47 = vsel %vm1887_vm7, %v1842_v17, %v1362_v52  ;;  %v1101_v52 = vrot.slane %v5807_v24, 1 }
 0x18b   : > { %1527 = vrot.lane.b32.xlu1 %v5804_v35, %s3431_s29  ;;  %v1970_v23 = vsel %vm1952_vm8, %v1905_v4, %v1426_v48  ;;  %v5808_v48 = vld [vmem:[#allocation29_spill] sm:$0xff] }
 0x18c   : > { %1595 = vrot.lane.b32.xlu0 %v4602_v2, %s3432_s30 }
 0x18d   : > { %v1428_v0 = vpop.permute.xlu1 %1427 }
 0x18e   : > { %v1510_v58 = vpop.permute.xlu0 %1509  ;;  %v1972_v59 = vsel %vm1952_vm8, %v1907_v47, %v1428_v0  ;;  %v4668_v0 = vsel %vm1042_vm1, %v1098_v54, %v1099_v43 }
 0x18f   : > { %1597 = vrot.lane.b32.xlu1 %v4607_v25, %s3432_s30  ;;  %v2035_v16 = vsel %vm2017_vm9, %v1970_v23, %v1510_v58 }
 0x190   : > { %1159 = vrot.lane.b32.xlu0 %v4542_v22, %s3426_s5 }
 0x191   : > { %v1512_v50 = vpop.permute.xlu1 %1511 }
 0x192   : > { %v1580_v49 = vpop.permute.xlu0 %1579  ;;  %v2037_v20 = vsel %vm2017_vm9, %v1972_v59, %v1512_v50 }
 0x193   : > { %1161 = vrot.lane.b32.xlu1 %v4547_v34, %s3426_s5  ;;  %v2100_v41 = vsel %vm2082_vm10, %v2035_v16, %v1580_v49 }
 0x194   : > { %1225 = vrot.lane.b32.xlu0 %v5800_v56, %s3427_s12  ;;  %3270 = vmatprep.mubr.msk.bf16.mxu0 %vm2190_vm11, %v2100_v41 }
 0x195   : > { %v1582_v61 = vpop.permute.xlu1 %1581 }
 0x196   : > { %v2102_v22 = vsel %vm2082_vm10, %v2037_v20, %v1582_v61  ;;  %v1210_v34 = vpop.permute.xlu0 %1209 }
 0x197   : > { %1227 = vrot.lane.b32.xlu1 %v5801_v14, %s3427_s12  ;;  %3271 = vmatmul.mubr.msk.bf16.gmra.mrb[16].mxu0 %vm2190_vm11, %v2102_v22 }
 0x198   : > { %1309 = vrot.lane.b32.xlu0 %v5803_v26, %s3428_s23  ;;  %v1649_v26 = vsel %vm1627_vm4, %v3639_v36, %v4212_v12  ;;  %v1716_v12 = vsel %vm1692_vm3, %v1651_v7, %v4379_v60 }
 0x199   : > { %v1212_v15 = vpop.permute.xlu1 %1211  ;;  %v1714_v8 = vsel %vm1692_vm3, %v1649_v26, %v4376_v9  ;;  %v4680_v9 = vsel %vm1042_vm1, %v1099_v43, %v1101_v52  ;;  %v1653_v43 = vsel %vm1627_vm4, %v5783_v30, %v4222_v51  ;;  %v1655_v26 = vsel %vm1627_vm4, %v3716_v21, %v4246_v44 }
 0x19a   : > { %v1294_v1 = vpop.permute.xlu0 %1293  ;;  %v1779_v6 = vsel %vm1757_vm5, %v1714_v8, %v1210_v34  ;;  %v1781_v11 = vsel %vm1757_vm5, %v1716_v12, %v1212_v15  ;;  %v5810_v15 = vld [vmem:[#allocation31_spill] sm:$0xff] }
 0x19b   : > { %1311 = vrot.lane.b32.xlu1 %v5804_v35, %s3428_s23  ;;  %v1844_v58 = vsel %vm1822_vm6, %v1779_v6, %v1294_v1  ;;  %v1103_v1 = vrot.slane %v5810_v15, 1 }
 0x19c   : > { %1379 = vrot.lane.b32.xlu0 %v4602_v2, %s3429_s26 }
 0x19d   : > { %v1296_v32 = vpop.permute.xlu1 %1295 }
 0x19e   : > { %v1364_v62 = vpop.permute.xlu0 %1363  ;;  %v1846_v18 = vsel %vm1822_vm6, %v1781_v11, %v1296_v32  ;;  %v1104_v32 = vrot.slane %v3969_v13, 1 }
 0x19f   : > { %1381 = vrot.lane.b32.xlu1 %v4607_v25, %s3429_s26  ;;  %v1909_v28 = vsel %vm1887_vm7, %v1844_v58, %v1364_v62 }
 0x1a0   : > { %1445 = vrot.lane.b32.xlu0 %v5805_v53, %s3430_s27  ;;  %v4728_v52 = vsel %vm1042_vm1, %v1103_v1, %v1104_v32 }
 0x1a1   : > { %v1366_v38 = vpop.permute.xlu1 %1365 }
 0x1a2   : > { %v1430_v55 = vpop.permute.xlu0 %1429  ;;  %v1911_v4 = vsel %vm1887_vm7, %v1846_v18, %v1366_v38  ;;  %v5811_v38 = vld [vmem:[#allocation32_spill] sm:$0xff] }
 0x1a3   : > { %1447 = vrot.lane.b32.xlu1 %v5806_v3, %s3430_s27  ;;  %v1974_v31 = vsel %vm1952_vm8, %v1909_v28, %v1430_v55  ;;  %v1106_v54 = vrot.slane %v5811_v38, 1 }
 0x1a4   : > { %1529 = vrot.lane.b32.xlu0 %v5808_v48, %s3431_s29 }
 0x1a5   : > { %v1432_v35 = vpop.permute.xlu1 %1431  ;;  %v4739_v7 = vsel %vm1042_vm1, %v1104_v32, %v1106_v54  ;;  %v1659_v32 = vsel %vm1627_vm4, %v5786_v27, %v4256_v45 }
 0x1a6   : > { %v1514_v36 = vpop.permute.xlu0 %1513  ;;  %v1976_v17 = vsel %vm1952_vm8, %v1911_v4, %v1432_v35 }
 0x1a7   : > { %1531 = vrot.lane.b32.xlu1 %v5809_v37, %s3431_s29  ;;  %v2039_v60 = vsel %vm2017_vm9, %v1974_v31, %v1514_v36 }
 0x1a8   : > { %1599 = vrot.lane.b32.xlu0 %v4668_v0, %s3432_s30 }
 0x1a9   : > { %v1516_v10 = vpop.permute.xlu1 %1515 }
 0x1aa   : > { %v1584_v50 = vpop.permute.xlu0 %1583  ;;  %v2041_v47 = vsel %vm2017_vm9, %v1976_v17, %v1516_v10 }
 0x1ab   : > { %1601 = vrot.lane.b32.xlu1 %v4680_v9, %s3432_s30  ;;  %v2104_v23 = vsel %vm2082_vm10, %v2039_v60, %v1584_v50 }
 0x1ac   : > { %1163 = vrot.lane.b32.xlu0 %v4602_v2, %s3426_s5  ;;  %3274 = vmatprep.mubr.msk.bf16.mxu0 %vm2190_vm11, %v2104_v23 }
 0x1ad   : > { %v1586_v16 = vpop.permute.xlu1 %1585 }
 0x1ae   : > { %v2106_v49 = vsel %vm2082_vm10, %v2041_v47, %v1586_v16  ;;  %v1148_v59 = vpop.permute.xlu0 %1147 }
 0x1af   : > { %1165 = vrot.lane.b32.xlu1 %v4607_v25, %s3426_s5  ;;  %3275 = vmatmul.mubr.msk.bf16.gmra.mrb[20].mxu0 %vm2190_vm11, %v2106_v49  ;;  %v1718_v24 = vsel %vm1692_vm3, %v1653_v43, %v1148_v59  ;;  %v5813_v49 = vld [vmem:[#allocation33_spill] sm:$0xff] }
 0x1b0   : > { %1229 = vrot.lane.b32.xlu0 %v5805_v53, %s3427_s12  ;;  %v1108_v59 = vrot.slane %v5813_v49, 1 }
 0x1b1   : > { %v1150_v41 = vpop.permute.xlu1 %1149 }
 0x1b2   : > { %v1214_v20 = vpop.permute.xlu0 %1213  ;;  %v1720_v30 = vsel %vm1692_vm3, %v1655_v26, %v1150_v41  ;;  %v5814_v41 = vld [vmem:[#allocation34_spill] sm:$0xff] }
 0x1b3   : > { %1231 = vrot.lane.b32.xlu1 %v5806_v3, %s3427_s12  ;;  %v1783_v35 = vsel %vm1757_vm5, %v1718_v24, %v1214_v20 }
 0x1b4   : > { %1313 = vrot.lane.b32.xlu0 %v5808_v48, %s3428_s23  ;;  %v5812_v48 = vld [vmem:[#allocation37_spill] sm:$0xff] }
 0x1b5   : > { %v1216_v61 = vpop.permute.xlu1 %1215 }
 0x1b6   : > { %v1298_v2 = vpop.permute.xlu0 %1297  ;;  %v1785_v6 = vsel %vm1757_vm5, %v1720_v30, %v1216_v61  ;;  %v5815_v61 = vld [vmem:[#allocation35_spill] sm:$0xff] }
 0x1b7   : > { %1315 = vrot.lane.b32.xlu1 %v5809_v37, %s3428_s23  ;;  %v1848_v51 = vsel %vm1822_vm6, %v1783_v35, %v1298_v2  ;;  %v1111_v2 = vrot.slane %v5815_v61, 1 }
 0x1b8   : > { %1383 = vrot.lane.b32.xlu0 %v4668_v0, %s3429_s26 }
 0x1b9   : > { %v1300_v25 = vpop.permute.xlu1 %1299 }
 0x1ba   : > { %v1368_v22 = vpop.permute.xlu0 %1367  ;;  %v1850_v21 = vsel %vm1822_vm6, %v1785_v6, %v1300_v25  ;;  %v1657_v25 = vsel %vm1627_vm4, %v5785_v29, %v4252_v5 }
 0x1bb   : > { %1385 = vrot.lane.b32.xlu1 %v4680_v9, %s3429_s26  ;;  %v1913_v37 = vsel %vm1887_vm7, %v1848_v51, %v1368_v22 }
 0x1bc   : > { %1449 = vrot.lane.b32.xlu0 %v5810_v15, %s3430_s27 }
 0x1bd   : > { %v1370_v34 = vpop.permute.xlu1 %1369 }
 0x1be   : > { %v1434_v62 = vpop.permute.xlu0 %1433  ;;  %v1915_v12 = vsel %vm1887_vm7, %v1850_v21, %v1370_v34 }
 0x1bf   : > { %1451 = vrot.lane.b32.xlu1 %v3969_v13, %s3430_s27  ;;  %v1978_v44 = vsel %vm1952_vm8, %v1913_v37, %v1434_v62 }
 0x1c0   : > { %1533 = vrot.lane.b32.xlu0 %v3995_v57, %s3431_s29 }
 0x1c1   : > { %v1436_v55 = vpop.permute.xlu1 %1435 }
 0x1c2   : > { %v1518_v8 = vpop.permute.xlu0 %1517  ;;  %v1980_v28 = vsel %vm1952_vm8, %v1915_v12, %v1436_v55 }
 0x1c3   : > { %1535 = vrot.lane.b32.xlu1 %v5812_v48, %s3431_s29  ;;  %v2043_v58 = vsel %vm2017_vm9, %v1978_v44, %v1518_v8 }
 0x1c4   : > { %1603 = vrot.lane.b32.xlu0 %v4728_v52, %s3432_s30 }
 0x1c5   : > { %v1520_v36 = vpop.permute.xlu1 %1519 }
 0x1c6   : > { %v1588_v11 = vpop.permute.xlu0 %1587  ;;  %v2045_v18 = vsel %vm2017_vm9, %v1980_v28, %v1520_v36  ;;  %v1113_v28 = vrot.slane %v4029_v42, 1 }
 0x1c7   : > { %1605 = vrot.lane.b32.xlu1 %v4739_v7, %s3432_s30  ;;  %v2108_v10 = vsel %vm2082_vm10, %v2043_v58, %v1588_v11 }
 0x1c8   : > { %1167 = vrot.lane.b32.xlu0 %v4668_v0, %s3426_s5  ;;  %3278 = vmatprep.mubr.msk.bf16.mxu0 %vm2190_vm11, %v2108_v10 }
 0x1c9   : > { %v1590_v31 = vpop.permute.xlu1 %1589 }
 0x1ca   : > { %v2110_v4 = vsel %vm2082_vm10, %v2045_v18, %v1590_v31  ;;  %v1152_v60 = vpop.permute.xlu0 %1151  ;;  %v5817_v18 = vld [vmem:[#allocation48_spill] sm:$0xff] }
 0x1cb   : > { %1169 = vrot.lane.b32.xlu1 %v4680_v9, %s3426_s5  ;;  %3279 = vmatmul.mubr.msk.bf16.gmra.mrb[24].mxu0 %vm2190_vm11, %v2110_v4  ;;  %v1722_v34 = vsel %vm1692_vm3, %v1657_v25, %v1152_v60  ;;  %v1116_v31 = vrot.slane %v5817_v18, 1  ;;  %v5818_v4 = vld [vmem:[#allocation56_spill] sm:$0xff] }
 0x1cc   : > { %1233 = vrot.lane.b32.xlu0 %v5810_v15, %s3427_s12  ;;  %v1661_v60 = vsel %vm1627_vm4, %v5790_v63, %v5818_v4 }
 0x1cd   : > { %v1154_v50 = vpop.permute.xlu1 %1153 }
 0x1ce   : > { %v1218_v17 = vpop.permute.xlu0 %1217  ;;  %v1724_v29 = vsel %vm1692_vm3, %v1659_v32, %v1154_v50 }
 0x1cf   : > { %1235 = vrot.lane.b32.xlu1 %v3969_v13, %s3427_s12  ;;  %v1787_v62 = vsel %vm1757_vm5, %v1722_v34, %v1218_v17  ;;  %v5819_v17 = vld [vmem:[#allocation51_spill] sm:$0xff] }
 0x1d0   : > { %1317 = vrot.lane.b32.xlu0 %v3995_v57, %s3428_s23  ;;  %v1109_v57 = vrot.slane %v5814_v41, 1 }
 0x1d1   : > { %v1220_v23 = vpop.permute.xlu1 %1219 }
 0x1d2   : > { %v1302_v0 = vpop.permute.xlu0 %1301  ;;  %v4787_v1 = vsel %vm1042_vm1, %v1108_v59, %v1109_v57  ;;  %v4798_v54 = vsel %vm1042_vm1, %v1109_v57, %v1111_v2  ;;  %v1789_v43 = vsel %vm1757_vm5, %v1724_v29, %v1220_v23  ;;  %v5821_v59 = vld [vmem:[#allocation53_spill] sm:$0xff] }
 0x1d3   : > { %1319 = vrot.lane.b32.xlu1 %v5812_v48, %s3428_s23  ;;  %v1852_v5 = vsel %vm1822_vm6, %v1787_v62, %v1302_v0 }
 0x1d4   : > { %1387 = vrot.lane.b32.xlu0 %v4728_v52, %s3429_s26 }
 0x1d5   : > { %v1304_v9 = vpop.permute.xlu1 %1303 }
 0x1d6   : > { %v1372_v47 = vpop.permute.xlu0 %1371  ;;  %v1854_v45 = vsel %vm1822_vm6, %v1789_v43, %v1304_v9  ;;  %v5820_v9 = vld [vmem:[#allocation57_spill] sm:$0xff] }
 0x1d7   : > { %1389 = vrot.lane.b32.xlu1 %v4739_v7, %s3429_s26  ;;  %v1917_v55 = vsel %vm1887_vm7, %v1852_v5, %v1372_v47  ;;  %v1663_v47 = vsel %vm1627_vm4, %v5791_v39, %v5820_v9 }
 0x1d8   : > { %1453 = vrot.lane.b32.xlu0 %v5813_v49, %s3430_s27 }
 0x1d9   : > { %v1374_v16 = vpop.permute.xlu1 %1373 }
 0x1da   : > { %v1438_v20 = vpop.permute.xlu0 %1437  ;;  %v1919_v26 = vsel %vm1887_vm7, %v1854_v45, %v1374_v16 }
 0x1db   : > { %1455 = vrot.lane.b32.xlu1 %v5814_v41, %s3430_s27  ;;  %v1982_v27 = vsel %vm1952_vm8, %v1917_v55, %v1438_v20 }
 0x1dc   : > { %1537 = vrot.lane.b32.xlu0 %v4018_v40, %s3431_s29 }
 0x1dd   : > { %v1440_v22 = vpop.permute.xlu1 %1439 }
 0x1de   : > { %v1522_v38 = vpop.permute.xlu0 %1521  ;;  %v1984_v8 = vsel %vm1952_vm8, %v1919_v26, %v1440_v22 }
 0x1df   : > { %1539 = vrot.lane.b32.xlu1 %v4038_v33, %s3431_s29  ;;  %v2047_v35 = vsel %vm2017_vm9, %v1982_v27, %v1522_v38 }
 0x1e0   : > { %1607 = vrot.lane.b32.xlu0 %v4787_v1, %s3432_s30 }
 0x1e1   : > { %v1524_v24 = vpop.permute.xlu1 %1523 }
 0x1e2   : > { %v1592_v48 = vpop.permute.xlu0 %1591  ;;  %v2049_v51 = vsel %vm2017_vm9, %v1984_v8, %v1524_v24 }
 0x1e3   : > { %1609 = vrot.lane.b32.xlu1 %v4798_v54, %s3432_s30  ;;  %v2112_v30 = vsel %vm2082_vm10, %v2047_v35, %v1592_v48 }
 0x1e4   : > { %1171 = vrot.lane.b32.xlu0 %v4728_v52, %s3426_s5  ;;  %3282 = vmatprep.mubr.msk.bf16.mxu0 %vm2190_vm11, %v2112_v30 }
 0x1e5   : > { %v1594_v6 = vpop.permute.xlu1 %1593 }
 0x1e6   : > { %v2114_v37 = vsel %vm2082_vm10, %v2049_v51, %v1594_v6  ;;  %v1156_v36 = vpop.permute.xlu0 %1155 }
 0x1e7   : > { %1173 = vrot.lane.b32.xlu1 %v4739_v7, %s3426_s5  ;;  %3283 = vmatmul.mubr.msk.bf16.gmra.mrb[28].mxu0 %vm2190_vm11, %v2114_v37  ;;  %v1726_v23 = vsel %vm1692_vm3, %v1661_v60, %v1156_v36 }
 0x1e8   : > { %1237 = vrot.lane.b32.xlu0 %v5813_v49, %s3427_s12 }
 0x1e9   : > { %v1158_v21 = vpop.permute.xlu1 %1157 }
 0x1ea   : > { %v1222_v44 = vpop.permute.xlu0 %1221  ;;  %v1728_v63 = vsel %vm1692_vm3, %v1663_v47, %v1158_v21 }
 0x1eb   : > { %1239 = vrot.lane.b32.xlu1 %v5814_v41, %s3427_s12  ;;  %v1791_v16 = vsel %vm1757_vm5, %v1726_v23, %v1222_v44 }
 0x1ec   : > { %1321 = vrot.lane.b32.xlu0 %v4018_v40, %s3428_s23  ;;  %v5816_v40 = vld [vmem:[#allocation46_spill] sm:$0xff] }
 0x1ed   : > { %v1224_v52 = vpop.permute.xlu1 %1223  ;;  %v1114_v10 = vrot.slane %v5816_v40, 1 }
 0x1ee   : > { %v1306_v7 = vpop.permute.xlu0 %1305  ;;  %v1793_v2 = vsel %vm1757_vm5, %v1728_v63, %v1224_v52 }
 0x1ef   : > { %1323 = vrot.lane.b32.xlu1 %v4038_v33, %s3428_s23  ;;  %v4847_v0 = vsel %vm1042_vm1, %v1113_v28, %v1114_v10  ;;  %v1856_v20 = vsel %vm1822_vm6, %v1791_v16, %v1306_v7  ;;  %v4858_v61 = vsel %vm1042_vm1, %v1114_v10, %v1116_v31  ;;  %v4920_v7 = vld [vmem:[%s3501_s28 + $0xb4] ss:$12 sps:$4 sm:$0xff]  }
 0x1f0   : > { %1391 = vrot.lane.b32.xlu0 %v4787_v1, %s3429_s26  ;;  %v5823_v10 = vld [vmem:[#allocation50_spill] sm:$0xff]  ;;  %v344_v9 = vunpack.c.l.bf16 %v4920_v7 }
 0x1f1   : > { %v1308_v12 = vpop.permute.xlu1 %1307 }
 0x1f2   : > { %v1376_v58 = vpop.permute.xlu0 %1375  ;;  %v1858_v22 = vsel %vm1822_vm6, %v1793_v2, %v1308_v12  ;;  %v4923_v12 = vld [vmem:[%s3501_s28 + $0xb8] sm:$0xff]  }
 0x1f3   : > { %1393 = vrot.lane.b32.xlu1 %v4798_v54, %s3429_s26  ;;  %v1921_v25 = vsel %vm1887_vm7, %v1856_v20, %v1376_v58  ;;  %v3191_v23 = vunpack.c.l.bf16 %v4923_v12  ;;  %v3192_v47 = vunpack.c.h.bf16 %v4923_v12  ;;  %v5824_v20 = vld [vmem:[#allocation58_spill] sm:$0xff] }
 0x1f4   : > { %1457 = vrot.lane.b32.xlu0 %v4029_v42, %s3430_s27  ;;  %v1665_v2 = vsel %vm1627_vm4, %v5795_v46, %v5824_v20 }
 0x1f5   : > { %v1378_v11 = vpop.permute.xlu1 %1377 }
 0x1f6   : > { %v1442_v33 = vpop.permute.xlu0 %1441  ;;  %v1923_v32 = vsel %vm1887_vm7, %v1858_v22, %v1378_v11  ;;  %v5822_v11 = vld [vmem:[#allocation47_spill] sm:$0xff] }
 0x1f7   : > { %1459 = vrot.lane.b32.xlu1 %v5816_v40, %s3430_s27  ;;  %v1986_v34 = vsel %vm1952_vm8, %v1921_v25, %v1442_v33  ;;  %v1118_v28 = vrot.slane %v5822_v11, 1  ;;  %v1119_v33 = vrot.slane %v5823_v10, 1 }
 0x1f8   : > { %1541 = vrot.lane.b32.xlu0 %v5819_v17, %s3431_s29 }
 0x1f9   : > { %v1444_v50 = vpop.permute.xlu1 %1443 }
 0x1fa   : > { %v1526_v57 = vpop.permute.xlu0 %1525  ;;  %v1988_v29 = vsel %vm1952_vm8, %v1923_v32, %v1444_v50  ;;  %v5825_v32 = vld [vmem:[#allocation59_spill] sm:$0xff] }
 0x1fb   : > { %1543 = vrot.lane.b32.xlu1 %v5821_v59, %s3431_s29  ;;  %v2051_v62 = vsel %vm2017_vm9, %v1986_v34, %v1526_v57  ;;  %v347_v34 = vunpack.c.h.bf16 %v4920_v7 }
 0x1fc   : > { %1611 = vrot.lane.b32.xlu0 %v4847_v0, %s3432_s30 }
 0x1fd   : > { %v1528_v39 = vpop.permute.xlu1 %1527 }
 0x1fe   : > { %v1596_v38 = vpop.permute.xlu0 %1595  ;;  %v2053_v43 = vsel %vm2017_vm9, %v1988_v29, %v1528_v39 }
 0x1ff   : > { %1613 = vrot.lane.b32.xlu1 %v4858_v61, %s3432_s30  ;;  %v2116_v5 = vsel %vm2082_vm10, %v2051_v62, %v1596_v38  ;;  %v1667_v62 = vsel %vm1627_vm4, %v5796_v19, %v5825_v32  ;;  %v474_v19 = vmul.f32 0.25, %v344_v9  ;;  %v5832_v32 = vld [vmem:[#allocation45_spill] sm:$0xff] }
 0x200   : > { %1175 = vrot.lane.b32.xlu0 %v4787_v1, %s3426_s5  ;;  %3286 = vmatprep.mubr.msk.bf16.mxu1 %vm2190_vm11, %v2116_v5  ;;  %v5826_v5 = vld [vmem:[#allocation52_spill] sm:$0xff] }
 0x201   : > { %v1598_v55 = vpop.permute.xlu1 %1597 }
 0x202   : > { %v2118_v24 = vsel %vm2082_vm10, %v2053_v43, %v1598_v55  ;;  %v4881_v45 = vpop.permute.xlu0 %1159  ;;  %v1121_v43 = vrot.slane %v5826_v5, 1  ;;  %v4956_v55 = vld [vmem:[%s3501_s28 + $0xc4] sm:$0x1]  ;;  %s522_s28 = scalar_select %p521_p8, 1.0, 0.0 }
 0x203   : > { %1177 = vrot.lane.b32.xlu1 %v4798_v54, %s3426_s5  ;;  %3287 = vmatmul.mubr.msk.bf16.vlgmr.msra.gmra.mrb[0].mxu1 %vm2190_vm11, %v2118_v24  ;;  %v4894_v54 = vld [vmem:[%s5609_s2] ss:$0 sm:$0xff] }
 0x204   : > { %1241 = vrot.lane.b32.xlu0 %v4029_v42, %s3427_s12 }
 0x205   : > { %v4883_v27 = vpop.permute.xlu1 %1161 }
 0x206   : > { %v4889_v1 = vpop.permute.xlu0 %1225 }
 0x207   : > { %1243 = vrot.lane.b32.xlu1 %v5816_v40, %s3427_s12 }
 0x208   : > { %1325 = vrot.lane.b32.xlu0 %v5819_v17, %s3428_s23 }
 0x209   : > { %v4896_v26 = vpop.permute.xlu1 %1227 }
 0x20a   : > { %v3256_v35 = vpop.f32.mrb[0].mxu0  ;;  %v1310_v30 = vpop.permute.xlu0 %1309 }
 0x20b   : > { %v2302_v48 = vadd.f32 %v3256_v35, %v4894_v54  ;;  %1327 = vrot.lane.b32.xlu1 %v5821_v59, %s3428_s23  ;;  %v2293_v8 = vpop.f32.mrb[1].mxu0  ;;  %v5827_v35 = vld [vmem:[#allocation54_spill] sm:$0xff] }
 0x20c   : > { %v2294_v51 = vadd.f32 %v4894_v54, %v2293_v8  ;;  %v3257_v6 = vpop.f32.mrb[2].mxu0  ;;  %1395 = vrot.lane.b32.xlu0 %v4847_v0, %s3429_s26 }
 0x20d   : > { %2884 = vst.msk [vmem:[%s4903_s24 + $0x10] sm:$0xff] %vm1822_vm6, %v2302_v48  ;;  %v2305_v37 = vadd.f32 %v3257_v6, %v4894_v54  ;;  %v4912_v36 = vpop.permute.xlu1 %1311  ;;  %v2296_v21 = vpop.f32.mrb[3].mxu0  ;;  %v2683_v18 = vmul.f32 %v2302_v48, %v2302_v48  ;;  %v2551_v16 = vsel %vm1822_vm6, %v2302_v48, 0.0  ;;  %v4961_v48 = vsel %vm1042_vm1, %v1118_v28, %v1119_v33 }
 0x20e   : > { %v2681_v44 = vmul.f32 %v2294_v51, %v2294_v51  ;;  %2882 = vst.msk [vmem:[%s4903_s24] sm:$0xff] %vm1822_vm6, %v2294_v51  ;;  %v2297_v52 = vadd.f32 %v4894_v54, %v2296_v21  ;;  %v1380_v58 = vpop.permute.xlu0 %1379  ;;  %v2548_v31 = vsel %vm1822_vm6, %v2294_v51, 0.0  ;;  %v1730_v51 = vsel %vm1692_vm3, %v1665_v2, %v4881_v45 }
 0x20f   : > { %2885 = vst.msk [vmem:[%s4903_s24 + $0x18] sm:$0xff] %vm1822_vm6, %v2305_v37  ;;  %1397 = vrot.lane.b32.xlu1 %v4858_v61, %s3429_s26  ;;  %v2684_v57 = vmul.f32 %v2305_v37, %v2305_v37  ;;  %v2748_v38 = vsel %vm1822_vm6, %v2683_v18, 0.0  ;;  %v2553_v29 = vsel %vm1822_vm6, %v2305_v37, 0.0  ;;  %v475_v37 = vmul.f32 0.25, %v3191_v23 }
 0x210   : > { %v2549_v4 = vsel %vm1822_vm6, %v2297_v52, 0.0  ;;  %v2682_v60 = vmul.f32 %v2297_v52, %v2297_v52  ;;  %2883 = vst.msk [vmem:[%s4903_s24 + $0x8] sm:$0xff] %vm1822_vm6, %v2297_v52  ;;  %1461 = vrot.lane.b32.xlu0 %v5822_v11, %s3430_s27  ;;  %v2745_v59 = vsel %vm1822_vm6, %v2681_v44, 0.0  ;;  %v476_v21 = vmul.f32 0.25, %v3192_v47  ;;  %v5828_v52 = vld [vmem:[#allocation55_spill] sm:$0xff] }
 0x211   : > { %v2550_v50 = vadd.f32 %v2549_v4, %v2548_v31  ;;  %v1382_v17 = vpop.permute.xlu1 %1381  ;;  %v2750_v6 = vsel %vm1822_vm6, %v2684_v57, 0.0  ;;  %v1795_v44 = vsel %vm1757_vm5, %v1730_v51, %v4889_v1  ;;  %v477_v45 = vmul.f32 0.25, %v347_v34  ;;  %v5829_v57 = vld [vmem:[#allocation41_spill] sm:$0xff] }
 0x212   : > { %v2746_v63 = vsel %vm1822_vm6, %v2682_v60, 0.0  ;;  %v1446_v22 = vpop.permute.xlu0 %1445  ;;  %v348_v31 = vunpack.c.l.bf16 %v4956_v55  ;;  %v1732_v4 = vsel %vm1692_vm3, %v1667_v62, %v4883_v27  ;;  %v1860_v60 = vsel %vm1822_vm6, %v1795_v44, %v1310_v30  ;;  %v5830_v30 = vld [vmem:[#allocation42_spill] sm:$0xff] }
 0x213   : > { %v2552_v25 = vadd.f32 %v2551_v16, %v2550_v50  ;;  %v2747_v39 = vadd.f32 %v2746_v63, %v2745_v59  ;;  %1463 = vrot.lane.b32.xlu1 %v5823_v10, %s3430_s27  ;;  %v4987_v50 = vsel %vm1042_vm1, %v1119_v33, %v1121_v43  ;;  %v1797_v1 = vsel %vm1757_vm5, %v1732_v4, %v4896_v26  ;;  %v5831_v33 = vld [vmem:[#allocation44_spill] sm:$0xff] }
 0x214   : > { %1545 = vrot.lane.b32.xlu0 %v5827_v35, %s3431_s29  ;;  %v1925_v16 = vsel %vm1887_vm7, %v1860_v60, %v1380_v58  ;;  %v514_v63 = vadd.f32 %v474_v19, %v5829_v57  ;;  %v1862_v20 = vsel %vm1822_vm6, %v1797_v1, %v4912_v36  ;;  %v515_v2 = vadd.f32 %v475_v37, %v5830_v30  ;;  %v5833_v19 = vld [vmem:[#allocation49_spill] sm:$0xff] }
 0x215   : > { %v2749_v46 = vadd.f32 %v2748_v38, %v2747_v39  ;;  %v1448_v24 = vpop.permute.xlu1 %1447  ;;  %v4963_v8 = vadd.f32 %v2553_v29, %v2552_v25  ;;  %v1990_v27 = vsel %vm1952_vm8, %v1925_v16, %v1446_v22  ;;  %v516_v25 = vadd.f32 %v476_v21, %v5831_v33 }
 0x216   : > { %v1530_v28 = vpop.permute.xlu0 %1529  ;;  %v1927_v39 = vsel %vm1887_vm7, %v1862_v20, %v1382_v17  ;;  %v517_v62 = vadd.f32 %v477_v45, %v5832_v32  ;;  %v478_v38 = vmul.f32 0.25, %v348_v31  ;;  %v5014_v43 = vpack.c.bf16 %v515_v2, %v514_v63 }
 0x217   : > { %1547 = vrot.lane.b32.xlu1 %v5828_v52, %s3431_s29  ;;  %v4978_v18 = vadd.f32 %v2750_v6, %v2749_v46  ;;  %v2055_v26 = vsel %vm2017_vm9, %v1990_v27, %v1530_v28  ;;  %v1992_v36 = vsel %vm1952_vm8, %v1927_v39, %v1448_v24 }
 0x218   : > { %1615 = vrot.lane.b32.xlu0 %v4961_v48, %s3432_s30  ;;  %v5021_v24 = vpack.c.bf16 %v517_v62, %v516_v25  ;;  %v518_v51 = vadd.f32 %v478_v38, %v5833_v19  ;;  %v1256_v37 = vshll.u32 %v5014_v43, 16  ;;  %v1254_v57 = vshrl.u32 %v5014_v43, 16 }
 0x219   : > { %v1532_v59 = vpop.permute.xlu1 %1531 }
 0x21a   : > { %v1600_v58 = vpop.permute.xlu0 %1599  ;;  %v2057_v29 = vsel %vm2017_vm9, %v1992_v36, %v1532_v59  ;;  %v1261_v28 = vshll.u32 %v5021_v24, 16  ;;  %v5035_v45 = vpack.c.bf16 %v518_v51, %v518_v51  ;;  %v1258_v30 = vrot.slane %v1256_v37, 1 }
 0x21b   : > { %1617 = vrot.lane.b32.xlu1 %v4987_v50, %s3432_s30  ;;  %v2120_v22 = vsel %vm2082_vm10, %v2055_v26, %v1600_v58  ;;  %v1265_v25 = vshrl.u32 %v5021_v24, 16 }
 0x21c   : > { %1179 = vrot.lane.b32.xlu0 %v4847_v0, %s3426_s5  ;;  %3290 = vmatprep.mubr.msk.bf16.mxu1 %vm2190_vm11, %v2120_v22  ;;  %v1269_v39 = vshll.u32 %v5035_v45, 16 }
 0x21d   : > { %v1602_v5 = vpop.permute.xlu1 %1601 }
 0x21e   : > { %v2122_v17 = vsel %vm2082_vm10, %v2057_v29, %v1602_v5  ;;  %v5019_v46 = vpop.permute.xlu0 %1163  ;;  %v1259_v5 = vor.u32 %v1258_v30, %v1254_v57  ;;  %v539_v57 = vmul.f32 0.75, %v344_v9  ;;  %v542_v9 = vmul.f32 0.75, %v347_v34  ;;  %v5836_v34 = vld [vmem:[#allocation38_spill] sm:$0xff] }
 0x21f   : > { %1181 = vrot.lane.b32.xlu1 %v4858_v61, %s3426_s5  ;;  %3291 = vmatmul.mubr.msk.bf16.gmra.mrb[4].mxu1 %vm2190_vm11, %v2122_v17 }
 0x220   : > { %1245 = vrot.lane.b32.xlu0 %v5822_v11, %s3427_s12 }
 0x221   : > { %v5024_v6 = vpop.permute.xlu1 %1165 }
 0x222   : > { %v3260_v0 = vpop.f32.mrb[4].mxu0  ;;  %v5032_v44 = vpop.permute.xlu0 %1229 }
 0x223   : > { %v2318_v21 = vadd.f32 %v3260_v0, %v4894_v54  ;;  %1247 = vrot.lane.b32.xlu1 %v5823_v10, %s3427_s12  ;;  %v2309_v61 = vpop.f32.mrb[5].mxu0 }
 0x224   : > { %v2310_v4 = vadd.f32 %v4894_v54, %v2309_v61  ;;  %v3261_v60 = vpop.f32.mrb[6].mxu0  ;;  %1329 = vrot.lane.b32.xlu0 %v5827_v35, %s3428_s23  ;;  %v1263_v35 = vrot.slane %v1261_v28, 1  ;;  %v1271_v61 = vrot.slane %v1269_v39, 1  ;;  %v5834_v39 = vld [vmem:[#allocation60_spill] sm:$0xff] }
 0x225   : > { %2888 = vst.msk [vmem:[%s4903_s24 + $0x30] sm:$0xff] %vm1822_vm6, %v2318_v21  ;;  %v2321_v1 = vadd.f32 %v3261_v60, %v4894_v54  ;;  %v5041_v16 = vpop.permute.xlu1 %1231  ;;  %v2312_v59 = vpop.f32.mrb[7].mxu0  ;;  %v2687_v26 = vmul.f32 %v2318_v21, %v2318_v21  ;;  %v1339_v60 = vrot.slane %v5021_v24, 1 }
 0x226   : > { %v2555_v63 = vsel %vm1822_vm6, %v2310_v4, 0.0  ;;  %v2685_v20 = vmul.f32 %v2310_v4, %v2310_v4  ;;  %2886 = vst.msk [vmem:[%s4903_s24 + $0x20] sm:$0xff] %vm1822_vm6, %v2310_v4  ;;  %v2313_v27 = vadd.f32 %v4894_v54, %v2312_v59  ;;  %v1314_v33 = vpop.permute.xlu0 %1313 }
 0x227   : > { %v2556_v2 = vadd.f32 %v2555_v63, %v4963_v8  ;;  %2889 = vst.msk [vmem:[%s4903_s24 + $0x38] sm:$0xff] %vm1822_vm6, %v2321_v1  ;;  %1331 = vrot.lane.b32.xlu1 %v5828_v52, %s3428_s23  ;;  %v2559_v52 = vsel %vm1822_vm6, %v2318_v21, 0.0  ;;  %v2688_v22 = vmul.f32 %v2321_v1, %v2321_v1  ;;  %v2756_v0 = vsel %vm1822_vm6, %v2687_v26, 0.0  ;;  %v5835_v26 = vld [vmem:[#allocation36_spill] sm:$0xff] }
 0x228   : > { %v2752_v58 = vsel %vm1822_vm6, %v2685_v20, 0.0  ;;  %v2557_v32 = vsel %vm1822_vm6, %v2313_v27, 0.0  ;;  %v2686_v62 = vmul.f32 %v2313_v27, %v2313_v27  ;;  %2887 = vst.msk [vmem:[%s4903_s24 + $0x28] sm:$0xff] %vm1822_vm6, %v2313_v27  ;;  %1399 = vrot.lane.b32.xlu0 %v4961_v48, %s3429_s26  ;;  %v2561_v37 = vsel %vm1822_vm6, %v2321_v1, 0.0 }
 0x229   : > { %v2753_v8 = vadd.f32 %v2752_v58, %v4978_v18  ;;  %v2558_v38 = vadd.f32 %v2557_v32, %v2556_v2  ;;  %v1316_v36 = vpop.permute.xlu1 %1315  ;;  %v1267_v18 = vor.u32 %v1265_v25, %v1263_v35  ;;  %v1338_v21 = vrot.slane %v5014_v43, 1 }
 0x22a   : > { %v2754_v29 = vsel %vm1822_vm6, %v2686_v62, 0.0  ;;  %v1384_v51 = vpop.permute.xlu0 %1383  ;;  %v2758_v63 = vsel %vm1822_vm6, %v2688_v22, 0.0  ;;  %v5081_v20 = vsel %vm609_vm0, %v1259_v5, %v1263_v35  ;;  %v540_v1 = vmul.f32 0.75, %v3191_v23 }
 0x22b   : > { %v2560_v17 = vadd.f32 %v2559_v52, %v2558_v38  ;;  %v2755_v19 = vadd.f32 %v2754_v29, %v2753_v8  ;;  %1401 = vrot.lane.b32.xlu1 %v4987_v50, %s3429_s26  ;;  %v541_v27 = vmul.f32 0.75, %v3192_v47  ;;  %v5096_v35 = vsel %vm609_vm0, %v1267_v18, %v1271_v61  ;;  %v5838_v38 = vld [vmem:[#allocation61_spill] sm:$0xff]  ;;  %v5839_v29 = vld [vmem:[#allocation40_spill] sm:$0xff] }
 0x22c   : > { %1465 = vrot.lane.b32.xlu0 %v5014_v43, %s3430_s27  ;;  %v1341_v25 = vrot.slane %v5035_v45, 1  ;;  %v1669_v23 = vsel %vm1627_vm4, %v5800_v56, %v5834_v39  ;;  %v5105_v47 = vsel %vm1042_vm1, %v1338_v21, %v1339_v60  ;;  %v544_v58 = vadd.f32 %v539_v57, %v5835_v26  ;;  %v5837_v45 = vld [vmem:[#allocation39_spill] sm:$0xff] }
 0x22d   : > { %v2757_v28 = vadd.f32 %v2756_v0, %v2755_v19  ;;  %v1386_v4 = vpop.permute.xlu1 %1385  ;;  %v5075_v59 = vadd.f32 %v2561_v37, %v2560_v17  ;;  %v1734_v7 = vsel %vm1692_vm3, %v1669_v23, %v5019_v46  ;;  %v545_v32 = vadd.f32 %v540_v1, %v5836_v34 }
 0x22e   : > { %v1450_v30 = vpop.permute.xlu0 %1449  ;;  %v549_v62 = vstv %s522_s28  ;;  %v546_v8 = vadd.f32 %v541_v27, %v5837_v45  ;;  %v1671_v56 = vsel %vm1627_vm4, %v5801_v14, %v5838_v38  ;;  %v1799_v52 = vsel %vm1757_vm5, %v1734_v7, %v5032_v44 }
 0x22f   : > { %1467 = vrot.lane.b32.xlu1 %v5021_v24, %s3430_s27  ;;  %v5091_v2 = vadd.f32 %v2758_v63, %v2757_v28  ;;  %v547_v5 = vadd.f32 %v542_v9, %v5839_v29  ;;  %v543_v46 = vmul.f32 0.75, %v348_v31  ;;  %v1736_v17 = vsel %vm1692_vm3, %v1671_v56, %v5024_v6  ;;  %v5840_v28 = vld [vmem:[#allocation43_spill] sm:$0xff] }
 0x230   : > { %1549 = vrot.lane.b32.xlu0 %v5081_v20, %s3431_s29  ;;  %v1864_v19 = vsel %vm1822_vm6, %v1799_v52, %v1314_v33  ;;  %v5126_v18 = vsel %vm1042_vm1, %v1339_v60, %v1341_v25  ;;  %v1801_v14 = vsel %vm1757_vm5, %v1736_v17, %v5041_v16  ;;  %v550_v37 = vmul.f32 %v549_v62, %v544_v58 }
 0x231   : > { %v1452_v12 = vpop.permute.xlu1 %1451  ;;  %v1929_v44 = vsel %vm1887_vm7, %v1864_v19, %v1384_v51  ;;  %v1866_v55 = vsel %vm1822_vm6, %v1801_v14, %v1316_v36  ;;  %v551_v6 = vmul.f32 %v549_v62, %v545_v32  ;;  %v552_v61 = vmul.f32 %v549_v62, %v546_v8 }
 0x232   : > { %v1534_v22 = vpop.permute.xlu0 %1533  ;;  %v1994_v31 = vsel %vm1952_vm8, %v1929_v44, %v1450_v30  ;;  %v1931_v33 = vsel %vm1887_vm7, %v1866_v55, %v1386_v4  ;;  %v553_v51 = vmul.f32 %v549_v62, %v547_v5  ;;  %v548_v60 = vadd.f32 %v543_v46, %v5840_v28 }
 0x233   : > { %1551 = vrot.lane.b32.xlu1 %v5096_v35, %s3431_s29  ;;  %v2059_v21 = vsel %vm2017_vm9, %v1994_v31, %v1534_v22  ;;  %v1996_v57 = vsel %vm1952_vm8, %v1931_v33, %v1452_v12  ;;  %v5147_v30 = vpack.c.bf16 %v551_v6, %v550_v37 }
 0x234   : > { %1619 = vrot.lane.b32.xlu0 %v5105_v47, %s3432_s30  ;;  %v554_v23 = vmul.f32 %v549_v62, %v548_v60 }
 0x235   : > { %v1536_v0 = vpop.permute.xlu1 %1535  ;;  %v1476_v45 = vshll.u32 %v5147_v30, 16 }
 0x236   : > { %v1604_v16 = vpop.permute.xlu0 %1603  ;;  %v2061_v36 = vsel %vm2017_vm9, %v1996_v57, %v1536_v0  ;;  %v608_v56 = vpack.c.bf16 %v554_v23, %v554_v23  ;;  %v5841_v23 = vld [vmem:[#allocation2_spill] sm:$0xff] }
 0x237   : > { %1621 = vrot.lane.b32.xlu1 %v5126_v18, %s3432_s30  ;;  %v2124_v63 = vsel %vm2082_vm10, %v2059_v21, %v1604_v16  ;;  %v1478_v0 = vrot.slane %v1476_v45, 1 }
 0x238   : > { %1183 = vrot.lane.b32.xlu0 %v4961_v48, %s3426_s5  ;;  %3294 = vmatprep.mubr.msk.bf16.mxu1 %vm2190_vm11, %v2124_v63  ;;  %v5155_v48 = vpack.c.bf16 %v553_v51, %v552_v61  ;;  %v1489_v33 = vshll.u32 %v608_v56, 16 }
 0x239   : > { %v1606_v1 = vpop.permute.xlu1 %1605 }
 0x23a   : > { %v2126_v4 = vsel %vm2082_vm10, %v2061_v36, %v1606_v1  ;;  %v3264_v27 = vpop.f32.mrb[8].mxu0  ;;  %v5153_v39 = vpop.permute.xlu0 %1167  ;;  %v1491_v36 = vrot.slane %v1489_v33, 1 }
 0x23b   : > { %v2334_v9 = vadd.f32 %v3264_v27, %v4894_v54  ;;  %1185 = vrot.lane.b32.xlu1 %v4987_v50, %s3426_s5  ;;  %v2325_v25 = vpop.f32.mrb[9].mxu0  ;;  %3295 = vmatmul.mubr.msk.bf16.gmra.mrb[8].mxu1 %vm2190_vm11, %v2126_v4  ;;  %v1558_v27 = vrot.slane %v5147_v30, 1 }
 0x23c   : > { %v2326_v12 = vadd.f32 %v4894_v54, %v2325_v25  ;;  %v3265_v26 = vpop.f32.mrb[10].mxu0  ;;  %1249 = vrot.lane.b32.xlu0 %v5014_v43, %s3427_s12  ;;  %v1481_v43 = vshll.u32 %v5155_v48, 16  ;;  %v1561_v25 = vrot.slane %v608_v56, 1 }
 0x23d   : > { %2892 = vst.msk [vmem:[%s4903_s24 + $0x50] sm:$0xff] %vm1822_vm6, %v2334_v9  ;;  %v2337_v58 = vadd.f32 %v3265_v26, %v4894_v54  ;;  %v5161_v7 = vpop.permute.xlu1 %1169  ;;  %v2328_v34 = vpop.f32.mrb[11].mxu0  ;;  %v2691_v52 = vmul.f32 %v2334_v9, %v2334_v9  ;;  %v2567_v19 = vsel %vm1822_vm6, %v2334_v9, 0.0 }
 0x23e   : > { %v2563_v50 = vsel %vm1822_vm6, %v2326_v12, 0.0  ;;  %v2689_v32 = vmul.f32 %v2326_v12, %v2326_v12  ;;  %2890 = vst.msk [vmem:[%s4903_s24 + $0x40] sm:$0xff] %vm1822_vm6, %v2326_v12  ;;  %v2329_v62 = vadd.f32 %v4894_v54, %v2328_v34  ;;  %v1234_v38 = vpop.permute.xlu0 %1233  ;;  %v1483_v61 = vrot.slane %v1481_v43, 1  ;;  %v5842_v34 = vld [vmem:[#allocation62_spill] sm:$0xff] }
 0x23f   : > { %v2564_v8 = vadd.f32 %v2563_v50, %v5075_v59  ;;  %2893 = vst.msk [vmem:[%s4903_s24 + $0x58] sm:$0xff] %vm1822_vm6, %v2337_v58  ;;  %1251 = vrot.lane.b32.xlu1 %v5021_v24, %s3427_s12  ;;  %v1474_v24 = vshrl.u32 %v5147_v30, 16  ;;  %v2692_v14 = vmul.f32 %v2337_v58, %v2337_v58  ;;  %v2764_v6 = vsel %vm1822_vm6, %v2691_v52, 0.0 }
 0x240   : > { %v2760_v22 = vsel %vm1822_vm6, %v2689_v32, 0.0  ;;  %v2565_v29 = vsel %vm1822_vm6, %v2329_v62, 0.0  ;;  %v2690_v5 = vmul.f32 %v2329_v62, %v2329_v62  ;;  %2891 = vst.msk [vmem:[%s4903_s24 + $0x48] sm:$0xff] %vm1822_vm6, %v2329_v62  ;;  %1333 = vrot.lane.b32.xlu0 %v5081_v20, %s3428_s23  ;;  %v2569_v20 = vsel %vm1822_vm6, %v2337_v58, 0.0 }
 0x241   : > { %v2761_v46 = vadd.f32 %v2760_v22, %v5091_v2  ;;  %v2566_v59 = vadd.f32 %v2565_v29, %v2564_v8  ;;  %v1236_v17 = vpop.permute.xlu1 %1235  ;;  %v1485_v2 = vshrl.u32 %v5155_v48, 16  ;;  %v2766_v28 = vsel %vm1822_vm6, %v2692_v14, 0.0 }
 0x242   : > { %v2762_v44 = vsel %vm1822_vm6, %v2690_v5, 0.0  ;;  %v1318_v31 = vpop.permute.xlu0 %1317  ;;  %v1479_v60 = vor.u32 %v1478_v0, %v1474_v24  ;;  %v1673_v12 = vsel %vm1627_vm4, %v5805_v53, %v5841_v23 }
 0x243   : > { %v2568_v37 = vadd.f32 %v2567_v19, %v2566_v59  ;;  %v2763_v55 = vadd.f32 %v2762_v44, %v2761_v46  ;;  %1335 = vrot.lane.b32.xlu1 %v5096_v35, %s3428_s23  ;;  %v1487_v63 = vor.u32 %v1485_v2, %v1483_v61  ;;  %v1738_v58 = vsel %vm1692_vm3, %v1673_v12, %v5153_v39  ;;  %s3087_s23 = sshll.u32 %s3411_s16, 1 }
 0x244   : > { %1403 = vrot.lane.b32.xlu0 %v5105_v47, %s3429_s26  ;;  %v1484_v4 = vsel %vm609_vm0, %v1479_v60, %v1483_v61  ;;  %v1559_v47 = vrot.slane %v5155_v48, 1  ;;  %v1803_v50 = vsel %vm1757_vm5, %v1738_v58, %v1234_v38  ;;  %s237_s25 = sadd.s32 %s3407_s15, %s3087_s23 }
 0x245   : > { %v2765_v21 = vadd.f32 %v2764_v6, %v2763_v55  ;;  %v1320_v16 = vpop.permute.xlu1 %1319  ;;  %v2570_v51 = vadd.f32 %v2569_v20, %v2568_v37  ;;  %v1868_v62 = vsel %vm1822_vm6, %v1803_v50, %v1318_v31  ;;  %v5843_v50 = vld [vmem:[#allocation63_spill] sm:$0xff]  ;;  %p238_p9 = scmp.lt.s32.totalorder %s237_s25, 3 }
 0x246   : > { %v1388_v35 = vpop.permute.xlu0 %1387  ;;  %v1562_v45 = vsel %vm1042_vm1, %v1559_v47, %v1561_v25 }
 0x247   : > { %1405 = vrot.lane.b32.xlu1 %v5126_v18, %s3429_s26  ;;  %v2767_v57 = vadd.f32 %v2766_v28, %v2765_v21  ;;  %v1492_v18 = vsel %vm609_vm0, %v1487_v63, %v1491_v36  ;;  %v1933_v8 = vsel %vm1887_vm7, %v1868_v62, %v1388_v35  ;;  %s5864_s25 = smov (!%p238_p9, %s237_s25), 3 }
 0x248   : > { %1469 = vrot.lane.b32.xlu0 %v5147_v30, %s3430_s27  ;;  %v1560_v30 = vsel %vm1042_vm1, %v1558_v27, %v1559_v47  ;;  %s3088_s16 = sshll.u32 %s5864_s25, 1 }
 0x249   : > { %v1390_v1 = vpop.permute.xlu1 %1389 }
 0x24a   : > { %v1454_v9 = vpop.permute.xlu0 %1453 }
 0x24b   : > { %1471 = vrot.lane.b32.xlu1 %v5155_v48, %s3430_s27  ;;  %v1675_v48 = vsel %vm1627_vm4, %v5806_v3, %v5842_v34  ;;  %v1998_v38 = vsel %vm1952_vm8, %v1933_v8, %v1454_v9  ;;  %s241_s27 = scalar_lea.vmem %s5611_s4, %s3088_s16 }
 0x24c   : > { %1553 = vrot.lane.b32.xlu0 %v1484_v4, %s3431_s29  ;;  %v1740_v53 = vsel %vm1692_vm3, %v1675_v48, %v5161_v7 }
 0x24d   : > { %v1456_v26 = vpop.permute.xlu1 %1455  ;;  %v1805_v39 = vsel %vm1757_vm5, %v1740_v53, %v1236_v17  ;;  %v5844_v53 = vld [vmem:[#allocation64_spill] sm:$0xff] }
 0x24e   : > { %v1538_v32 = vpop.permute.xlu0 %1537  ;;  %v1870_v3 = vsel %vm1822_vm6, %v1805_v39, %v1320_v16  ;;  %v1679_v62 = vsel %vm1627_vm4, %v3969_v13, %v5844_v53 }
 0x24f   : > { %1555 = vrot.lane.b32.xlu1 %v1492_v18, %s3431_s29  ;;  %v1935_v52 = vsel %vm1887_vm7, %v1870_v3, %v1390_v1  ;;  %v2063_v7 = vsel %vm2017_vm9, %v1998_v38, %v1538_v32  ;;  %v1677_v32 = vsel %vm1627_vm4, %v5810_v15, %v5843_v50 }
 0x250   : > { %1623 = vrot.lane.b32.xlu0 %v1560_v30, %s3432_s30  ;;  %v2000_v46 = vsel %vm1952_vm8, %v1935_v52, %v1456_v26 }
 0x251   : > { %v1540_v43 = vpop.permute.xlu1 %1539 }
 0x252   : > { %v3268_v56 = vpop.f32.mrb[12].mxu0  ;;  %v1608_v5 = vpop.permute.xlu0 %1607  ;;  %v2065_v19 = vsel %vm2017_vm9, %v2000_v46, %v1540_v43 }
 0x253   : > { %v2350_v22 = vadd.f32 %v3268_v56, %v4894_v54  ;;  %1625 = vrot.lane.b32.xlu1 %v1562_v45, %s3432_s30  ;;  %v2341_v29 = vpop.f32.mrb[13].mxu0  ;;  %v2128_v17 = vsel %vm2082_vm10, %v2063_v7, %v1608_v5 }
 0x254   : > { %v2342_v59 = vadd.f32 %v4894_v54, %v2341_v29  ;;  %v3269_v24 = vpop.f32.mrb[14].mxu0  ;;  %3298 = vmatprep.mubr.msk.bf16.mxu1 %vm2190_vm11, %v2128_v17 }
 0x255   : > { %2896 = vst.msk [vmem:[%s4903_s24 + $0x70] sm:$0xff] %vm1822_vm6, %v2350_v22  ;;  %v2353_v14 = vadd.f32 %v3269_v24, %v4894_v54  ;;  %v1610_v44 = vpop.permute.xlu1 %1609  ;;  %v2344_v0 = vpop.f32.mrb[15].mxu0  ;;  %v2695_v61 = vmul.f32 %v2350_v22, %v2350_v22  ;;  %v2575_v63 = vsel %vm1822_vm6, %v2350_v22, 0.0 }
 0x256   : > { %v2571_v37 = vsel %vm1822_vm6, %v2342_v59, 0.0  ;;  %v2693_v55 = vmul.f32 %v2342_v59, %v2342_v59  ;;  %2894 = vst.msk [vmem:[%s4903_s24 + $0x60] sm:$0xff] %vm1822_vm6, %v2342_v59  ;;  %v2130_v31 = vsel %vm2082_vm10, %v2065_v19, %v1610_v44  ;;  %v2345_v2 = vadd.f32 %v4894_v54, %v2344_v0  ;;  %v1172_v20 = vpop.permute.xlu0 %1171 }
 0x257   : > { %v2572_v6 = vadd.f32 %v2571_v37, %v2570_v51  ;;  %2897 = vst.msk [vmem:[%s4903_s24 + $0x78] sm:$0xff] %vm1822_vm6, %v2353_v14  ;;  %3299 = vmatmul.mubr.msk.bf16.gmra.mrb[12].mxu1 %vm2190_vm11, %v2130_v31  ;;  %v2696_v36 = vmul.f32 %v2353_v14, %v2353_v14  ;;  %v2772_v47 = vsel %vm1822_vm6, %v2695_v61, 0.0  ;;  %v2577_v9 = vsel %vm1822_vm6, %v2353_v14, 0.0 }
 0x258   : > { %v2768_v33 = vsel %vm1822_vm6, %v2693_v55, 0.0  ;;  %v2573_v21 = vsel %vm1822_vm6, %v2345_v2, 0.0  ;;  %v2694_v16 = vmul.f32 %v2345_v2, %v2345_v2  ;;  %2895 = vst.msk [vmem:[%s4903_s24 + $0x68] sm:$0xff] %vm1822_vm6, %v2345_v2  ;;  %v1742_v39 = vsel %vm1692_vm3, %v1677_v32, %v1172_v20 }
 0x259   : > { %v2769_v28 = vadd.f32 %v2768_v33, %v2767_v57  ;;  %v2574_v60 = vadd.f32 %v2573_v21, %v2572_v6  ;;  %v1174_v35 = vpop.permute.xlu1 %1173  ;;  %v2774_v12 = vsel %vm1822_vm6, %v2696_v36, 0.0 }
 0x25a   : > { %v2770_v51 = vsel %vm1822_vm6, %v2694_v16, 0.0  ;;  %v1238_v27 = vpop.permute.xlu0 %1237  ;;  %v1744_v8 = vsel %vm1692_vm3, %v1679_v62, %v1174_v35 }
 0x25b   : > { %v2576_v1 = vadd.f32 %v2575_v63, %v2574_v60  ;;  %v2771_v4 = vadd.f32 %v2770_v51, %v2769_v28  ;;  %v1807_v3 = vsel %vm1757_vm5, %v1742_v39, %v1238_v27 }
 0x25d   : > { %v2773_v18 = vadd.f32 %v2772_v47, %v2771_v4  ;;  %v1240_v25 = vpop.permute.xlu1 %1239  ;;  %v2578_v23 = vadd.f32 %v2577_v9, %v2576_v1 }
 0x25e   : > { %v1322_v57 = vpop.permute.xlu0 %1321  ;;  %v1809_v38 = vsel %vm1757_vm5, %v1744_v8, %v1240_v25  ;;  %v5845_v8 = vld [vmem:[#allocation65_spill] sm:$0xff] }
 0x25f   : > { %v2775_v26 = vadd.f32 %v2774_v12, %v2773_v18  ;;  %v1872_v7 = vsel %vm1822_vm6, %v1807_v3, %v1322_v57  ;;  %v5846_v3 = vld [vmem:[#allocation66_spill] sm:$0xff] }
 0x261   : > { %v1324_v58 = vpop.permute.xlu1 %1323 }
 0x262   : > { %v1392_v30 = vpop.permute.xlu0 %1391  ;;  %v1874_v13 = vsel %vm1822_vm6, %v1809_v38, %v1324_v58  ;;  %v1683_v38 = vsel %vm1627_vm4, %v5814_v41, %v5846_v3 }
 0x263   : > { %v1937_v5 = vsel %vm1887_vm7, %v1872_v7, %v1392_v30 }
 0x265   : > { %v1394_v34 = vpop.permute.xlu1 %1393 }
 0x266   : > { %v1458_v48 = vpop.permute.xlu0 %1457  ;;  %v1939_v46 = vsel %vm1887_vm7, %v1874_v13, %v1394_v34 }
 0x267   : > { %v2002_v19 = vsel %vm1952_vm8, %v1937_v5, %v1458_v48 }
 0x269   : > { %v1460_v45 = vpop.permute.xlu1 %1459 }
 0x26a   : > { %v3272_v43 = vpop.f32.mrb[16].mxu0  ;;  %v1542_v15 = vpop.permute.xlu0 %1541  ;;  %v2004_v37 = vsel %vm1952_vm8, %v1939_v46, %v1460_v45 }
 0x26b   : > { %v2366_v56 = vadd.f32 %v3272_v43, %v4894_v54  ;;  %v2357_v52 = vpop.f32.mrb[17].mxu0  ;;  %v2067_v2 = vsel %vm2017_vm9, %v2002_v19, %v1542_v15  ;;  %v1681_v43 = vsel %vm1627_vm4, %v5813_v49, %v5845_v8 }
 0x26c   : > { %v2358_v22 = vadd.f32 %v4894_v54, %v2357_v52  ;;  %v3273_v29 = vpop.f32.mrb[18].mxu0 }
 0x26d   : > { %2900 = vst.msk [vmem:[%s4903_s24 + $0x90] sm:$0xff] %vm1822_vm6, %v2366_v56  ;;  %v2369_v59 = vadd.f32 %v3273_v29, %v4894_v54  ;;  %v1544_v17 = vpop.permute.xlu1 %1543  ;;  %v2360_v24 = vpop.f32.mrb[19].mxu0  ;;  %v2699_v55 = vmul.f32 %v2366_v56, %v2366_v56  ;;  %v2583_v63 = vsel %vm1822_vm6, %v2366_v56, 0.0 }
 0x26e   : > { %v2579_v14 = vsel %vm1822_vm6, %v2358_v22, 0.0  ;;  %v2697_v44 = vmul.f32 %v2358_v22, %v2358_v22  ;;  %2898 = vst.msk [vmem:[%s4903_s24 + $0x80] sm:$0xff] %vm1822_vm6, %v2358_v22  ;;  %v2361_v0 = vadd.f32 %v4894_v54, %v2360_v24  ;;  %v1612_v6 = vpop.permute.xlu0 %1611  ;;  %v2069_v28 = vsel %vm2017_vm9, %v2004_v37, %v1544_v17 }
 0x26f   : > { %v2580_v31 = vadd.f32 %v2579_v14, %v2578_v23  ;;  %2901 = vst.msk [vmem:[%s4903_s24 + $0x98] sm:$0xff] %vm1822_vm6, %v2369_v59  ;;  %v2132_v21 = vsel %vm2082_vm10, %v2067_v2, %v1612_v6  ;;  %v2700_v36 = vmul.f32 %v2369_v59, %v2369_v59  ;;  %v2780_v9 = vsel %vm1822_vm6, %v2699_v55, 0.0 }
 0x270   : > { %v2776_v20 = vsel %vm1822_vm6, %v2697_v44, 0.0  ;;  %v2581_v61 = vsel %vm1822_vm6, %v2361_v0, 0.0  ;;  %v2698_v33 = vmul.f32 %v2361_v0, %v2361_v0  ;;  %2899 = vst.msk [vmem:[%s4903_s24 + $0x88] sm:$0xff] %vm1822_vm6, %v2361_v0  ;;  %3302 = vmatprep.mubr.msk.bf16.mxu1 %vm2190_vm11, %v2132_v21  ;;  %v2585_v18 = vsel %vm1822_vm6, %v2369_v59, 0.0 }
 0x271   : > { %v2777_v16 = vadd.f32 %v2776_v20, %v2775_v26  ;;  %v2582_v60 = vadd.f32 %v2581_v61, %v2580_v31  ;;  %v1614_v35 = vpop.permute.xlu1 %1613  ;;  %v2782_v57 = vsel %vm1822_vm6, %v2700_v36, 0.0 }
 0x272   : > { %v2778_v51 = vsel %vm1822_vm6, %v2698_v33, 0.0  ;;  %v2134_v1 = vsel %vm2082_vm10, %v2069_v28, %v1614_v35  ;;  %v1176_v47 = vpop.permute.xlu0 %1175 }
 0x273   : > { %v2584_v4 = vadd.f32 %v2583_v63, %v2582_v60  ;;  %v2779_v27 = vadd.f32 %v2778_v51, %v2777_v16  ;;  %3303 = vmatmul.mubr.msk.bf16.gmra.mrb[16].mxu1 %vm2190_vm11, %v2134_v1  ;;  %v1746_v15 = vsel %vm1692_vm3, %v1681_v43, %v1176_v47  ;;  %v5847_v43 = vld [vmem:[#allocation67_spill] sm:$0xff] }
 0x274   : > { %v1685_v3 = vsel %vm1627_vm4, %v4029_v42, %v5847_v43 }
 0x275   : > { %v2781_v25 = vadd.f32 %v2780_v9, %v2779_v27  ;;  %v1178_v23 = vpop.permute.xlu1 %1177  ;;  %v2586_v12 = vadd.f32 %v2585_v18, %v2584_v4 }
 0x276   : > { %v1242_v26 = vpop.permute.xlu0 %1241  ;;  %v1748_v7 = vsel %vm1692_vm3, %v1683_v38, %v1178_v23  ;;  %v5848_v38 = vld [vmem:[#allocation68_spill] sm:$0xff] }
 0x277   : > { %v2783_v58 = vadd.f32 %v2782_v57, %v2781_v25  ;;  %v1811_v49 = vsel %vm1757_vm5, %v1746_v15, %v1242_v26 }
 0x279   : > { %v1244_v30 = vpop.permute.xlu1 %1243 }
 0x27a   : > { %v1326_v34 = vpop.permute.xlu0 %1325  ;;  %v1813_v59 = vsel %vm1757_vm5, %v1748_v7, %v1244_v30 }
 0x27b   : > { %v1876_v17 = vsel %vm1822_vm6, %v1811_v49, %v1326_v34 }
 0x27d   : > { %v1328_v48 = vpop.permute.xlu1 %1327 }
 0x27e   : > { %v1396_v50 = vpop.permute.xlu0 %1395  ;;  %v1878_v55 = vsel %vm1822_vm6, %v1813_v59, %v1328_v48 }
 0x27f   : > { %v1941_v31 = vsel %vm1887_vm7, %v1876_v17, %v1396_v50 }
 0x281   : > { %v1398_v32 = vpop.permute.xlu1 %1397 }
 0x282   : > { %v3276_v53 = vpop.f32.mrb[20].mxu0  ;;  %v1462_v39 = vpop.permute.xlu0 %1461  ;;  %v1943_v28 = vsel %vm1887_vm7, %v1878_v55, %v1398_v32 }
 0x283   : > { %v2382_v62 = vadd.f32 %v3276_v53, %v4894_v54  ;;  %v2373_v45 = vpop.f32.mrb[21].mxu0  ;;  %v2006_v33 = vsel %vm1952_vm8, %v1941_v31, %v1462_v39 }
 0x284   : > { %v2374_v56 = vadd.f32 %v4894_v54, %v2373_v45  ;;  %v3277_v52 = vpop.f32.mrb[22].mxu0 }
 0x285   : > { %2904 = vst.msk [vmem:[%s4903_s24 + $0xb0] sm:$0xff] %vm1822_vm6, %v2382_v62  ;;  %v2385_v13 = vadd.f32 %v3277_v52, %v4894_v54  ;;  %v1464_v22 = vpop.permute.xlu1 %1463  ;;  %v2376_v29 = vpop.f32.mrb[23].mxu0  ;;  %v2703_v14 = vmul.f32 %v2382_v62, %v2382_v62  ;;  %v2591_v61 = vsel %vm1822_vm6, %v2382_v62, 0.0 }
 0x286   : > { %v2587_v5 = vsel %vm1822_vm6, %v2374_v56, 0.0  ;;  %v2701_v41 = vmul.f32 %v2374_v56, %v2374_v56  ;;  %2902 = vst.msk [vmem:[%s4903_s24 + $0xa0] sm:$0xff] %vm1822_vm6, %v2374_v56  ;;  %v2377_v46 = vadd.f32 %v4894_v54, %v2376_v29  ;;  %v1546_v19 = vpop.permute.xlu0 %1545  ;;  %v2008_v4 = vsel %vm1952_vm8, %v1943_v28, %v1464_v22 }
 0x287   : > { %v2588_v24 = vadd.f32 %v2587_v5, %v2586_v12  ;;  %2905 = vst.msk [vmem:[%s4903_s24 + $0xb8] sm:$0xff] %vm1822_vm6, %v2385_v13  ;;  %v2704_v21 = vmul.f32 %v2385_v13, %v2385_v13  ;;  %v2071_v63 = vsel %vm2017_vm9, %v2006_v33, %v1546_v19  ;;  %v2788_v51 = vsel %vm1822_vm6, %v2703_v14, 0.0 }
 0x288   : > { %v2784_v44 = vsel %vm1822_vm6, %v2701_v41, 0.0  ;;  %v2589_v0 = vsel %vm1822_vm6, %v2377_v46, 0.0  ;;  %v2702_v37 = vmul.f32 %v2377_v46, %v2377_v46  ;;  %2903 = vst.msk [vmem:[%s4903_s24 + $0xa8] sm:$0xff] %vm1822_vm6, %v2377_v46  ;;  %v2593_v1 = vsel %vm1822_vm6, %v2385_v13, 0.0 }
 0x289   : > { %v2785_v2 = vadd.f32 %v2784_v44, %v2783_v58  ;;  %v2590_v6 = vadd.f32 %v2589_v0, %v2588_v24  ;;  %v1548_v20 = vpop.permute.xlu1 %1547  ;;  %v2790_v23 = vsel %vm1822_vm6, %v2704_v21, 0.0  ;;  %v1687_v56 = vsel %vm1627_vm4, %v5816_v40, %v5848_v38 }
 0x28a   : > { %v2786_v16 = vsel %vm1822_vm6, %v2702_v37, 0.0  ;;  %v1616_v36 = vpop.permute.xlu0 %1615  ;;  %v2073_v9 = vsel %vm2017_vm9, %v2008_v4, %v1548_v20 }
 0x28b   : > { %v2592_v60 = vadd.f32 %v2591_v61, %v2590_v6  ;;  %v2787_v35 = vadd.f32 %v2786_v16, %v2785_v2  ;;  %v2136_v27 = vsel %vm2082_vm10, %v2071_v63, %v1616_v36 }
 0x28c   : > { %3306 = vmatprep.mubr.msk.bf16.mxu1 %vm2190_vm11, %v2136_v27 }
 0x28d   : > { %v2789_v47 = vadd.f32 %v2788_v51, %v2787_v35  ;;  %v1618_v18 = vpop.permute.xlu1 %1617  ;;  %v2594_v25 = vadd.f32 %v2593_v1, %v2592_v60 }
 0x28e   : > { %v2138_v12 = vsel %vm2082_vm10, %v2073_v9, %v1618_v18  ;;  %v1180_v57 = vpop.permute.xlu0 %1179 }
 0x28f   : > { %3307 = vmatmul.mubr.msk.bf16.gmra.mrb[20].mxu1 %vm2190_vm11, %v2138_v12  ;;  %v2791_v26 = vadd.f32 %v2790_v23, %v2789_v47  ;;  %v1750_v7 = vsel %vm1692_vm3, %v1685_v3, %v1180_v57  ;;  %v5850_v3 = vld [vmem:[#allocation70_spill] sm:$0xff] }
 0x290   : > { %v1691_v38 = vsel %vm1627_vm4, %v5823_v10, %v5850_v3 }
 0x291   : > { %v1182_v58 = vpop.permute.xlu1 %1181 }
 0x292   : > { %v1246_v30 = vpop.permute.xlu0 %1245  ;;  %v1752_v13 = vsel %vm1692_vm3, %v1687_v56, %v1182_v58 }
 0x293   : > { %v1815_v42 = vsel %vm1757_vm5, %v1750_v7, %v1246_v30 }
 0x295   : > { %v1248_v34 = vpop.permute.xlu1 %1247 }
 0x296   : > { %v1330_v48 = vpop.permute.xlu0 %1329  ;;  %v1817_v46 = vsel %vm1757_vm5, %v1752_v13, %v1248_v34 }
 0x297   : > { %v1880_v59 = vsel %vm1822_vm6, %v1815_v42, %v1330_v48 }
 0x299   : > { %v1332_v50 = vpop.permute.xlu1 %1331 }
 0x29a   : > { %v1400_v32 = vpop.permute.xlu0 %1399  ;;  %v1882_v37 = vsel %vm1822_vm6, %v1817_v46, %v1332_v50 }
 0x29d   : > { %v1402_v53 = vpop.permute.xlu1 %1401 }
 0x29e   : > { %v3280_v62 = vpop.f32.mrb[24].mxu0  ;;  %v1466_v8 = vpop.permute.xlu0 %1465  ;;  %v1947_v21 = vsel %vm1887_vm7, %v1882_v37, %v1402_v53  ;;  %v5383_v53 = vld [vmem:[%s5609_s2] ss:$0 sm:$0xff] }
 0x29f   : > { %v2398_v45 = vadd.f32 %v3280_v62, %v4894_v54  ;;  %v2389_v39 = vpop.f32.mrb[25].mxu0 }
 0x2a0   : > { %v2390_v52 = vadd.f32 %v4894_v54, %v2389_v39  ;;  %v3281_v15 = vpop.f32.mrb[26].mxu0 }
 0x2a1   : > { %2908 = vst.msk [vmem:[%s4903_s24 + $0xd0] sm:$0xff] %vm1822_vm6, %v2398_v45  ;;  %v2401_v22 = vadd.f32 %v3281_v15, %v4894_v54  ;;  %v1468_v29 = vpop.permute.xlu1 %1467  ;;  %v2392_v49 = vpop.f32.mrb[27].mxu0  ;;  %v2707_v19 = vmul.f32 %v2398_v45, %v2398_v45  ;;  %v2599_v6 = vsel %vm1822_vm6, %v2398_v45, 0.0 }
 0x2a2   : > { %v2595_v5 = vsel %vm1822_vm6, %v2390_v52, 0.0  ;;  %v2705_v40 = vmul.f32 %v2390_v52, %v2390_v52  ;;  %2906 = vst.msk [vmem:[%s4903_s24 + $0xc0] sm:$0xff] %vm1822_vm6, %v2390_v52  ;;  %v2393_v41 = vadd.f32 %v4894_v54, %v2392_v49  ;;  %v1550_v24 = vpop.permute.xlu0 %1549  ;;  %v1945_v54 = vsel %vm1887_vm7, %v1880_v59, %v1400_v32 }
 0x2a3   : > { %v2596_v17 = vadd.f32 %v2595_v5, %v2594_v25  ;;  %2909 = vst.msk [vmem:[%s4903_s24 + $0xd8] sm:$0xff] %vm1822_vm6, %v2401_v22  ;;  %v2010_v20 = vsel %vm1952_vm8, %v1945_v54, %v1466_v8  ;;  %v2708_v61 = vmul.f32 %v2401_v22, %v2401_v22  ;;  %v2796_v63 = vsel %vm1822_vm6, %v2707_v19, 0.0  ;;  %v5849_v8 = vld [vmem:[#allocation69_spill] sm:$0xff] }
 0x2a4   : > { %v2792_v14 = vsel %vm1822_vm6, %v2705_v40, 0.0  ;;  %v2597_v44 = vsel %vm1822_vm6, %v2393_v41, 0.0  ;;  %v2706_v0 = vmul.f32 %v2393_v41, %v2393_v41  ;;  %2907 = vst.msk [vmem:[%s4903_s24 + $0xc8] sm:$0xff] %vm1822_vm6, %v2393_v41  ;;  %v2075_v60 = vsel %vm2017_vm9, %v2010_v20, %v1550_v24 }
 0x2a5   : > { %v2793_v55 = vadd.f32 %v2792_v14, %v2791_v26  ;;  %v2598_v31 = vadd.f32 %v2597_v44, %v2596_v17  ;;  %v1552_v2 = vpop.permute.xlu1 %1551  ;;  %v2601_v36 = vsel %vm1822_vm6, %v2401_v22, 0.0  ;;  %v2012_v51 = vsel %vm1952_vm8, %v1947_v21, %v1468_v29 }
 0x2a6   : > { %v2794_v33 = vsel %vm1822_vm6, %v2706_v0, 0.0  ;;  %v1620_v35 = vpop.permute.xlu0 %1619  ;;  %v2077_v27 = vsel %vm2017_vm9, %v2012_v51, %v1552_v2  ;;  %v2798_v18 = vsel %vm1822_vm6, %v2708_v61, 0.0  ;;  %v1689_v43 = vsel %vm1627_vm4, %v5822_v11, %v5849_v8 }
 0x2a7   : > { %v2600_v16 = vadd.f32 %v2599_v6, %v2598_v31  ;;  %v2795_v28 = vadd.f32 %v2794_v33, %v2793_v55  ;;  %v2140_v1 = vsel %vm2082_vm10, %v2075_v60, %v1620_v35 }
 0x2a8   : > { %3310 = vmatprep.mubr.msk.bf16.mxu1 %vm2190_vm11, %v2140_v1 }
 0x2a9   : > { %v2797_v4 = vadd.f32 %v2796_v63, %v2795_v28  ;;  %v1622_v47 = vpop.permute.xlu1 %1621  ;;  %v2602_v9 = vadd.f32 %v2601_v36, %v2600_v16 }
 0x2aa   : > { %v2142_v25 = vsel %vm2082_vm10, %v2077_v27, %v1622_v47  ;;  %v1184_v23 = vpop.permute.xlu0 %1183 }
 0x2ab   : > { %3311 = vmatmul.mubr.msk.bf16.gmra.mrb[24].mxu1 %vm2190_vm11, %v2142_v25  ;;  %v2799_v12 = vadd.f32 %v2798_v18, %v2797_v4  ;;  %v1754_v15 = vsel %vm1692_vm3, %v1689_v43, %v1184_v23 }
 0x2ad   : > { %v1186_v57 = vpop.permute.xlu1 %1185 }
 0x2ae   : > { %v1250_v26 = vpop.permute.xlu0 %1249  ;;  %v1756_v7 = vsel %vm1692_vm3, %v1691_v38, %v1186_v57 }
 0x2af   : > { %v1819_v11 = vsel %vm1757_vm5, %v1754_v15, %v1250_v26 }
 0x2b1   : > { %v1252_v58 = vpop.permute.xlu1 %1251 }
 0x2b2   : > { %v1334_v30 = vpop.permute.xlu0 %1333  ;;  %v1821_v5 = vsel %vm1757_vm5, %v1756_v7, %v1252_v58 }
 0x2b3   : > { %v1884_v40 = vsel %vm1822_vm6, %v1819_v11, %v1334_v30 }
 0x2b5   : > { %v1336_v34 = vpop.permute.xlu1 %1335 }
 0x2b6   : > { %v1404_v48 = vpop.permute.xlu0 %1403  ;;  %v1886_v14 = vsel %vm1822_vm6, %v1821_v5, %v1336_v34 }
 0x2b7   : > { %v1949_v44 = vsel %vm1887_vm7, %v1884_v40, %v1404_v48 }
 0x2b9   : > { %v1406_v50 = vpop.permute.xlu1 %1405 }
 0x2ba   : > { %v3284_v32 = vpop.f32.mrb[28].mxu0  ;;  %v1470_v39 = vpop.permute.xlu0 %1469  ;;  %v1951_v20 = vsel %vm1887_vm7, %v1886_v14, %v1406_v50 }
 0x2bb   : > { %v2414_v62 = vadd.f32 %v5383_v53, %v3284_v32  ;;  %v2405_v45 = vpop.f32.mrb[29].mxu0  ;;  %v2014_v31 = vsel %vm1952_vm8, %v1949_v44, %v1470_v39 }
 0x2bc   : > { %v2406_v56 = vadd.f32 %v5383_v53, %v2405_v45  ;;  %v3285_v52 = vpop.f32.mrb[30].mxu0 }
 0x2bd   : > { %2912 = vst.msk [vmem:[%s4903_s24 + $0xf0] sm:$0xff] %vm1822_vm6, %v2414_v62  ;;  %v2417_v13 = vadd.f32 %v5383_v53, %v3285_v52  ;;  %v1472_v22 = vpop.permute.xlu1 %1471  ;;  %v2408_v29 = vpop.f32.mrb[31].mxu0  ;;  %v2711_v59 = vmul.f32 %v2414_v62, %v2414_v62  ;;  %v2607_v55 = vsel %vm1822_vm6, %v2414_v62, 0.0 }
 0x2be   : > { %v2603_v49 = vsel %vm1822_vm6, %v2406_v56, 0.0  ;;  %v2709_v10 = vmul.f32 %v2406_v56, %v2406_v56  ;;  %2910 = vst.msk [vmem:[%s4903_s24 + $0xe0] sm:$0xff] %vm1822_vm6, %v2406_v56  ;;  %v2409_v42 = vadd.f32 %v5383_v53, %v2408_v29  ;;  %v1554_v46 = vpop.permute.xlu0 %1553  ;;  %v2016_v35 = vsel %vm1952_vm8, %v1951_v20, %v1472_v22 }
 0x2bf   : > { %v2604_v41 = vadd.f32 %v2603_v49, %v2602_v9  ;;  %2913 = vst.msk [vmem:[%s4903_s24 + $0xf8] sm:$0xff] %vm1822_vm6, %v2417_v13  ;;  %v2712_v2 = vmul.f32 %v2417_v13, %v2417_v13  ;;  %v2079_v21 = vsel %vm2017_vm9, %v2014_v31, %v1554_v46  ;;  %v2804_v28 = vsel %vm1822_vm6, %v2711_v59, 0.0 }
 0x2c0   : > { %v2800_v17 = vsel %vm1822_vm6, %v2709_v10, 0.0  ;;  %v2605_v24 = vsel %vm1822_vm6, %v2409_v42, 0.0  ;;  %v2710_v19 = vmul.f32 %v2409_v42, %v2409_v42  ;;  %2911 = vst.msk [vmem:[%s4903_s24 + $0xe8] sm:$0xff] %vm1822_vm6, %v2409_v42  ;;  %v2609_v60 = vsel %vm1822_vm6, %v2417_v13, 0.0 }
 0x2c1   : > { %v2801_v0 = vadd.f32 %v2800_v17, %v2799_v12  ;;  %v2606_v37 = vadd.f32 %v2605_v24, %v2604_v41  ;;  %v1556_v54 = vpop.permute.xlu1 %1555  ;;  %v2806_v27 = vsel %vm1822_vm6, %v2712_v2, 0.0 }
 0x2c2   : > { %v2802_v6 = vsel %vm1822_vm6, %v2710_v19, 0.0  ;;  %v1624_v16 = vpop.permute.xlu0 %1623  ;;  %v2081_v51 = vsel %vm2017_vm9, %v2016_v35, %v1556_v54 }
 0x2c3   : > { %v2608_v61 = vadd.f32 %v2607_v55, %v2606_v37  ;;  %v2803_v33 = vadd.f32 %v2802_v6, %v2801_v0  ;;  %v2144_v63 = vsel %vm2082_vm10, %v2079_v21, %v1624_v16 }
 0x2c4   : > { %3314 = vmatprep.mubr.msk.bf16.mxu1 %vm2190_vm11, %v2144_v63 }
 0x2c5   : > { %v2805_v36 = vadd.f32 %v2804_v28, %v2803_v33  ;;  %v1626_v1 = vpop.permute.xlu1 %1625  ;;  %v2610_v4 = vadd.f32 %v2609_v60, %v2608_v61 }
 0x2c6   : > { %v2146_v47 = vsel %vm2082_vm10, %v2081_v51, %v1626_v1 }
 0x2c7   : > { %3315 = vmatmul.mubr.msk.bf16.gmra.mrb[28].mxu1 %vm2190_vm11, %v2146_v47  ;;  %v2807_v9 = vadd.f32 %v2806_v27, %v2805_v36 }
 0x2d6   : > { %v3288_v18 = vpop.f32.mrb[0].mxu1 }
 0x2d7   : > { %v2430_v25 = vadd.f32 %v5383_v53, %v3288_v18  ;;  %v2421_v23 = vpop.f32.mrb[1].mxu1 }
 0x2d8   : > { %v2422_v12 = vadd.f32 %v5383_v53, %v2421_v23  ;;  %v3289_v57 = vpop.f32.mrb[2].mxu1 }
 0x2d9   : > { %2916 = vst.msk [vmem:[%s4903_s24 + $0x110] sm:$0xff] %vm1822_vm6, %v2430_v25  ;;  %v2433_v26 = vadd.f32 %v5383_v53, %v3289_v57  ;;  %v2424_v58 = vpop.f32.mrb[3].mxu1  ;;  %v2715_v32 = vmul.f32 %v2430_v25, %v2430_v25  ;;  %v2615_v3 = vsel %vm1822_vm6, %v2430_v25, 0.0 }
 0x2da   : > { %v2611_v30 = vsel %vm1822_vm6, %v2422_v12, 0.0  ;;  %v2713_v34 = vmul.f32 %v2422_v12, %v2422_v12  ;;  %2914 = vst.msk [vmem:[%s4903_s24 + $0x100] sm:$0xff] %vm1822_vm6, %v2422_v12  ;;  %v2425_v48 = vadd.f32 %v5383_v53, %v2424_v58 }
 0x2db   : > { %v2612_v50 = vadd.f32 %v2611_v30, %v2610_v4  ;;  %2917 = vst.msk [vmem:[%s4903_s24 + $0x118] sm:$0xff] %vm1822_vm6, %v2433_v26  ;;  %v2716_v38 = vmul.f32 %v2433_v26, %v2433_v26  ;;  %v2812_v7 = vsel %vm1822_vm6, %v2715_v32, 0.0  ;;  %v2617_v13 = vsel %vm1822_vm6, %v2433_v26, 0.0 }
 0x2dc   : > { %v2808_v62 = vsel %vm1822_vm6, %v2713_v34, 0.0  ;;  %v2613_v45 = vsel %vm1822_vm6, %v2425_v48, 0.0  ;;  %v2714_v39 = vmul.f32 %v2425_v48, %v2425_v48  ;;  %2915 = vst.msk [vmem:[%s4903_s24 + $0x108] sm:$0xff] %vm1822_vm6, %v2425_v48 }
 0x2dd   : > { %v2809_v8 = vadd.f32 %v2808_v62, %v2807_v9  ;;  %v2614_v43 = vadd.f32 %v2613_v45, %v2612_v50  ;;  %v2814_v11 = vsel %vm1822_vm6, %v2716_v38, 0.0 }
 0x2de   : > { %v2810_v56 = vsel %vm1822_vm6, %v2714_v39, 0.0 }
 0x2df   : > { %v2616_v52 = vadd.f32 %v2615_v3, %v2614_v43  ;;  %v2811_v15 = vadd.f32 %v2810_v56, %v2809_v8 }
 0x2e1   : > { %v2813_v22 = vadd.f32 %v2812_v7, %v2811_v15  ;;  %v2618_v29 = vadd.f32 %v2617_v13, %v2616_v52 }
 0x2e3   : > { %v2815_v49 = vadd.f32 %v2814_v11, %v2813_v22 }
 0x2f2   : > { %v3292_v10 = vpop.f32.mrb[4].mxu1 }
 0x2f3   : > { %v2446_v42 = vadd.f32 %v5383_v53, %v3292_v10  ;;  %v2437_v5 = vpop.f32.mrb[5].mxu1 }
 0x2f4   : > { %v2438_v40 = vadd.f32 %v5383_v53, %v2437_v5  ;;  %v3293_v41 = vpop.f32.mrb[6].mxu1 }
 0x2f5   : > { %2920 = vst.msk [vmem:[%s4903_s24 + $0x130] sm:$0xff] %vm1822_vm6, %v2446_v42  ;;  %v2449_v46 = vadd.f32 %v5383_v53, %v3293_v41  ;;  %v2440_v59 = vpop.f32.mrb[7].mxu1  ;;  %v2719_v44 = vmul.f32 %v2446_v42, %v2446_v42  ;;  %v2623_v2 = vsel %vm1822_vm6, %v2446_v42, 0.0 }
 0x2f6   : > { %v2619_v17 = vsel %vm1822_vm6, %v2438_v40, 0.0  ;;  %v2717_v24 = vmul.f32 %v2438_v40, %v2438_v40  ;;  %2918 = vst.msk [vmem:[%s4903_s24 + $0x120] sm:$0xff] %vm1822_vm6, %v2438_v40  ;;  %v2441_v19 = vadd.f32 %v5383_v53, %v2440_v59 }
 0x2f7   : > { %v2620_v14 = vadd.f32 %v2619_v17, %v2618_v29  ;;  %2921 = vst.msk [vmem:[%s4903_s24 + $0x138] sm:$0xff] %vm1822_vm6, %v2449_v46  ;;  %v2720_v6 = vmul.f32 %v2449_v46, %v2449_v46  ;;  %v2820_v21 = vsel %vm1822_vm6, %v2719_v44, 0.0  ;;  %v2625_v16 = vsel %vm1822_vm6, %v2449_v46, 0.0 }
 0x2f8   : > { %v2816_v0 = vsel %vm1822_vm6, %v2717_v24, 0.0  ;;  %v2621_v37 = vsel %vm1822_vm6, %v2441_v19, 0.0  ;;  %v2718_v54 = vmul.f32 %v2441_v19, %v2441_v19  ;;  %2919 = vst.msk [vmem:[%s4903_s24 + $0x128] sm:$0xff] %vm1822_vm6, %v2441_v19 }
 0x2f9   : > { %v2817_v55 = vadd.f32 %v2816_v0, %v2815_v49  ;;  %v2622_v31 = vadd.f32 %v2621_v37, %v2620_v14  ;;  %v2822_v35 = vsel %vm1822_vm6, %v2720_v6, 0.0 }
 0x2fa   : > { %v2818_v20 = vsel %vm1822_vm6, %v2718_v54, 0.0 }
 0x2fb   : > { %v2624_v61 = vadd.f32 %v2623_v2, %v2622_v31  ;;  %v2819_v33 = vadd.f32 %v2818_v20, %v2817_v55 }
 0x2fd   : > { %v2821_v28 = vadd.f32 %v2820_v21, %v2819_v33  ;;  %v2626_v60 = vadd.f32 %v2625_v16, %v2624_v61 }
 0x2ff   : > { %v2823_v63 = vadd.f32 %v2822_v35, %v2821_v28 }
 0x30e   : > { %v3296_v36 = vpop.f32.mrb[8].mxu1 }
 0x30f   : > { %v2462_v51 = vadd.f32 %v5383_v53, %v3296_v36  ;;  %v2453_v1 = vpop.f32.mrb[9].mxu1 }
 0x310   : > { %v2454_v4 = vadd.f32 %v5383_v53, %v2453_v1  ;;  %v3297_v27 = vpop.f32.mrb[10].mxu1 }
 0x311   : > { %2924 = vst.msk [vmem:[%s4903_s24 + $0x150] sm:$0xff] %vm1822_vm6, %v2462_v51  ;;  %v2465_v47 = vadd.f32 %v5383_v53, %v3297_v27  ;;  %v2456_v9 = vpop.f32.mrb[11].mxu1  ;;  %v2723_v57 = vmul.f32 %v2462_v51, %v2462_v51  ;;  %v2631_v50 = vsel %vm1822_vm6, %v2462_v51, 0.0 }
 0x312   : > { %v2627_v18 = vsel %vm1822_vm6, %v2454_v4, 0.0  ;;  %v2721_v25 = vmul.f32 %v2454_v4, %v2454_v4  ;;  %2922 = vst.msk [vmem:[%s4903_s24 + $0x140] sm:$0xff] %vm1822_vm6, %v2454_v4  ;;  %v2457_v23 = vadd.f32 %v5383_v53, %v2456_v9 }
 0x313   : > { %v2628_v12 = vadd.f32 %v2627_v18, %v2626_v60  ;;  %2925 = vst.msk [vmem:[%s4903_s24 + $0x158] sm:$0xff] %vm1822_vm6, %v2465_v47  ;;  %v2724_v32 = vmul.f32 %v2465_v47, %v2465_v47  ;;  %v2828_v8 = vsel %vm1822_vm6, %v2723_v57, 0.0  ;;  %v2633_v43 = vsel %vm1822_vm6, %v2465_v47, 0.0 }
 0x314   : > { %v2824_v26 = vsel %vm1822_vm6, %v2721_v25, 0.0  ;;  %v2629_v58 = vsel %vm1822_vm6, %v2457_v23, 0.0  ;;  %v2722_v30 = vmul.f32 %v2457_v23, %v2457_v23  ;;  %2923 = vst.msk [vmem:[%s4903_s24 + $0x148] sm:$0xff] %vm1822_vm6, %v2457_v23 }
 0x315   : > { %v2825_v34 = vadd.f32 %v2824_v26, %v2823_v63  ;;  %v2630_v48 = vadd.f32 %v2629_v58, %v2628_v12  ;;  %v2830_v56 = vsel %vm1822_vm6, %v2724_v32, 0.0 }
 0x316   : > { %v2826_v62 = vsel %vm1822_vm6, %v2722_v30, 0.0 }
 0x317   : > { %v2632_v45 = vadd.f32 %v2631_v50, %v2630_v48  ;;  %v2827_v39 = vadd.f32 %v2826_v62, %v2825_v34 }
 0x319   : > { %v2829_v3 = vadd.f32 %v2828_v8, %v2827_v39  ;;  %v2634_v38 = vadd.f32 %v2633_v43, %v2632_v45 }
 0x31b   : > { %v2831_v52 = vadd.f32 %v2830_v56, %v2829_v3 }
 0x32a   : > { %v3300_v15 = vpop.f32.mrb[12].mxu1 }
 0x32b   : > { %v2478_v7 = vadd.f32 %v5383_v53, %v3300_v15  ;;  %v2469_v13 = vpop.f32.mrb[13].mxu1 }
 0x32c   : > { %v2470_v22 = vadd.f32 %v5383_v53, %v2469_v13  ;;  %v3301_v29 = vpop.f32.mrb[14].mxu1 }
 0x32d   : > { %2928 = vst.msk [vmem:[%s4903_s24 + $0x170] sm:$0xff] %vm1822_vm6, %v2478_v7  ;;  %v2481_v11 = vadd.f32 %v5383_v53, %v3301_v29  ;;  %v2472_v49 = vpop.f32.mrb[15].mxu1  ;;  %v2727_v41 = vmul.f32 %v2478_v7, %v2478_v7  ;;  %v2639_v14 = vsel %vm1822_vm6, %v2478_v7, 0.0 }
 0x32e   : > { %v2635_v10 = vsel %vm1822_vm6, %v2470_v22, 0.0  ;;  %v2725_v42 = vmul.f32 %v2470_v22, %v2470_v22  ;;  %2926 = vst.msk [vmem:[%s4903_s24 + $0x160] sm:$0xff] %vm1822_vm6, %v2470_v22  ;;  %v2473_v5 = vadd.f32 %v5383_v53, %v2472_v49 }
 0x32f   : > { %v2636_v40 = vadd.f32 %v2635_v10, %v2634_v38  ;;  %2929 = vst.msk [vmem:[%s4903_s24 + $0x178] sm:$0xff] %vm1822_vm6, %v2481_v11  ;;  %v2728_v44 = vmul.f32 %v2481_v11, %v2481_v11  ;;  %v2836_v55 = vsel %vm1822_vm6, %v2727_v41, 0.0  ;;  %v2641_v31 = vsel %vm1822_vm6, %v2481_v11, 0.0 }
 0x330   : > { %v2832_v46 = vsel %vm1822_vm6, %v2725_v42, 0.0  ;;  %v2637_v59 = vsel %vm1822_vm6, %v2473_v5, 0.0  ;;  %v2726_v17 = vmul.f32 %v2473_v5, %v2473_v5  ;;  %2927 = vst.msk [vmem:[%s4903_s24 + $0x168] sm:$0xff] %vm1822_vm6, %v2473_v5 }
 0x331   : > { %v2833_v24 = vadd.f32 %v2832_v46, %v2831_v52  ;;  %v2638_v19 = vadd.f32 %v2637_v59, %v2636_v40  ;;  %v2838_v20 = vsel %vm1822_vm6, %v2728_v44, 0.0 }
 0x332   : > { %v2834_v0 = vsel %vm1822_vm6, %v2726_v17, 0.0 }
 0x333   : > { %v2640_v37 = vadd.f32 %v2639_v14, %v2638_v19  ;;  %v2835_v54 = vadd.f32 %v2834_v0, %v2833_v24 }
 0x335   : > { %v2837_v2 = vadd.f32 %v2836_v55, %v2835_v54  ;;  %v2642_v6 = vadd.f32 %v2641_v31, %v2640_v37 }
 0x337   : > { %v2839_v61 = vadd.f32 %v2838_v20, %v2837_v2 }
 0x346   : > { %v3304_v33 = vpop.f32.mrb[16].mxu1 }
 0x347   : > { %v2494_v21 = vadd.f32 %v5383_v53, %v3304_v33  ;;  %v2485_v16 = vpop.f32.mrb[17].mxu1 }
 0x348   : > { %v2486_v28 = vadd.f32 %v5383_v53, %v2485_v16  ;;  %v3305_v60 = vpop.f32.mrb[18].mxu1 }
 0x349   : > { %2932 = vst.msk [vmem:[%s4903_s24 + $0x190] sm:$0xff] %vm1822_vm6, %v2494_v21  ;;  %v2497_v35 = vadd.f32 %v5383_v53, %v3305_v60  ;;  %v2488_v63 = vpop.f32.mrb[19].mxu1  ;;  %v2731_v27 = vmul.f32 %v2494_v21, %v2494_v21  ;;  %v2647_v12 = vsel %vm1822_vm6, %v2494_v21, 0.0 }
 0x34a   : > { %v2643_v36 = vsel %vm1822_vm6, %v2486_v28, 0.0  ;;  %v2729_v51 = vmul.f32 %v2486_v28, %v2486_v28  ;;  %2930 = vst.msk [vmem:[%s4903_s24 + $0x180] sm:$0xff] %vm1822_vm6, %v2486_v28  ;;  %v2489_v1 = vadd.f32 %v5383_v53, %v2488_v63 }
 0x34b   : > { %v2644_v4 = vadd.f32 %v2643_v36, %v2642_v6  ;;  %2933 = vst.msk [vmem:[%s4903_s24 + $0x198] sm:$0xff] %vm1822_vm6, %v2497_v35  ;;  %v2732_v57 = vmul.f32 %v2497_v35, %v2497_v35  ;;  %v2844_v34 = vsel %vm1822_vm6, %v2731_v27, 0.0  ;;  %v2649_v48 = vsel %vm1822_vm6, %v2497_v35, 0.0 }
 0x34c   : > { %v2840_v47 = vsel %vm1822_vm6, %v2729_v51, 0.0  ;;  %v2645_v9 = vsel %vm1822_vm6, %v2489_v1, 0.0  ;;  %v2730_v18 = vmul.f32 %v2489_v1, %v2489_v1  ;;  %2931 = vst.msk [vmem:[%s4903_s24 + $0x188] sm:$0xff] %vm1822_vm6, %v2489_v1 }
 0x34d   : > { %v2841_v25 = vadd.f32 %v2840_v47, %v2839_v61  ;;  %v2646_v23 = vadd.f32 %v2645_v9, %v2644_v4  ;;  %v2846_v62 = vsel %vm1822_vm6, %v2732_v57, 0.0 }
 0x34e   : > { %v2842_v26 = vsel %vm1822_vm6, %v2730_v18, 0.0 }
 0x34f   : > { %v2648_v58 = vadd.f32 %v2647_v12, %v2646_v23  ;;  %v2843_v30 = vadd.f32 %v2842_v26, %v2841_v25 }
 0x351   : > { %v2845_v50 = vadd.f32 %v2844_v34, %v2843_v30  ;;  %v2650_v32 = vadd.f32 %v2649_v48, %v2648_v58 }
 0x353   : > { %v2847_v45 = vadd.f32 %v2846_v62, %v2845_v50 }
 0x362   : > { %v3308_v39 = vpop.f32.mrb[20].mxu1 }
 0x363   : > { %v2510_v8 = vadd.f32 %v5383_v53, %v3308_v39  ;;  %v2501_v43 = vpop.f32.mrb[21].mxu1 }
 0x364   : > { %v2502_v3 = vadd.f32 %v5383_v53, %v2501_v43  ;;  %v3309_v38 = vpop.f32.mrb[22].mxu1 }
 0x365   : > { %2936 = vst.msk [vmem:[%s4903_s24 + $0x1b0] sm:$0xff] %vm1822_vm6, %v2510_v8  ;;  %v2513_v56 = vadd.f32 %v5383_v53, %v3309_v38  ;;  %v2504_v52 = vpop.f32.mrb[23].mxu1  ;;  %v2735_v29 = vmul.f32 %v2510_v8, %v2510_v8  ;;  %v2655_v40 = vsel %vm1822_vm6, %v2510_v8, 0.0 }
 0x366   : > { %v2651_v15 = vsel %vm1822_vm6, %v2502_v3, 0.0  ;;  %v2733_v7 = vmul.f32 %v2502_v3, %v2502_v3  ;;  %2934 = vst.msk [vmem:[%s4903_s24 + $0x1a0] sm:$0xff] %vm1822_vm6, %v2502_v3  ;;  %v2505_v13 = vadd.f32 %v5383_v53, %v2504_v52 }
 0x367   : > { %v2652_v22 = vadd.f32 %v2651_v15, %v2650_v32  ;;  %2937 = vst.msk [vmem:[%s4903_s24 + $0x1b8] sm:$0xff] %vm1822_vm6, %v2513_v56  ;;  %v2736_v41 = vmul.f32 %v2513_v56, %v2513_v56  ;;  %v2852_v24 = vsel %vm1822_vm6, %v2735_v29, 0.0  ;;  %v2657_v19 = vsel %vm1822_vm6, %v2513_v56, 0.0 }
 0x368   : > { %v2848_v11 = vsel %vm1822_vm6, %v2733_v7, 0.0  ;;  %v2653_v49 = vsel %vm1822_vm6, %v2505_v13, 0.0  ;;  %v2734_v10 = vmul.f32 %v2505_v13, %v2505_v13  ;;  %2935 = vst.msk [vmem:[%s4903_s24 + $0x1a8] sm:$0xff] %vm1822_vm6, %v2505_v13 }
 0x369   : > { %v2849_v42 = vadd.f32 %v2848_v11, %v2847_v45  ;;  %v2654_v5 = vadd.f32 %v2653_v49, %v2652_v22  ;;  %v2854_v0 = vsel %vm1822_vm6, %v2736_v41, 0.0 }
 0x36a   : > { %v2850_v46 = vsel %vm1822_vm6, %v2734_v10, 0.0 }
 0x36b   : > { %v2656_v59 = vadd.f32 %v2655_v40, %v2654_v5  ;;  %v2851_v17 = vadd.f32 %v2850_v46, %v2849_v42 }
 0x36d   : > { %v2853_v14 = vadd.f32 %v2852_v24, %v2851_v17  ;;  %v2658_v44 = vadd.f32 %v2657_v19, %v2656_v59 }
 0x36f   : > { %v2855_v37 = vadd.f32 %v2854_v0, %v2853_v14 }
 0x37e   : > { %v3312_v54 = vpop.f32.mrb[24].mxu1 }
 0x37f   : > { %v2526_v55 = vadd.f32 %v5383_v53, %v3312_v54  ;;  %v2517_v31 = vpop.f32.mrb[25].mxu1 }
 0x380   : > { %v2518_v2 = vadd.f32 %v5383_v53, %v2517_v31  ;;  %v3313_v6 = vpop.f32.mrb[26].mxu1 }
 0x381   : > { %2940 = vst.msk [vmem:[%s4903_s24 + $0x1d0] sm:$0xff] %vm1822_vm6, %v2526_v55  ;;  %v2529_v20 = vadd.f32 %v5383_v53, %v3313_v6  ;;  %v2520_v61 = vpop.f32.mrb[27].mxu1  ;;  %v2739_v60 = vmul.f32 %v2526_v55, %v2526_v55  ;;  %v2663_v4 = vsel %vm1822_vm6, %v2526_v55, 0.0 }
 0x382   : > { %v2659_v33 = vsel %vm1822_vm6, %v2518_v2, 0.0  ;;  %v2737_v21 = vmul.f32 %v2518_v2, %v2518_v2  ;;  %2938 = vst.msk [vmem:[%s4903_s24 + $0x1c0] sm:$0xff] %vm1822_vm6, %v2518_v2  ;;  %v2521_v16 = vadd.f32 %v5383_v53, %v2520_v61 }
 0x383   : > { %v2660_v28 = vadd.f32 %v2659_v33, %v2658_v44  ;;  %2941 = vst.msk [vmem:[%s4903_s24 + $0x1d8] sm:$0xff] %vm1822_vm6, %v2529_v20  ;;  %v2740_v27 = vmul.f32 %v2529_v20, %v2529_v20  ;;  %v2860_v25 = vsel %vm1822_vm6, %v2739_v60, 0.0  ;;  %v2665_v23 = vsel %vm1822_vm6, %v2529_v20, 0.0 }
 0x384   : > { %v2856_v35 = vsel %vm1822_vm6, %v2737_v21, 0.0  ;;  %v2661_v63 = vsel %vm1822_vm6, %v2521_v16, 0.0  ;;  %v2738_v36 = vmul.f32 %v2521_v16, %v2521_v16  ;;  %2939 = vst.msk [vmem:[%s4903_s24 + $0x1c8] sm:$0xff] %vm1822_vm6, %v2521_v16 }
 0x385   : > { %v2857_v51 = vadd.f32 %v2856_v35, %v2855_v37  ;;  %v2662_v1 = vadd.f32 %v2661_v63, %v2660_v28  ;;  %v2862_v26 = vsel %vm1822_vm6, %v2740_v27, 0.0 }
 0x386   : > { %v2858_v47 = vsel %vm1822_vm6, %v2738_v36, 0.0 }
 0x387   : > { %v2664_v9 = vadd.f32 %v2663_v4, %v2662_v1  ;;  %v2859_v18 = vadd.f32 %v2858_v47, %v2857_v51 }
 0x389   : > { %v2861_v12 = vadd.f32 %v2860_v25, %v2859_v18  ;;  %v2666_v57 = vadd.f32 %v2665_v23, %v2664_v9 }
 0x38b   : > { %v2863_v58 = vadd.f32 %v2862_v26, %v2861_v12 }
 0x39a   : > { %v3316_v30 = vpop.f32.mrb[28].mxu1 }
 0x39b   : > { %v2542_v34 = vadd.f32 %v5383_v53, %v3316_v30  ;;  %v2533_v48 = vpop.f32.mrb[29].mxu1 }
 0x39c   : > { %v2534_v50 = vadd.f32 %v5383_v53, %v2533_v48  ;;  %v3317_v32 = vpop.f32.mrb[30].mxu1 }
 0x39d   : > { %2944 = vst.msk [vmem:[%s4903_s24 + $0x1f0] sm:$0xff] %vm1822_vm6, %v2542_v34  ;;  %v2545_v62 = vadd.f32 %v5383_v53, %v3317_v32  ;;  %v2536_v45 = vpop.f32.mrb[31].mxu1  ;;  %v2743_v38 = vmul.f32 %v2542_v34, %v2542_v34  ;;  %v2671_v22 = vsel %vm1822_vm6, %v2542_v34, 0.0 }
 0x39e   : > { %v2667_v39 = vsel %vm1822_vm6, %v2534_v50, 0.0  ;;  %v2741_v8 = vmul.f32 %v2534_v50, %v2534_v50  ;;  %2942 = vst.msk [vmem:[%s4903_s24 + $0x1e0] sm:$0xff] %vm1822_vm6, %v2534_v50  ;;  %v2537_v43 = vadd.f32 %v5383_v53, %v2536_v45 }
 0x39f   : > { %v2668_v3 = vadd.f32 %v2667_v39, %v2666_v57  ;;  %2945 = vst.msk [vmem:[%s4903_s24 + $0x1f8] sm:$0xff] %vm1822_vm6, %v2545_v62  ;;  %v2744_v29 = vmul.f32 %v2545_v62, %v2545_v62  ;;  %v2868_v10 = vsel %vm1822_vm6, %v2743_v38, 0.0  ;;  %v2673_v42 = vsel %vm1822_vm6, %v2545_v62, 0.0 }
 0x3a0   : > { %v2864_v56 = vsel %vm1822_vm6, %v2741_v8, 0.0  ;;  %v2669_v52 = vsel %vm1822_vm6, %v2537_v43, 0.0  ;;  %v2742_v15 = vmul.f32 %v2537_v43, %v2537_v43  ;;  %2943 = vst.msk [vmem:[%s4903_s24 + $0x1e8] sm:$0xff] %vm1822_vm6, %v2537_v43 }
 0x3a1   : > { %v2865_v7 = vadd.f32 %v2864_v56, %v2863_v58  ;;  %v2670_v13 = vadd.f32 %v2669_v52, %v2668_v3  ;;  %v2870_v41 = vsel %vm1822_vm6, %v2744_v29, 0.0 }
 0x3a2   : > { %v2866_v53 = vsel %vm1822_vm6, %v2742_v15, 0.0 }
 0x3a3   : > { %v2672_v11 = vadd.f32 %v2671_v22, %v2670_v13  ;;  %v2867_v49 = vadd.f32 %v2866_v53, %v2865_v7 }
 0x3a5   : > { %v2674_v5 = vadd.f32 %v2673_v42, %v2672_v11  ;;  %v2869_v40 = vadd.f32 %v2868_v10, %v2867_v49 }
 0x3a7   : > { %v2675_v46 = vrot.slane %v2674_v5, 4  ;;  %v2871_v59 = vadd.f32 %v2870_v41, %v2869_v40 }
 0x3a9   : > { %v2676_v17 = vadd.f32 %v2675_v46, %v2674_v5  ;;  %v2872_v24 = vrot.slane %v2871_v59, 4 }
 0x3ab   : > { %v2677_v19 = vrot.slane %v2676_v17, 2  ;;  %v2873_v14 = vadd.f32 %v2872_v24, %v2871_v59 }
 0x3ad   : > { %v2678_v44 = vadd.f32 %v2677_v19, %v2676_v17  ;;  %v2874_v0 = vrot.slane %v2873_v14, 2 }
 0x3af   : > { %v2679_v37 = vrot.slane %v2678_v44, 1  ;;  %v2875_v54 = vadd.f32 %v2874_v0, %v2873_v14 }
 0x3b1   : > { %v2876_v55 = vrot.slane %v2875_v54, 1  ;;  %v2680_v31 = vadd.f32 %v2679_v37, %v2678_v44 }
 0x3b3   : > { %v2877_v2 = vadd.f32 %v2876_v55, %v2875_v54 }
 0x3b5   : > { %v2879_v6 = vsel %vm2878_vm12, %v2680_v31, %v2877_v2 }
 0x3b6   : > { %2881 = vst.msk [vmem:[%s241_s27] sm:$0x3] %vm2880_vm13, %v2879_v6 }
 0x3b7 PF: > { %s15_s19 = sadd.s32 1, %s3423_s19   ;;  %s5851_s15 = smov %s3415_s17 }
 0x3b8   : > { %p12_p10 = scmp.ge.s32.totalorder %s15_s19, 6   ;;  %s5852_s16 = smov %s3419_s18 }
 0x3b9   : > { %s5853_s17 = smov %s5856_s20  ;;  %s5854_s18 = smov %s5860_s21 }
 0x3ba   :  { %14 = sbr.rel (!%p12_p10) target bundleno = 3 (0x3), region = 75 }

</bundles_post_ra>
